<compile_context>
chip_gen: v5e
topology: v5e:2x2
jax: 0.10.0
libtpu: 0.0.40
codegen_flags: <defaults>
</compile_context>

<pallas_src>
import functools

import jax
import jax.numpy as jnp
import numpy as np
from jax.experimental import pallas as pl
from jax.experimental.pallas import tpu as pltpu


def _drl_kernel(x_ref, m_ref, wd_ref, bd_ref, w1_ref, b1_ref, o_ref, xs_ref, *,
                dilation, pad, K, Bt, compute_dtype):
    # x_ref : (Bt, C_in, Tp)    unpadded input block (Tp = lane-padded T)
    # m_ref : (Bt, 1, Tp)       mask[:, 0:1, :] rows
    # wd_ref: (C_out, K*C_in)   dilated-conv weight, taps flattened (k-major)
    # bd_ref: (C_out, 1)        dilated-conv bias
    # w1_ref: (C_out, C_out)    1x1-conv weight
    # b1_ref: (C_out, 1)        1x1-conv bias
    # o_ref : (Bt, C_out, Tp)
    # xs_ref: (K*C_in, Bt*Tp)   VMEM scratch holding the stacked tap operand
    Tp = x_ref.shape[-1]
    C_in = x_ref.shape[1]
    t_idx = jax.lax.broadcasted_iota(jnp.int32, (1, Tp), 1)

    # Stage 1: build the stacked (K*C_in, Bt*Tp) operand.  Tap k's column t
    # holds x[:, t + k*dilation - pad], zero where that index falls in the
    # conv's implicit zero halo.  Shifts go to the XLU via roll; the halo is a
    # cheap iota mask on the VPU.  Per-batch rolls mean no cross-batch leak.
    for b in range(Bt):                                  # Bt, K tiny & static
        xb_c = x_ref[b].astype(compute_dtype)            # (C_in, Tp) bf16 taps
        for k in range(K):
            off = k * dilation - pad
            if off == 0:
                tap = xb_c
            else:
                shifted = pltpu.roll(xb_c, shift=(-off) % Tp, axis=1)
                valid = (t_idx + off >= 0) & (t_idx + off < Tp)
                tap = jnp.where(valid, shifted, jnp.zeros_like(shifted))
            xs_ref[k * C_in:(k + 1) * C_in, b * Tp:(b + 1) * Tp] = tap

    # Stage 2: dilated conv as ONE MXU matmul (fp32 accumulate), ReLU,
    # then the 1x1 conv as a second MXU matmul.  Epilogue stays fp32.
    acc = jnp.dot(wd_ref[...], xs_ref[...], preferred_element_type=jnp.float32)
    h = jnp.maximum(acc + bd_ref[...], 0.0)              # ReLU(conv_dilated(x))
    out = jnp.dot(w1_ref[...], h.astype(compute_dtype),
                  preferred_element_type=jnp.float32) + b1_ref[...]   # conv_1x1

    # Stage 3: dropout (eval-mode identity) + residual + mask in fp32.
    for b in range(Bt):
        xb = x_ref[b].astype(jnp.float32)                # residual stays fp32
        ob = (xb + out[:, b * Tp:(b + 1) * Tp]) * m_ref[b]
        o_ref[b] = ob.astype(o_ref.dtype)


def _pick_bt(B, T_pad, max_lanes):
    """Largest divisor of B s.t. Bt*T_pad <= max_lanes and the grid keeps
    >=2 steps when B >= 2 (so both v7x TensorCores get work)."""
    best = 1
    for bt in range(1, B + 1):
        if B % bt:
            continue
        if bt * T_pad > max_lanes:
            continue
        if B >= 2 and B // bt < 2:
            continue
        best = max(best, bt)
    return best


def dilated_residual_layer(x, mask, w_dilated, b_dilated, w_1x1, b_1x1,
                           dilation, *, compute_dtype=jnp.bfloat16,
                           max_lanes_per_step=2048):
    """x: (B, C, T), mask: (B, Cm, T), w_dilated: (C_out, C_in, K)."""
    B, C, T = x.shape
    C_out, C_in, K = w_dilated.shape
    assert C_in == C and C_out == C, "residual add requires in_channels == out_channels"
    # Same formula as the PyTorch module; length-preserving only for odd K.
    pad = int(dilation + dilation * (K - 3) / 2)
    assert 2 * pad == dilation * (K - 1), "padding is only length-preserving for odd K"

    # Lane-dense T: pad to a multiple of 128; padded x / mask columns are zero,
    # which exactly reproduces the conv's implicit zero padding past T and is
    # masked out of the final result anyway.
    T_pad = ((T + 127) // 128) * 128
    mask_row = mask[:, 0:1, :].astype(jnp.float32)
    if T_pad != T:
        x_in = jnp.pad(x, ((0, 0), (0, 0), (0, T_pad - T)))
        mask_row = jnp.pad(mask_row, ((0, 0), (0, 0), (0, T_pad - T)))
    else:
        x_in = x

    Bt = _pick_bt(B, T_pad, max_lanes_per_step)
    nb = B // Bt

    # (C_out, C_in, K) -> (C_out, K, C_in) -> (C_out, K*C_in); cast once here
    # so the kernel never re-casts weights per grid step.
    wd_flat = jnp.transpose(w_dilated, (0, 2, 1)).reshape(C_out, K * C_in)
    wd_flat = wd_flat.astype(compute_dtype)
    w1 = w_1x1.reshape(C_out, C_out).astype(compute_dtype)
    bd = b_dilated.reshape(C_out, 1).astype(jnp.float32)
    b1 = b_1x1.reshape(C_out, 1).astype(jnp.float32)

    kernel = functools.partial(_drl_kernel, dilation=int(dilation), pad=pad,
                               K=K, Bt=Bt, compute_dtype=compute_dtype)

    act_bytes = jnp.dtype(x.dtype).itemsize
    w_bytes = jnp.dtype(compute_dtype).itemsize
    cost = pl.CostEstimate(
        flops=2 * B * T_pad * C_out * (K * C_in + C_out) + 4 * B * C_out * T_pad,
        transcendentals=0,
        bytes_accessed=(2 * B * C * T_pad + B * T_pad) * act_bytes
        + (wd_flat.size + w1.size) * w_bytes + (bd.size + b1.size) * 4,
    )

    out = pl.pallas_call(
        kernel,
        out_shape=jax.ShapeDtypeStruct((B, C_out, T_pad), x.dtype),
        grid=(nb,),
        in_specs=[
            pl.BlockSpec((Bt, C, T_pad), lambda g: (g, 0, 0)),         # x
            pl.BlockSpec((Bt, 1, T_pad), lambda g: (g, 0, 0)),         # mask row
            pl.BlockSpec((C_out, K * C_in), lambda g: (0, 0)),         # wd (flat)
            pl.BlockSpec((C_out, 1), lambda g: (0, 0)),                # bd
            pl.BlockSpec((C_out, C_out), lambda g: (0, 0)),            # w1
            pl.BlockSpec((C_out, 1), lambda g: (0, 0)),                # b1
        ],
        out_specs=pl.BlockSpec((Bt, C_out, T_pad), lambda g: (g, 0, 0)),
        scratch_shapes=[pltpu.VMEM((K * C_in, Bt * T_pad), compute_dtype)],
        compiler_params=pltpu.CompilerParams(
            dimension_semantics=("parallel",),
            vmem_limit_bytes=32 * 1024 * 1024,
        ),
        cost_estimate=cost,
    )(x_in, mask_row, wd_flat, bd, w1, b1)

    return out[:, :, :T]


def _reference(x, mask, w_dilated, b_dilated, w_1x1, b_1x1, dilation):
    K = w_dilated.shape[-1]
    pad = int(dilation + dilation * (K - 3) / 2)
    y = jax.lax.conv_general_dilated(
        x, w_dilated, window_strides=(1,), padding=[(pad, pad)],
        rhs_dilation=(dilation,), dimension_numbers=("NCH", "OIH", "NCH"))
    y = jnp.maximum(y + b_dilated[None, :, None], 0.0)
    y = jax.lax.conv_general_dilated(
        y, w_1x1, window_strides=(1,), padding=[(0, 0)],
        dimension_numbers=("NCH", "OIH", "NCH"))
    y = y + b_1x1[None, :, None]
    return (x + y) * mask[:, 0:1, :]


def _run_case(key, B, C, T, K, dilation):
    k_x, k_m, k_wd, k_bd, k_w1, k_b1 = jax.random.split(key, 6)

    x = jax.random.normal(k_x, (B, C, T), dtype=jnp.float32)
    mask = (jax.random.uniform(k_m, (B, C, T)) > 0.3).astype(jnp.float32)

    # Deterministic parameter init (Conv1d-style uniform fan-in bound).
    bound_d = 1.0 / np.sqrt(C * K)
    w_dilated = jax.random.uniform(k_wd, (C, C, K), minval=-bound_d, maxval=bound_d)
    b_dilated = jax.random.uniform(k_bd, (C,), minval=-bound_d, maxval=bound_d)
    bound_1 = 1.0 / np.sqrt(C * 1)
    w_1x1 = jax.random.uniform(k_w1, (C, C, 1), minval=-bound_1, maxval=bound_1)
    b_1x1 = jax.random.uniform(k_b1, (C,), minval=-bound_1, maxval=bound_1)

    ref = _reference(x, mask, w_dilated, b_dilated, w_1x1, b_1x1, dilation)

    # fp32 MXU operands: tight tolerance.
    out_f32 = dilated_residual_layer(x, mask, w_dilated, b_dilated, w_1x1, b_1x1,
                                     dilation, compute_dtype=jnp.float32)
    out_f32 = jax.block_until_ready(out_f32)
    np.testing.assert_allclose(np.asarray(out_f32), np.asarray(ref),
                               rtol=2e-5, atol=2e-5)

    # Default bf16 MXU operands, fp32 accumulate/epilogue: looser tolerance.
    out_bf16 = dilated_residual_layer(x, mask, w_dilated, b_dilated, w_1x1, b_1x1,
                                      dilation)
    out_bf16 = jax.block_until_ready(out_bf16)
    np.testing.assert_allclose(np.asarray(out_bf16), np.asarray(ref),
                               rtol=8e-2, atol=8e-2)


if __name__ == "__main__":
    root = jax.random.PRNGKey(0)
    # MS-TCN-style shapes, kept small.
    # Case 1: lane-dense T, batch-stacking path (Bt=2, grid of 2 steps).
    _run_case(jax.random.fold_in(root, 0), B=4, C=64, T=512, K=3, dilation=4)
    # Case 2: non-multiple-of-128 T (exercises lane padding), odd batch.
    _run_case(jax.random.fold_in(root, 1), B=3, C=64, T=300, K=3, dilation=2)
    print("KERNEL_OK")
</pallas_src>

<mosaic_0001>
module attributes {stable_mosaic.version = 11 : i64} {
  func.func @_drl_kernel(%arg0: i32, %arg1: memref<2x64x512xf32, #tpu.memory_space<vmem>>, %arg2: memref<2x1x512xf32, #tpu.memory_space<vmem>>, %arg3: memref<64x192xf32, #tpu.memory_space<vmem>>, %arg4: memref<64x1xf32, #tpu.memory_space<vmem>>, %arg5: memref<64x64xf32, #tpu.memory_space<vmem>>, %arg6: memref<64x1xf32, #tpu.memory_space<vmem>>, %arg7: memref<2x64x512xf32, #tpu.memory_space<vmem>>, %arg8: memref<192x1024xf32, #tpu.memory_space<vmem>>) attributes {dimension_semantics = [#tpu.dimension_semantics<parallel>], iteration_bounds = array<i64: 2>, scalar_prefetch = 0 : i64, scratch_operands = 1 : i64, tpu.core_type = #tpu.core_type<tc>, window_params = [{transform_indices = @transform_0, window_bounds = array<i64: 2, 64, 512>}, {transform_indices = @transform_1, window_bounds = array<i64: 2, 1, 512>}, {pipeline_mode = #tpu.pipeline_mode<synchronous>, transform_indices = @transform_2, window_bounds = array<i64: 64, 192>}, {pipeline_mode = #tpu.pipeline_mode<synchronous>, transform_indices = @transform_3, window_bounds = array<i64: 64, 1>}, {pipeline_mode = #tpu.pipeline_mode<synchronous>, transform_indices = @transform_4, window_bounds = array<i64: 64, 64>}, {pipeline_mode = #tpu.pipeline_mode<synchronous>, transform_indices = @transform_5, window_bounds = array<i64: 64, 1>}, {transform_indices = @transform_6, window_bounds = array<i64: 2, 64, 512>}]} {
    %0 = tpu.iota {dimensions = array<i32: 1>} : vector<1x512xi32>
    %c0 = arith.constant 0 : index
    %c0_0 = arith.constant 0 : index
    %c0_1 = arith.constant 0 : index
    %1 = vector.load %arg1[%c0, %c0_0, %c0_1] : memref<2x64x512xf32, #tpu.memory_space<vmem>>, vector<1x64x512xf32>
    %2 = vector.shape_cast %1 : vector<1x64x512xf32> to vector<64x512xf32>
    %c4_i32 = arith.constant 4 : i32
    %3 = tpu.dynamic_rotate %2 by %c4_i32 dim 1 : vector<64x512xf32>, i32 -> vector<64x512xf32>
    %c-4_i32 = arith.constant -4 : i32
    %4 = vector.broadcast %c-4_i32 : i32 to vector<1x512xi32>
    %5 = arith.addi %0, %4 : vector<1x512xi32>
    %c0_i32 = arith.constant 0 : i32
    %6 = vector.broadcast %c0_i32 : i32 to vector<1x512xi32>
    %7 = arith.cmpi sge, %5, %6 : vector<1x512xi32>
    %c-4_i32_2 = arith.constant -4 : i32
    %8 = vector.broadcast %c-4_i32_2 : i32 to vector<1x512xi32>
    %9 = arith.addi %0, %8 : vector<1x512xi32>
    %c512_i32 = arith.constant 512 : i32
    %10 = vector.broadcast %c512_i32 : i32 to vector<1x512xi32>
    %11 = arith.cmpi slt, %9, %10 : vector<1x512xi32>
    %12 = arith.andi %7, %11 : vector<1x512xi1>
    %cst = arith.constant 0.000000e+00 : f32
    %13 = vector.broadcast %cst : f32 to vector<64x512xf32>
    %14 = vector.shape_cast %12 : vector<1x512xi1> to vector<1x512xi1>
    %15 = vector.broadcast %14 : vector<1x512xi1> to vector<64x512xi1>
    %16 = arith.select %15, %3, %13 : vector<64x512xi1>, vector<64x512xf32>
    %c0_3 = arith.constant 0 : index
    %c0_4 = arith.constant 0 : index
    %17 = vector.load %arg8[%c0_3, %c0_4] : memref<192x1024xf32, #tpu.memory_space<vmem>>, vector<64x512xf32>
    tpu.vector_store %arg8[%c0_3, %c0_4], %16 {strides = array<i32>} : memref<192x1024xf32, #tpu.memory_space<vmem>>, vector<64x512xf32>,
    %c64 = arith.constant 64 : index
    %c0_5 = arith.constant 0 : index
    %18 = vector.load %arg8[%c64, %c0_5] : memref<192x1024xf32, #tpu.memory_space<vmem>>, vector<64x512xf32>
    tpu.vector_store %arg8[%c64, %c0_5], %2 {strides = array<i32>} : memref<192x1024xf32, #tpu.memory_space<vmem>>, vector<64x512xf32>,
    %c508_i32 = arith.constant 508 : i32
    %19 = tpu.dynamic_rotate %2 by %c508_i32 dim 1 : vector<64x512xf32>, i32 -> vector<64x512xf32>
    %c4_i32_6 = arith.constant 4 : i32
    %20 = vector.broadcast %c4_i32_6 : i32 to vector<1x512xi32>
    %21 = arith.addi %0, %20 : vector<1x512xi32>
    %c0_i32_7 = arith.constant 0 : i32
    %22 = vector.broadcast %c0_i32_7 : i32 to vector<1x512xi32>
    %23 = arith.cmpi sge, %21, %22 : vector<1x512xi32>
    %c4_i32_8 = arith.constant 4 : i32
    %24 = vector.broadcast %c4_i32_8 : i32 to vector<1x512xi32>
    %25 = arith.addi %0, %24 : vector<1x512xi32>
    %c512_i32_9 = arith.constant 512 : i32
    %26 = vector.broadcast %c512_i32_9 : i32 to vector<1x512xi32>
    %27 = arith.cmpi slt, %25, %26 : vector<1x512xi32>
    %28 = arith.andi %23, %27 : vector<1x512xi1>
    %cst_10 = arith.constant 0.000000e+00 : f32
    %29 = vector.broadcast %cst_10 : f32 to vector<64x512xf32>
    %30 = vector.shape_cast %28 : vector<1x512xi1> to vector<1x512xi1>
    %31 = vector.broadcast %30 : vector<1x512xi1> to vector<64x512xi1>
    %32 = arith.select %31, %19, %29 : vector<64x512xi1>, vector<64x512xf32>
    %c128 = arith.constant 128 : index
    %c0_11 = arith.constant 0 : index
    %33 = vector.load %arg8[%c128, %c0_11] : memref<192x1024xf32, #tpu.memory_space<vmem>>, vector<64x512xf32>
    tpu.vector_store %arg8[%c128, %c0_11], %32 {strides = array<i32>} : memref<192x1024xf32, #tpu.memory_space<vmem>>, vector<64x512xf32>,
    %c1 = arith.constant 1 : index
    %c0_12 = arith.constant 0 : index
    %c0_13 = arith.constant 0 : index
    %34 = vector.load %arg1[%c1, %c0_12, %c0_13] : memref<2x64x512xf32, #tpu.memory_space<vmem>>, vector<1x64x512xf32>
    %35 = vector.shape_cast %34 : vector<1x64x512xf32> to vector<64x512xf32>
    %c4_i32_14 = arith.constant 4 : i32
    %36 = tpu.dynamic_rotate %35 by %c4_i32_14 dim 1 : vector<64x512xf32>, i32 -> vector<64x512xf32>
    %c-4_i32_15 = arith.constant -4 : i32
    %37 = vector.broadcast %c-4_i32_15 : i32 to vector<1x512xi32>
    %38 = arith.addi %0, %37 : vector<1x512xi32>
    %c0_i32_16 = arith.constant 0 : i32
    %39 = vector.broadcast %c0_i32_16 : i32 to vector<1x512xi32>
    %40 = arith.cmpi sge, %38, %39 : vector<1x512xi32>
    %c-4_i32_17 = arith.constant -4 : i32
    %41 = vector.broadcast %c-4_i32_17 : i32 to vector<1x512xi32>
    %42 = arith.addi %0, %41 : vector<1x512xi32>
    %c512_i32_18 = arith.constant 512 : i32
    %43 = vector.broadcast %c512_i32_18 : i32 to vector<1x512xi32>
    %44 = arith.cmpi slt, %42, %43 : vector<1x512xi32>
    %45 = arith.andi %40, %44 : vector<1x512xi1>
    %cst_19 = arith.constant 0.000000e+00 : f32
    %46 = vector.broadcast %cst_19 : f32 to vector<64x512xf32>
    %47 = vector.shape_cast %45 : vector<1x512xi1> to vector<1x512xi1>
    %48 = vector.broadcast %47 : vector<1x512xi1> to vector<64x512xi1>
    %49 = arith.select %48, %36, %46 : vector<64x512xi1>, vector<64x512xf32>
    %c0_20 = arith.constant 0 : index
    %c512 = arith.constant 512 : index
    %50 = vector.load %arg8[%c0_20, %c512] : memref<192x1024xf32, #tpu.memory_space<vmem>>, vector<64x512xf32>
    tpu.vector_store %arg8[%c0_20, %c512], %49 {strides = array<i32>} : memref<192x1024xf32, #tpu.memory_space<vmem>>, vector<64x512xf32>,
    %c64_21 = arith.constant 64 : index
    %c512_22 = arith.constant 512 : index
    %51 = vector.load %arg8[%c64_21, %c512_22] : memref<192x1024xf32, #tpu.memory_space<vmem>>, vector<64x512xf32>
    tpu.vector_store %arg8[%c64_21, %c512_22], %35 {strides = array<i32>} : memref<192x1024xf32, #tpu.memory_space<vmem>>, vector<64x512xf32>,
    %c508_i32_23 = arith.constant 508 : i32
    %52 = tpu.dynamic_rotate %35 by %c508_i32_23 dim 1 : vector<64x512xf32>, i32 -> vector<64x512xf32>
    %c4_i32_24 = arith.constant 4 : i32
    %53 = vector.broadcast %c4_i32_24 : i32 to vector<1x512xi32>
    %54 = arith.addi %0, %53 : vector<1x512xi32>
    %c0_i32_25 = arith.constant 0 : i32
    %55 = vector.broadcast %c0_i32_25 : i32 to vector<1x512xi32>
    %56 = arith.cmpi sge, %54, %55 : vector<1x512xi32>
    %c4_i32_26 = arith.constant 4 : i32
    %57 = vector.broadcast %c4_i32_26 : i32 to vector<1x512xi32>
    %58 = arith.addi %0, %57 : vector<1x512xi32>
    %c512_i32_27 = arith.constant 512 : i32
    %59 = vector.broadcast %c512_i32_27 : i32 to vector<1x512xi32>
    %60 = arith.cmpi slt, %58, %59 : vector<1x512xi32>
    %61 = arith.andi %56, %60 : vector<1x512xi1>
    %cst_28 = arith.constant 0.000000e+00 : f32
    %62 = vector.broadcast %cst_28 : f32 to vector<64x512xf32>
    %63 = vector.shape_cast %61 : vector<1x512xi1> to vector<1x512xi1>
    %64 = vector.broadcast %63 : vector<1x512xi1> to vector<64x512xi1>
    %65 = arith.select %64, %52, %62 : vector<64x512xi1>, vector<64x512xf32>
    %c128_29 = arith.constant 128 : index
    %c512_30 = arith.constant 512 : index
    %66 = vector.load %arg8[%c128_29, %c512_30] : memref<192x1024xf32, #tpu.memory_space<vmem>>, vector<64x512xf32>
    tpu.vector_store %arg8[%c128_29, %c512_30], %65 {strides = array<i32>} : memref<192x1024xf32, #tpu.memory_space<vmem>>, vector<64x512xf32>,
    %c0_31 = arith.constant 0 : index
    %c0_32 = arith.constant 0 : index
    %67 = vector.load %arg3[%c0_31, %c0_32] : memref<64x192xf32, #tpu.memory_space<vmem>>, vector<64x192xf32>
    %c0_33 = arith.constant 0 : index
    %c0_34 = arith.constant 0 : index
    %68 = vector.load %arg8[%c0_33, %c0_34] : memref<192x1024xf32, #tpu.memory_space<vmem>>, vector<192x1024xf32>
    %cst_35 = arith.constant dense<0.000000e+00> : vector<64x1024xf32>
    %69 = tpu.matmul %67, %68, %cst_35 {dimension_numbers = #tpu.dot_dimension_numbers<[1], [0], [0], [1], [0, 0, 1, 1], [], []>} : vector<64x192xf32>, vector<192x1024xf32>, vector<64x1024xf32> -> vector<64x1024xf32>
    %c0_36 = arith.constant 0 : index
    %c0_37 = arith.constant 0 : index
    %70 = vector.load %arg4[%c0_36, %c0_37] : memref<64x1xf32, #tpu.memory_space<vmem>>, vector<64x1xf32>
    %71 = vector.broadcast %70 : vector<64x1xf32> to vector<64x1024xf32>
    %72 = arith.addf %69, %71 : vector<64x1024xf32>
    %cst_38 = arith.constant 0.000000e+00 : f32
    %73 = vector.broadcast %cst_38 : f32 to vector<64x1024xf32>
    %74 = arith.maximumf %72, %73 : vector<64x1024xf32>
    %c0_39 = arith.constant 0 : index
    %c0_40 = arith.constant 0 : index
    %75 = vector.load %arg5[%c0_39, %c0_40] : memref<64x64xf32, #tpu.memory_space<vmem>>, vector<64x64xf32>
    %cst_41 = arith.constant dense<0.000000e+00> : vector<64x1024xf32>
    %76 = tpu.matmul %75, %74, %cst_41 {dimension_numbers = #tpu.dot_dimension_numbers<[1], [0], [0], [1], [0, 0, 1, 1], [], []>} : vector<64x64xf32>, vector<64x1024xf32>, vector<64x1024xf32> -> vector<64x1024xf32>
    %c0_42 = arith.constant 0 : index
    %c0_43 = arith.constant 0 : index
    %77 = vector.load %arg6[%c0_42, %c0_43] : memref<64x1xf32, #tpu.memory_space<vmem>>, vector<64x1xf32>
    %78 = vector.broadcast %77 : vector<64x1xf32> to vector<64x1024xf32>
    %79 = arith.addf %76, %78 : vector<64x1024xf32>
    %c0_44 = arith.constant 0 : index
    %c0_45 = arith.constant 0 : index
    %c0_46 = arith.constant 0 : index
    %80 = vector.load %arg1[%c0_44, %c0_45, %c0_46] : memref<2x64x512xf32, #tpu.memory_space<vmem>>, vector<1x64x512xf32>
    %81 = vector.shape_cast %80 : vector<1x64x512xf32> to vector<64x512xf32>
    %82 = vector.extract_strided_slice %79 {offsets = [0, 0], sizes = [64, 512], strides = [1, 1]} : vector<64x1024xf32> to vector<64x512xf32>
    %83 = arith.addf %81, %82 : vector<64x512xf32>
    %c0_47 = arith.constant 0 : index
    %c0_48 = arith.constant 0 : index
    %c0_49 = arith.constant 0 : index
    %84 = vector.load %arg2[%c0_47, %c0_48, %c0_49] : memref<2x1x512xf32, #tpu.memory_space<vmem>>, vector<1x1x512xf32>
    %85 = vector.shape_cast %84 : vector<1x1x512xf32> to vector<1x512xf32>
    %86 = vector.broadcast %85 : vector<1x512xf32> to vector<64x512xf32>
    %87 = arith.mulf %83, %86 : vector<64x512xf32>
    %c0_50 = arith.constant 0 : index
    %c0_51 = arith.constant 0 : index
    %c0_52 = arith.constant 0 : index
    %88 = vector.load %arg7[%c0_50, %c0_51, %c0_52] : memref<2x64x512xf32, #tpu.memory_space<vmem>>, vector<1x64x512xf32>
    %89 = vector.shape_cast %88 : vector<1x64x512xf32> to vector<64x512xf32>
    %90 = vector.shape_cast %87 : vector<64x512xf32> to vector<1x64x512xf32>
    tpu.vector_store %arg7[%c0_50, %c0_51, %c0_52], %90 {strides = array<i32>} : memref<2x64x512xf32, #tpu.memory_space<vmem>>, vector<1x64x512xf32>,
    %c1_53 = arith.constant 1 : index
    %c0_54 = arith.constant 0 : index
    %c0_55 = arith.constant 0 : index
    %91 = vector.load %arg1[%c1_53, %c0_54, %c0_55] : memref<2x64x512xf32, #tpu.memory_space<vmem>>, vector<1x64x512xf32>
    %92 = vector.shape_cast %91 : vector<1x64x512xf32> to vector<64x512xf32>
    %93 = vector.extract_strided_slice %79 {offsets = [0, 512], sizes = [64, 512], strides = [1, 1]} : vector<64x1024xf32> to vector<64x512xf32>
    %94 = arith.addf %92, %93 : vector<64x512xf32>
    %c1_56 = arith.constant 1 : index
    %c0_57 = arith.constant 0 : index
    %c0_58 = arith.constant 0 : index
    %95 = vector.load %arg2[%c1_56, %c0_57, %c0_58] : memref<2x1x512xf32, #tpu.memory_space<vmem>>, vector<1x1x512xf32>
    %96 = vector.shape_cast %95 : vector<1x1x512xf32> to vector<1x512xf32>
    %97 = vector.broadcast %96 : vector<1x512xf32> to vector<64x512xf32>
    %98 = arith.mulf %94, %97 : vector<64x512xf32>
    %c1_59 = arith.constant 1 : index
    %c0_60 = arith.constant 0 : index
    %c0_61 = arith.constant 0 : index
    %99 = vector.load %arg7[%c1_59, %c0_60, %c0_61] : memref<2x64x512xf32, #tpu.memory_space<vmem>>, vector<1x64x512xf32>
    %100 = vector.shape_cast %99 : vector<1x64x512xf32> to vector<64x512xf32>
    %101 = vector.shape_cast %98 : vector<64x512xf32> to vector<1x64x512xf32>
    tpu.vector_store %arg7[%c1_59, %c0_60, %c0_61], %101 {strides = array<i32>} : memref<2x64x512xf32, #tpu.memory_space<vmem>>, vector<1x64x512xf32>,
    return
  }
  func.func @transform_0(%arg0: i32) -> (i32, i32, i32) {
    %c0_i32 = arith.constant 0 : i32
    %c0_i32_0 = arith.constant 0 : i32
    %c0_i32_1 = arith.constant 0 : i32
    return %arg0, %c0_i32, %c0_i32_0 : i32, i32, i32
  }
  func.func @transform_1(%arg0: i32) -> (i32, i32, i32) {
    %c0_i32 = arith.constant 0 : i32
    %c0_i32_0 = arith.constant 0 : i32
    %c0_i32_1 = arith.constant 0 : i32
    return %arg0, %c0_i32, %c0_i32_0 : i32, i32, i32
  }
  func.func @transform_2(%arg0: i32) -> (i32, i32) {
    %c0_i32 = arith.constant 0 : i32
    %c0_i32_0 = arith.constant 0 : i32
    %c0_i32_1 = arith.constant 0 : i32
    return %c0_i32, %c0_i32_0 : i32, i32
  }
  func.func @transform_3(%arg0: i32) -> (i32, i32) {
    %c0_i32 = arith.constant 0 : i32
    %c0_i32_0 = arith.constant 0 : i32
    %c0_i32_1 = arith.constant 0 : i32
    return %c0_i32, %c0_i32_0 : i32, i32
  }
  func.func @transform_4(%arg0: i32) -> (i32, i32) {
    %c0_i32 = arith.constant 0 : i32
    %c0_i32_0 = arith.constant 0 : i32
    %c0_i32_1 = arith.constant 0 : i32
    return %c0_i32, %c0_i32_0 : i32, i32
  }
  func.func @transform_5(%arg0: i32) -> (i32, i32) {
    %c0_i32 = arith.constant 0 : i32
    %c0_i32_0 = arith.constant 0 : i32
    %c0_i32_1 = arith.constant 0 : i32
    return %c0_i32, %c0_i32_0 : i32, i32
  }
  func.func @transform_6(%arg0: i32) -> (i32, i32, i32) {
    %c0_i32 = arith.constant 0 : i32
    %c0_i32_0 = arith.constant 0 : i32
    %c0_i32_1 = arith.constant 0 : i32
    return %arg0, %c0_i32, %c0_i32_0 : i32, i32, i32
  }
}

</mosaic_0001>

<bundles_post_ra>
// kernel: tpu_custom_call.1
= control target key start
LH: loop header
LB: loop body
LE: loop exit
PB: predicated region body
PF: predicated region fallthrough
CT: control target
= control target key end

     0   :  { %s6300_s0 = inlined_call_operand.hbm [shape: f32[4,64,512], index: 0, kind: input, shape index: {}]   ;;  %s6301_s1 = inlined_call_operand.hbm [shape: f32[4,1,512], index: 1, kind: input, shape index: {}]   ;;  %s6302_s2 = inlined_call_operand.vmem [shape: f32[64,192], index: 2, kind: input, shape index: {}]   ;;  %s6303_s3 = inlined_call_operand.vmem [shape: f32[64,1], index: 3, kind: input, shape index: {}]   ;;  %s6304_s4 = inlined_call_operand.hbm [shape: f32[64,64], index: 4, kind: input, shape index: {}]   ;;  %s6305_s5 = inlined_call_operand.vmem [shape: f32[64,1], index: 5, kind: input, shape index: {}]   ;;  %s6306_s6 = inlined_call_operand.hbm [shape: f32[4,64,512], index: 6, kind: output, shape index: {}]  }
   0x1   :  { %6375 = sst [smem:[#allocation34_spill]] %s6300_s0 }
   0x2   :  { %6376 = sst [smem:[#allocation35_spill]] %s6304_s4 }
   0x3   :  { %11 = vsyncpa [#allocation4], 0 }
   0x4   :  { %13 = vsyncpa [#allocation4 + $0x1], 0 }
   0x5   :  { %14 = vsyncpa [#allocation7], 0 }
   0x6   :  { %16 = vsyncpa [#allocation7 + $0x1], 0 }
   0x7   :  { %17 = vsyncpa [#allocation5], 0 }
   0x8   :  { %19 = vsyncpa [#allocation5 + $0x1], 0  ;;  %s3737_s21 = smov 0   ;;  %s3739_s22 = smov 0  }
   0x9   :  { %s3741_s23 = smov 0   ;;  %s3743_s24 = smov 0  }
   0xa LB: > { %6377 = sst [smem:[#allocation14_spill]] %s3684_s23  ;;  %s3758_s25 = sadd.s32 4294967295, %s3688_s24   ;;  %s3688_s24 = sphi %s3743_s24, %s6474_s24   ;;  %s3684_s23 = sphi %s3741_s23, %s6476_s23   ;;  %s3680_s22 = sphi %s3739_s22, %s6478_s22   ;;  %s3676_s21 = sphi %s3737_s21, %s6477_s21  }
   0xb   : > { %s2967_s26 = sadd.s32 4294967294, %s3688_s24   ;;  %p45_p0 = scmp.ne.s32.totalorder %s3680_s22, %s3676_s21 }
   0xc   : > { %p46_p1 = scmp.eq.s32.totalorder %s3758_s25, 0  ;;  %p179_p2 = scmp.eq.s32.totalorder %s3758_s25, 1 }
   0xd   : > { %p185_p3 = scmp.eq.s32.totalorder %s2967_s26, 1  ;;  %p2968_p5 = scmp.ge.s32.totalorder %s3688_s24, 1 }
   0xe   : > { %p3767_p4 = por %p46_p1, %p45_p0  ;;  %p192_p7 = scmp.lt.s32.totalorder %s3688_s24, 3 }
   0xf   : > { %p3772_p6 = por %p185_p3, %p45_p0  ;;  %s6381_s4 = sld [smem:[#allocation35_spill]] }
  0x10   : > { %p3780_p8 = pnand %p2968_p5, %p192_p7  ;;  %s3690_s9 = smov [#allocation8]  }
  0x11   : > { %s6379_s28 = scalar_select %p3772_p6, 1, 0 }
  0x12   : > { %p3277_p9 = pneg %p3780_p8  ;;  %s211_s10 = sshll.u32 %s3690_s9, 4  ;;  %s212_s10 = int_to_ptr.vmem [resolvable:$true] %s211_s10 }
  0x13   : > { %6380 = sst [smem:[#allocation15_spill]] %s6379_s28  ;;  %s3790_s11 = sadd.s32 1, %s3688_s24  }
  0x14   : > { %p3278_p10 = pnand %p3277_p9, %p46_p1  ;;  %6383 = sst [smem:[#allocation16_spill]] %s3790_s11 }
  0x15   : > { %s209_s7 = sshll.u32 %s6381_s4, 4  ;;  %s3691_s12 = smov 128   ;;  %s210_s7 = int_to_ptr.hbm [resolvable:$true] %s209_s7 }
  0x16   : > { %s3692_s13 = smov 8   ;;  %s29_s14 = ssub.s32 %s3688_s24, %s3790_s11 }
  0x17   : > { %3280 = dma.hbm_to_vmem [thread:$0]  (!%p3278_p10), %s210_s7, 1024, %s212_s10, [#allocation7], %s3691_s12, %s3691_s12, %s3692_s13  }
  0x18   : > { %s32_s15 = sadd.s32 1, %s3684_s23  ;;  %p30_p12 = scmp.eq.s32.totalorder %s29_s14, 0 }
  0x19   : > { %p39_p13 = scmp.ne.s32.totalorder %s3684_s23, %s3680_s22  ;;  %p40_p0 = scmp.eq.s32.totalorder %s3688_s24, 0 }
  0x1a   : > { %p3293_p3 = scmp.lt.s32.totalorder %s3688_s24, 2  ;;  %s3809_s18 = sand.u32 1, %s3684_s23  }
  0x1b   : > { %s3800_s16 = scalar_select %p30_p12, %s3684_s23, %s32_s15  }
  0x1c   : > { %p41_p5 = por %p40_p0, %p39_p13  ;;  %p3804_p7 = por %p179_p2, %p39_p13 }
  0x1d   : > { %6384 = sst [smem:[#allocation17_spill]] %s3800_s16  ;;  %s3215_s19 = sshll.u32 %s3688_s24, 9 }
  0x1e   : > { %s2971_s20 = sshll.u32 %s3809_s18, 9  ;;  %s6386_s0 = sld [smem:[#allocation34_spill]] }
  0x1f   : > { %s232_s9 = scalar_lea.vmem [#allocation3], %s2971_s20  ;;  %p3818_p2 = pnand %p3293_p3, %p41_p5 }
  0x20   : > { %s241_s10 = sshll.u32 %s232_s9, 4  ;;  %s251_s13 = sand.u32 1, %s3688_s24   ;;  %s242_s10 = int_to_ptr.vmem [resolvable:$true] %s241_s10 }
  0x21   : > { %s229_s14 = scalar_lea.sflag [#allocation4], %s3809_s18  ;;  %p3558_p10 = pneg %p3818_p2 }
  0x24   : > { %s238_s30 = scalar_lea.hbm %s6386_s0, %s3215_s19  ;;  %s3561_s26 = scalar_lea.hbm %s6386_s0, 1024 }
  0x25   : > { %s239_s7 = sshll.u32 %s238_s30, 4  ;;  %s240_s7 = int_to_ptr.hbm [resolvable:$true] %s239_s7 }
  0x26   : > { %s3554_s15 = sshra.s32 %s240_s7, 4  ;;  %s3555_s15 = int_to_ptr.hbm [resolvable:$true] %s3554_s15 }
  0x27   : > { %s3556_s4 = scalar_lea.hbm %s3555_s15, 512  ;;  %p3562_p0 = scmp.lt.s32.totalorder %s3555_s15, %s6386_s0 }
  0x28   : > { %p3557_p9 = scmp.ne.s32.totalorder %s3555_s15, %s3556_s4  ;;  %p3563_p3 = scmp.lt.s32.totalorder %s3561_s26, %s3556_s4 }
  0x2a   : > { %p3559_p12 = pnand %p3558_p10, %p3557_p9  ;;  %p3564_p5 = por %p3563_p3, %p3562_p0 }
  0x2c   : > { %p3560_p13 = pneg %p3559_p12 }
  0x2e   : > { %p3565_p11 = pnand %p3564_p5, %p3560_p13 }
  0x30   : > { %3568 = shalt.err (!%p3565_p11)
}
  0x31   : > { %s3693_s9 = smov 512   ;;  %s3694_s16 = smov 32  }
  0x32   : > { %3284 = dma.hbm_to_vmem [thread:$0]  (!%p3818_p2), %s240_s7, 8192, %s242_s10, %s229_s14, %s3693_s9, %s3693_s9, %s3694_s16  }
  0x33   : > { %s2975_s23 = sshll.u32 %s3809_s18, 3  ;;  %s3216_s11 = sshll.u32 %s3688_s24, 3 }
  0x34   : > { %s260_s28 = scalar_lea.hbm %s6301_s1, %s3216_s11  ;;  %s255_s15 = scalar_lea.vmem [#allocation6], %s2975_s23 }
  0x35   : > { %s261_s29 = sshll.u32 %s260_s28, 4  ;;  %s263_s4 = sshll.u32 %s255_s15, 4  ;;  %s262_s29 = int_to_ptr.hbm [resolvable:$true] %s261_s29  ;;  %s264_s4 = int_to_ptr.vmem [resolvable:$true] %s263_s4 }
  0x36   : > { %s252_s26 = scalar_lea.sflag [#allocation7], %s251_s13  ;;  %s3584_s30 = sshra.s32 %s262_s29, 4  ;;  %s3585_s30 = int_to_ptr.hbm [resolvable:$true] %s3584_s30 }
  0x37   : > { %s3586_s0 = scalar_lea.hbm %s3585_s30, 8  ;;  %s3591_s7 = scalar_lea.hbm %s6301_s1, 16 }
  0x38   : > { %p3587_p11 = scmp.ne.s32.totalorder %s3585_s30, %s3586_s0  ;;  %p3592_p13 = scmp.lt.s32.totalorder %s3585_s30, %s6301_s1 }
  0x39   : > { %p3593_p0 = scmp.lt.s32.totalorder %s3591_s7, %s3586_s0 }
  0x3a   : > { %p3589_p9 = pnand %p3587_p11, %p3558_p10 }
  0x3b   : > { %p3594_p3 = por %p3593_p0, %p3592_p13 }
  0x3c   : > { %p3590_p12 = pneg %p3589_p9 }
  0x3e   : > { %p3595_p5 = pnand %p3594_p3, %p3590_p12 }
  0x40   : > { %3598 = shalt.err (!%p3595_p5)
}
  0x41   : > { %s3695_s23 = smov 64   ;;  %s3696_s28 = smov 4  }
  0x42   : > { %3287 = dma.hbm_to_vmem [thread:$0]  (!%p3818_p2), %s262_s29, 128, %s264_s4, %s252_s26, %s3695_s23, %s3695_s23, %s3696_s28  }
  0x43   : > { %275 = sbr.rel (%p3780_p8) target bundleno = 878 (0x36e), region = 44 }
  0x48   : > { %s3856_s13 = sand.u32 1, %s3680_s22  }
  0x49   : > { %s2979_s14 = sshll.u32 %s3856_s13, 9  ;;  %s278_s0 = scalar_lea.sflag [#allocation4], %s3856_s13 }
  0x4a   : > { %s3862_s9 = scalar_lea.vmem [#allocation3], %s2979_s14 }
  0x4b   : > { %3659 = dma.done.wait (%p3767_p4), %s278_s0, 8192  }
  0x4c   : > { %3661 = vsyncadd (%p3767_p4), %s278_s0, 4294959104  ;;  %s287_s8 = sand.u32 1, %s3758_s25   ;;  %s2980_s12 = sshll.u32 %s3856_s13, 3 }
  0x4d   : > { %s288_s19 = scalar_lea.sflag [#allocation7], %s287_s8  ;;  %s3870_s20 = scalar_lea.vmem [#allocation6], %s2980_s12 }
  0x4e   : > { %3663 = dma.done.wait (%p3767_p4), %s288_s19, 128  }
  0x4f   : > { %3665 = vsyncadd (%p3767_p4), %s288_s19, 4294967168 }
  0x50   : > { %3667 = dma.done.wait (%p46_p1), [#allocation7], 1024  }
  0x51   : > { %3669 = vsyncadd (%p46_p1), [#allocation7], 4294966272  ;;  %v367_v0 = vld [vmem:[%s3862_s9 + $0xe0] sm:$0xff]  ;;  %v3885_v2 = vld [vmem:[%s3862_s9 + $0x88] sm:$0xff]  ;;  %s3697_s27 = smov 4   ;;  %s3698_s29 = smov 124   ;;  %v334_v47 = vlaneseq }
  0x52   : > { %v3882_v1 = vld [vmem:[%s3862_s9 + $0xc0] sm:$0xff]  ;;  %385 = vrot.lane.b32.xlu0 %v367_v0, %s3697_s27  ;;  %v360_v3 = vld [vmem:[%s3862_s9 + $0xa8] sm:$0xff]  ;;  %1439 = vmatpush.msra.mxu0 %v367_v0  ;;  %v3908_v10 = vld [vmem:[%s3862_s9 + $0xf8] sm:$0xff]  ;;  %vm1414_vm3 = vcmask 523264   ;;  %s5916_s23 = scalar_lea.vmem [#allocation9], %s2979_s14  ;;  %s3218_s14 = sshll.u32 %s3758_s25, 9 }
  0x53   : > { %383 = vrot.lane.b32.xlu1 %v3882_v1, %s3697_s27  ;;  %v3345_v4 = vpack.i.bf16 %v3885_v2, %v360_v3  ;;  %v364_v5 = vld [vmem:[%s3862_s9 + $0xc8] sm:$0xff]  ;;  %v3897_v8 = vld [vmem:[%s3862_s9 + $0xa0] sm:$0xff]  ;;  %v3923_v14 = vld [vmem:[%s3862_s9 + $0xf0] sm:$0xff]  ;;  %v4048_v49 = vand.u32 127, %v334_v47  ;;  %s2858_s0 = scalar_lea.hbm %s6306_s6, %s3218_s14  ;;  %s2859_s8 = sshll.u32 %s5916_s23, 4  ;;  %s2860_s8 = int_to_ptr.vmem [resolvable:$true] %s2859_s8 }
  0x54   : > { %v368_v6 = vld [vmem:[%s3862_s9 + $0xe8] sm:$0xff]  ;;  %1440 = vmatpush.msra.mxu0 %v3882_v1  ;;  %v3901_v9 = vld [vmem:[%s3862_s9 + $0x80] sm:$0xff]  ;;  %v3929_v16 = vld [vmem:[%s3862_s9 + $0xd8] sm:$0xff]  ;;  %s2846_s25 = scalar_lea.sflag [#allocation5], %s3856_s13  ;;  %s3634_s15 = scalar_lea.hbm %s6306_s6, 1024 }
  0x55   : > { %1521 = vmatpush.msra.mxu2 %v368_v6  ;;  %3346 = vrot.lane.b32.xlu2 %v3345_v4, %s3697_s27  ;;  %v3340_v7 = vpack.i.bf16 %v364_v5, %v368_v6  ;;  %v3911_v11 = vld [vmem:[%s3862_s9 + $0x60] sm:$0xff]  ;;  %v352_v13 = vld [vmem:[%s3862_s9 + $0x68] sm:$0xff]  ;;  %v3350_v18 = vpack.i.bf16 %v3923_v14, %v368_v6  ;;  %v3945_v22 = vld [vmem:[%s3862_s9 + $0xb8] sm:$0xff]  ;;  %v4054_v51 = vadd.s32 4294967292, %v4048_v49  ;;  %vm652_vm0 = vcmp.lt.s32.totalorder %v4048_v49, 124 }
  0x56   : > { %1441 = vmatpush.msra.mxu0 %v3897_v8  ;;  %v3916_v12 = vld [vmem:[%s3862_s9 + $0x40] sm:$0xff]  ;;  %v348_v17 = vld [vmem:[%s3862_s9 + $0x48] sm:$0xff]  ;;  %v3949_v24 = vld [vmem:[%s3862_s9 + $0xd0] sm:$0xff]  ;;  %vm435_vm1 = vcmp.lt.s32.totalorder %v4048_v49, 4 }
  0x57   : > { %1522 = vmatpush.msra.mxu2 %v364_v5  ;;  %v3926_v15 = vld [vmem:[%s3862_s9 + $0x20] sm:$0xff]  ;;  %v344_v19 = vld [vmem:[%s3862_s9 + $0x28] sm:$0xff]  ;;  %v3355_v21 = vpack.i.bf16 %v348_v17, %v352_v13  ;;  %v3360_v25 = vpack.i.bf16 %v3949_v24, %v364_v5  ;;  %v3958_v26 = vld [vmem:[%s3862_s9 + $0x98] sm:$0xff]  ;;  %v3400_v45 = vpack.i.bf16 %v3949_v24, %v3923_v14  ;;  %6388 = vst [vmem:[#allocation18_spill] sm:$0xff] %v4054_v51  ;;  %vm472_vm2 = vcmp.ge.s32.totalorder %v4054_v51, 0 }
  0x58   : > { %1442 = vmatpush.msra.mxu0 %v3901_v9  ;;  %v340_v20 = vld [vmem:[%s3862_s9 + $0x8] sm:$0xff]  ;;  %v339_v23 = vld [vmem:[%s3862_s9] sm:$0xff]  ;;  %v3961_v27 = vld [vmem:[%s3862_s9 + $0xb0] sm:$0xff] }
  0x59   : > { %1523 = vmatpush.msra.mxu2 %v360_v3  ;;  %v3365_v28 = vpack.i.bf16 %v3961_v27, %v360_v3  ;;  %v3370_v29 = vpack.i.bf16 %v340_v20, %v344_v19  ;;  %v3971_v30 = vld [vmem:[%s3862_s9 + $0x78] sm:$0xff]  ;;  %v3977_v31 = vld [vmem:[%s3862_s9 + $0x90] sm:$0xff]  ;;  %v4088_v61 = vld [vmem:[%s3862_s9 + $0x1e8] sm:$0xff] }
  0x5a   : > { %3341 = vrot.lane.b32.xlu0 %v3340_v7, %s3697_s27  ;;  %1443 = vmatpush.msra.mxu0 %v3911_v11  ;;  %v3375_v32 = vpack.i.bf16 %v3977_v31, %v3885_v2  ;;  %v3986_v33 = vld [vmem:[%s3862_s9 + $0x58] sm:$0xff]  ;;  %v3989_v34 = vld [vmem:[%s3862_s9 + $0x70] sm:$0xff]  ;;  %v3405_v48 = vpack.i.bf16 %v3977_v31, %v3961_v27 }
  0x5b   : > { %381 = vrot.lane.b32.xlu1 %v3897_v8, %s3697_s27  ;;  %1524 = vmatpush.msra.mxu2 %v3885_v2  ;;  %v3380_v35 = vpack.i.bf16 %v3989_v34, %v352_v13  ;;  %v3998_v36 = vld [vmem:[%s3862_s9 + $0x38] sm:$0xff]  ;;  %v4001_v37 = vld [vmem:[%s3862_s9 + $0x50] sm:$0xff] }
  0x5c   : > { %1444 = vmatpush.msra.mxu0 %v3916_v12  ;;  %v3385_v38 = vpack.i.bf16 %v4001_v37, %v348_v17  ;;  %v4010_v39 = vld [vmem:[%s3862_s9 + $0x18] sm:$0xff]  ;;  %v4013_v40 = vld [vmem:[%s3862_s9 + $0x30] sm:$0xff]  ;;  %v3410_v54 = vpack.i.bf16 %v4001_v37, %v3989_v34 }
  0x5d   : > { %433 = vrot.lane.b32.xlu2 %v3908_v10, %s3697_s27  ;;  %1525 = vmatpush.msra.mxu2 %v352_v13  ;;  %v3390_v41 = vpack.i.bf16 %v4013_v40, %v344_v19  ;;  %v4022_v42 = vld [vmem:[%s3862_s9 + $0x10] sm:$0xff] }
  0x5e   : > { %1445 = vmatpush.msra.mxu0 %v3926_v15  ;;  %v3395_v43 = vpack.i.bf16 %v4022_v42, %v340_v20  ;;  %v3415_v60 = vpack.i.bf16 %v4022_v42, %v4013_v40  ;;  %v4091_v62 = vld [vmem:[%s3862_s9 + $0x1f0] sm:$0xff] }
  0x5f   : > { %1526 = vmatpush.msra.mxu2 %v348_v17  ;;  %v4099_v2 = vld [vmem:[%s3862_s9 + $0x1d0] sm:$0xff]  ;;  %v3420_v5 = vpack.i.bf16 %v4091_v62, %v4088_v61 }
  0x60   : > { %1446 = vmatpush.msra.mxu0 %v339_v23  ;;  %v4175_v47 = vld [vmem:[%s3862_s9 + $0x190] sm:$0xff] }
  0x61   : > { %1527 = vmatpush.msra.mxu2 %v344_v19  ;;  %v4132_v19 = vld [vmem:[%s3862_s9 + $0x1a8] sm:$0xff] }
  0x62   : > { %379 = vrot.lane.b32.xlu0 %v3901_v9, %s3697_s27 }
  0x63   : > { %431 = vrot.lane.b32.xlu1 %v3929_v16, %s3697_s27  ;;  %1528 = vmatpush.msra.mxu2 %v340_v20  ;;  %v4135_v20 = vld [vmem:[%s3862_s9 + $0x1b0] sm:$0xff] }
  0x65   : > { %3351 = vrot.lane.b32.xlu2 %v3350_v18, %s3698_s29 }
  0x6a   : > { %377 = vrot.lane.b32.xlu0 %v3911_v11, %s3697_s27 }
  0x6b   : > { %3356 = vrot.lane.b32.xlu1 %v3355_v21, %s3697_s27 }
  0x6d   : > { %429 = vrot.lane.b32.xlu2 %v3945_v22, %s3697_s27 }
  0x72   : > { %3361 = vrot.lane.b32.xlu0 %v3360_v25, %s3698_s29 }
  0x73   : > { %375 = vrot.lane.b32.xlu1 %v3916_v12, %s3697_s27 }
  0x75   : > { %427 = vrot.lane.b32.xlu2 %v3958_v26, %s3697_s27 }
  0x7a   : > { %602 = vrot.lane.b32.xlu0 %v367_v0, %s3698_s29 }
  0x7b   : > { %3366 = vrot.lane.b32.xlu1 %v3365_v28, %s3698_s29 }
  0x7d   : > { %373 = vrot.lane.b32.xlu2 %v3926_v15, %s3697_s27 }
  0x82   : > { %3371 = vrot.lane.b32.xlu0 %v3370_v29, %s3697_s27 }
  0x83   : > { %425 = vrot.lane.b32.xlu1 %v3971_v30, %s3697_s27 }
  0x85   : > { %600 = vrot.lane.b32.xlu2 %v3882_v1, %s3698_s29  ;;  %v4096_v1 = vld [vmem:[%s3862_s9 + $0x1c8] sm:$0xff] }
  0x86   : > { %v3430_v25 = vpack.i.bf16 %v4096_v1, %v4088_v61 }
  0x8a   : > { %3376 = vrot.lane.b32.xlu0 %v3375_v32, %s3698_s29  ;;  %v3435_v32 = vpack.i.bf16 %v4135_v20, %v4132_v19 }
  0x8b   : > { %371 = vrot.lane.b32.xlu1 %v339_v23, %s3697_s27 }
  0x8d   : > { %423 = vrot.lane.b32.xlu2 %v3986_v33, %s3697_s27 }
  0x92   : > { %598 = vrot.lane.b32.xlu0 %v3897_v8, %s3698_s29 }
  0x93   : > { %3381 = vrot.lane.b32.xlu1 %v3380_v35, %s3698_s29 }
  0x95   : > { %421 = vrot.lane.b32.xlu2 %v3998_v36, %s3697_s27 }
  0x9a   : > { %596 = vrot.lane.b32.xlu0 %v3901_v9, %s3698_s29  ;;  %v3425_v9 = vpack.i.bf16 %v4099_v2, %v4096_v1 }
  0x9b   : > { %3386 = vrot.lane.b32.xlu1 %v3385_v38, %s3698_s29  ;;  %v4166_v38 = vld [vmem:[%s3862_s9 + $0x1c0] sm:$0xff] }
  0x9c   : > { %6390 = vst [vmem:[#allocation20_spill] sm:$0xff] %v4166_v38 }
  0x9d   : > { %419 = vrot.lane.b32.xlu2 %v4010_v39, %s3697_s27 }
  0xa2   : > { %594 = vrot.lane.b32.xlu0 %v3911_v11, %s3698_s29 }
  0xa3   : > { %3391 = vrot.lane.b32.xlu1 %v3390_v41, %s3698_s29 }
  0xa5   : > { %592 = vrot.lane.b32.xlu2 %v3916_v12, %s3698_s29  ;;  %v4121_v12 = vld [vmem:[%s3862_s9 + $0x1e0] sm:$0xff] }
  0xa6   : > { %6389 = vst [vmem:[#allocation19_spill] sm:$0xff] %v4121_v12 }
  0xaa   : > { %3396 = vrot.lane.b32.xlu0 %v3395_v43, %s3698_s29 }
  0xab   : > { %590 = vrot.lane.b32.xlu1 %v3926_v15, %s3698_s29 }
  0xad   : > { %588 = vrot.lane.b32.xlu2 %v339_v23, %s3698_s29 }
  0xaf   : > { %v4031_v44 = vpop.permute.xlu2 %3346 }
  0xb0   : > { %v6314_v6 = vunpack.i.l.bf16 %v4031_v44  ;;  %v6313_v13 = vunpack.i.h.bf16 %v4031_v44 }
  0xb2   : > { %650 = vrot.lane.b32.xlu0 %v3908_v10, %s3698_s29 }
  0xb3   : > { %648 = vrot.lane.b32.xlu1 %v3929_v16, %s3698_s29 }
  0xb5   : > { %3401 = vrot.lane.b32.xlu2 %v3400_v45, %s3697_s27  ;;  %v4172_v45 = vld [vmem:[%s3862_s9 + $0x188] sm:$0xff] }
  0xb7   : > { %v4040_v46 = vpop.permute.xlu2 %433 }
  0xba   : > { %646 = vrot.lane.b32.xlu0 %v3945_v22, %s3698_s29 }
  0xbb   : > { %644 = vrot.lane.b32.xlu1 %v3958_v26, %s3698_s29 }
  0xbd   : > { %3406 = vrot.lane.b32.xlu2 %v3405_v48, %s3697_s27 }
  0xbf   : > { %v4051_v50 = vpop.permute.xlu2 %3351 }
  0xc0   : > { %v6320_v52 = vunpack.i.h.bf16 %v4051_v50  ;;  %v3353_v53 = vunpack.i.l.bf16 %v4051_v50 }
  0xc2   : > { %642 = vrot.lane.b32.xlu0 %v3971_v30, %s3698_s29  ;;  %v668_v55 = vsel %vm652_vm0, %v3353_v53, %v6320_v52  ;;  %v4324_v52 = vld [vmem:[%s3862_s9 + $0x128] sm:$0xff] }
  0xc3   : > { %640 = vrot.lane.b32.xlu1 %v3986_v33, %s3698_s29  ;;  %1570 = vmatpush.msra.mxu3 %v668_v55  ;;  %6396 = vst [vmem:[#allocation26_spill] sm:$0xff] %v4324_v52 }
  0xc4   : > { %v386_v56 = vpop.permute.xlu0 %385 }
  0xc5   : > { %v384_v57 = vpop.permute.xlu1 %383  ;;  %3411 = vrot.lane.b32.xlu2 %v3410_v54, %s3697_s27  ;;  %v467_v58 = vsel %vm435_vm1, %v4040_v46, %v386_v56 }
  0xc6   : > { %3219 = vmatpush.msk.msra.mxu0 %vm472_vm2, %v467_v58 }
  0xc7   : > { %v4079_v59 = vpop.permute.xlu2 %429 }
  0xca   : > { %638 = vrot.lane.b32.xlu0 %v3998_v36, %s3698_s29 }
  0xcb   : > { %636 = vrot.lane.b32.xlu1 %v4010_v39, %s3698_s29 }
  0xcc   : > { %v4093_v63 = vpop.permute.xlu0 %3341 }
  0xcd   : > { %v382_v0 = vpop.permute.xlu1 %381  ;;  %v6315_v3 = vunpack.i.h.bf16 %v4093_v63  ;;  %v6316_v4 = vunpack.i.l.bf16 %v4093_v63  ;;  %3416 = vrot.lane.b32.xlu2 %v3415_v60, %s3697_s27 }
  0xce   : > { %v457_v15 = vsel %vm435_vm1, %v382_v0, %v6314_v6  ;;  %v465_v29 = vsel %vm435_vm1, %v4079_v59, %v382_v0 }
  0xcf   : > { %v4107_v7 = vpop.permute.xlu2 %427  ;;  %v459_v8 = vsel %vm435_vm1, %v386_v56, %v6316_v4  ;;  %v458_v11 = vsel %vm435_vm1, %v384_v57, %v6315_v3  ;;  %v3440_v56 = vpack.i.bf16 %v4175_v47, %v4172_v45 }
  0xd0   : > { %1529 = vmatpush.msra.mxu2 %v459_v8 }
  0xd2   : > { %3421 = vrot.lane.b32.xlu0 %v3420_v5, %s3698_s29  ;;  %1530 = vmatpush.msra.mxu2 %v458_v11  ;;  %v3445_v11 = vpack.i.bf16 %v4172_v45, %v4132_v19 }
  0xd3   : > { %3426 = vrot.lane.b32.xlu1 %v3425_v9, %s3698_s29 }
  0xd4   : > { %v380_v18 = vpop.permute.xlu0 %379  ;;  %1531 = vmatpush.msra.mxu2 %v457_v15  ;;  %v4208_v15 = vld [vmem:[%s3862_s9 + $0x168] sm:$0xff] }
  0xd5   : > { %v4129_v17 = vpop.permute.xlu1 %431  ;;  %820 = vrot.lane.b32.xlu2 %v4121_v12, %s3697_s27  ;;  %v456_v23 = vsel %vm435_vm1, %v380_v18, %v6313_v13  ;;  %v464_v35 = vsel %vm435_vm1, %v4107_v7, %v380_v18  ;;  %v4211_v18 = vld [vmem:[%s3862_s9 + $0x170] sm:$0xff] }
  0xd6   : > { %v466_v21 = vsel %vm435_vm1, %v4129_v17, %v384_v57  ;;  %1532 = vmatpush.msra.mxu2 %v456_v23  ;;  %v4191_v57 = vld [vmem:[%s3862_s9 + $0x1a0] sm:$0xff] }
  0xd7   : > { %3220 = vmatpush.msk.msra.mxu0 %vm472_vm2, %v466_v21  ;;  %v4150_v28 = vpop.permute.xlu2 %373  ;;  %6391 = vst [vmem:[#allocation21_spill] sm:$0xff] %v4191_v57 }
  0xd9   : > { %3221 = vmatpush.msk.msra.mxu0 %vm472_vm2, %v465_v29 }
  0xda   : > { %3431 = vrot.lane.b32.xlu0 %v3430_v25, %s3697_s27  ;;  %v3450_v25 = vpack.i.bf16 %v4211_v18, %v4208_v15 }
  0xdb   : > { %3222 = vmatpush.msk.msra.mxu0 %vm472_vm2, %v464_v35  ;;  %3436 = vrot.lane.b32.xlu1 %v3435_v32, %s3698_s29 }
  0xdc   : > { %v378_v41 = vpop.permute.xlu0 %377 }
  0xdd   : > { %v4169_v43 = vpop.permute.xlu1 %3356  ;;  %818 = vrot.lane.b32.xlu2 %v4166_v38, %s3697_s27 }
  0xde   : > { %v6312_v48 = vunpack.i.l.bf16 %v4169_v43  ;;  %v6311_v58 = vunpack.i.h.bf16 %v4169_v43 }
  0xdf   : > { %v4180_v54 = vpop.permute.xlu2 %600 }
  0xe0   : > { %v455_v55 = vsel %vm435_vm1, %v378_v41, %v6312_v48 }
  0xe1   : > { %1533 = vmatpush.msra.mxu2 %v455_v55 }
  0xe2   : > { %1012 = vrot.lane.b32.xlu0 %v4121_v12, %s3698_s29 }
  0xe3   : > { %3441 = vrot.lane.b32.xlu1 %v3440_v56, %s3698_s29 }
  0xe4   : > { %v4195_v60 = vpop.permute.xlu0 %3361 }
  0xe5   : > { %v376_v0 = vpop.permute.xlu1 %375  ;;  %v6319_v5 = vunpack.i.h.bf16 %v4195_v60  ;;  %v3363_v8 = vunpack.i.l.bf16 %v4195_v60  ;;  %816 = vrot.lane.b32.xlu2 %v4191_v57, %s3697_s27 }
  0xe6   : > { %v454_v9 = vsel %vm435_vm1, %v376_v0, %v6311_v58  ;;  %v4251_v58 = vld [vmem:[%s3862_s9 + $0x1f8] sm:$0xff] }
  0xe7   : > { %1534 = vmatpush.msra.mxu2 %v454_v9  ;;  %v4213_v21 = vpop.permute.xlu2 %423  ;;  %v667_v23 = vsel %vm652_vm0, %v3363_v8, %v6319_v5 }
  0xe8   : > { %1571 = vmatpush.msra.mxu3 %v667_v23  ;;  %v4242_v23 = vld [vmem:[%s3862_s9 + $0x180] sm:$0xff]  ;;  %v462_v3 = vsel %vm435_vm1, %v4213_v21, %v376_v0 }
  0xe9   : > { %6392 = vst [vmem:[#allocation22_spill] sm:$0xff] %v4242_v23 }
  0xea   : > { %3446 = vrot.lane.b32.xlu0 %v3445_v11, %s3697_s27  ;;  %v675_v11 = vsel %vm652_vm0, %v4180_v54, %v3363_v8  ;;  %v4261_v8 = vld [vmem:[%s3862_s9 + $0x150] sm:$0xff] }
  0xeb   : > { %1010 = vrot.lane.b32.xlu1 %v4166_v38, %s3698_s29  ;;  %v4379_v38 = vld [vmem:[%s3862_s9 + $0x1b8] sm:$0xff] }
  0xec   : > { %v4224_v29 = vpop.permute.xlu0 %602 }
  0xed   : > { %v4226_v32 = vpop.permute.xlu1 %3366  ;;  %3451 = vrot.lane.b32.xlu2 %v3450_v25, %s3698_s29  ;;  %v676_v56 = vsel %vm652_vm0, %v4224_v29, %v3353_v53  ;;  %v4258_v53 = vld [vmem:[%s3862_s9 + $0x148] sm:$0xff] }
  0xee   : > { %v6318_v35 = vunpack.i.h.bf16 %v4226_v32  ;;  %v6321_v55 = vunpack.i.l.bf16 %v4226_v32  ;;  %1488 = vmatpush.msra.mxu1 %v676_v56  ;;  %6393 = vst [vmem:[#allocation23_spill] sm:$0xff] %v4258_v53  ;;  %v3455_v13 = vpack.i.bf16 %v4261_v8, %v4258_v53  ;;  %v3460_v0 = vpack.i.bf16 %v4258_v53, %v4208_v15 }
  0xef   : > { %v4236_v9 = vpop.permute.xlu2 %421 }
  0xf0   : > { %v666_v25 = vsel %vm652_vm0, %v6321_v55, %v6318_v35  ;;  %1489 = vmatpush.msra.mxu1 %v675_v11  ;;  %v4327_v55 = vld [vmem:[%s3862_s9 + $0x130] sm:$0xff] }
  0xf1   : > { %1572 = vmatpush.msra.mxu3 %v666_v25  ;;  %6397 = vst [vmem:[#allocation27_spill] sm:$0xff] %v4327_v55 }
  0xf2   : > { %814 = vrot.lane.b32.xlu0 %v4242_v23, %s3697_s27 }
  0xf3   : > { %868 = vrot.lane.b32.xlu1 %v4251_v58, %s3697_s27 }
  0xf4   : > { %v4265_v48 = vpop.permute.xlu0 %3371 }
  0xf5   : > { %v4263_v56 = vpop.permute.xlu1 %425  ;;  %v6317_v11 = vunpack.i.l.bf16 %v4265_v48  ;;  %1008 = vrot.lane.b32.xlu2 %v4191_v57, %s3698_s29 }
  0xf6   : > { %v463_v25 = vsel %vm435_vm1, %v4263_v56, %v378_v41  ;;  %v4290_v41 = vld [vmem:[%s3862_s9 + $0x160] sm:$0xff] }
  0xf7   : > { %3223 = vmatpush.msk.msra.mxu0 %vm472_vm2, %v463_v25  ;;  %v4277_v6 = vpop.permute.xlu2 %419  ;;  %v453_v4 = vsel %vm435_vm1, %v4150_v28, %v6317_v11  ;;  %6394 = vst [vmem:[#allocation24_spill] sm:$0xff] %v4290_v41  ;;  %v461_v25 = vsel %vm435_vm1, %v4236_v9, %v4150_v28  ;;  %v4309_v28 = vld [vmem:[%s6302_s2] sm:$0xff] }
  0xf8   : > { %1535 = vmatpush.msra.mxu2 %v453_v4  ;;  %6395 = vst [vmem:[#allocation25_spill] sm:$0xff] %v4309_v28 }
  0xf9   : > { %3224 = vmatpush.msk.msra.mxu0 %vm472_vm2, %v462_v3  ;;  %v6323_v3 = vunpack.i.h.bf16 %v4265_v48 }
  0xfa   : > { %3456 = vrot.lane.b32.xlu0 %v3455_v13, %s3698_s29 }
  0xfb   : > { %3225 = vmatpush.msk.msra.mxu0 %vm472_vm2, %v461_v25  ;;  %812 = vrot.lane.b32.xlu1 %v4290_v41, %s3697_s27 }
  0xfc   : > { %v4304_v4 = vpop.permute.xlu0 %3376 }
  0xfd   : > { %v372_v11 = vpop.permute.xlu1 %371  ;;  %v3378_v13 = vunpack.i.l.bf16 %v4304_v4  ;;  %3461 = vrot.lane.b32.xlu2 %v3460_v0, %s3697_s27  ;;  %v6398_v0 = vunpack.i.h.bf16 %v4304_v4 }
  0xfe   : > { %v452_v25 = vsel %vm435_vm1, %v372_v11, %v6323_v3  ;;  %v460_v5 = vsel %vm435_vm1, %v4277_v6, %v372_v11  ;;  %v4337_v3 = vld [vmem:[%s3862_s9 + $0x1d8] sm:$0xff] }
  0xff   : > { %1536 = vmatpush.msra.mxu2 %v452_v25  ;;  %3226 = vmatpush.msk.msra.mxu0 %vm472_vm2, %v460_v5  ;;  %v4329_v35 = vpop.permute.xlu2 %592  ;;  %v665_v57 = vsel %vm652_vm0, %v3378_v13, %v6398_v0  ;;  %v3465_v5 = vpack.i.bf16 %v4327_v55, %v4324_v52  ;;  %v6400_v0 = vunpack.i.l.bf16 %v4226_v32 }
 0x100   : > { %1537 = vmatmul.f32.vlgmr.msra.gmra.mxu2 %v4309_v28  ;;  %1573 = vmatpush.msra.mxu3 %v665_v57  ;;  %v4356_v57 = vld [vmem:[%s6302_s2 + $0x10] sm:$0xff] }
 0x101   : > { %1685 = vmatpush.msrb.mxu0 %v3908_v10  ;;  %6399 = vst [vmem:[#allocation28_spill] sm:$0xff] %v4356_v57 }
 0x102   : > { %1455 = vmatmul.f32.vlgmr.msra.gmra.mxu0 %v4309_v28  ;;  %866 = vrot.lane.b32.xlu0 %v4337_v3, %s3697_s27 }
 0x103   : > { %1686 = vmatpush.msrb.mxu0 %v3929_v16  ;;  %1006 = vrot.lane.b32.xlu1 %v4242_v23, %s3698_s29 }
 0x104   : > { %v4349_v11 = vpop.permute.xlu0 %598 }
 0x105   : > { %1687 = vmatpush.msrb.mxu0 %v3945_v22  ;;  %v4351_v10 = vpop.permute.xlu1 %3381  ;;  %3466 = vrot.lane.b32.xlu2 %v3465_v5, %s3698_s29  ;;  %v674_v22 = vsel %vm652_vm0, %v4349_v11, %v6400_v0  ;;  %v4371_v5 = vld [vmem:[%s3862_s9 + $0x140] sm:$0xff] }
 0x106   : > { %v6328_v16 = vunpack.i.h.bf16 %v4351_v10  ;;  %v3383_v25 = vunpack.i.l.bf16 %v4351_v10  ;;  %1490 = vmatpush.msra.mxu1 %v674_v22  ;;  %6401 = vst [vmem:[#allocation29_spill] sm:$0xff] %v4371_v5 }
 0x107   : > { %1688 = vmatpush.msrb.mxu0 %v3958_v26  ;;  %v4367_v51 = vpop.permute.xlu2 %588  ;;  %v4389_v26 = vld [vmem:[%s3862_s9 + $0x108] sm:$0xff] }
 0x108   : > { %1540 = vmatmul.f32.gmra.mxu2 %v4356_v57  ;;  %v664_v23 = vsel %vm652_vm0, %v3383_v25, %v6328_v16  ;;  %6402 = vst [vmem:[#allocation30_spill] sm:$0xff] %v4389_v26 }
 0x109   : > { %1689 = vmatpush.msrb.mxu0 %v3971_v30  ;;  %1574 = vmatpush.msra.mxu3 %v664_v23  ;;  %v4392_v30 = vld [vmem:[%s3862_s9 + $0x110] sm:$0xff] }
 0x10a   : > { %1458 = vmatmul.f32.gmra.mxu0 %v4356_v57  ;;  %810 = vrot.lane.b32.xlu0 %v4371_v5, %s3697_s27  ;;  %6403 = vst [vmem:[#allocation31_spill] sm:$0xff] %v4392_v30  ;;  %v3470_v57 = vpack.i.bf16 %v4392_v30, %v4389_v26 }
 0x10b   : > { %1690 = vmatpush.msrb.mxu0 %v3986_v33  ;;  %864 = vrot.lane.b32.xlu1 %v4379_v38, %s3697_s27  ;;  %v4401_v33 = vld [vmem:[%s6302_s2 + $0x20] sm:$0xff] }
 0x10c   : > { %v4394_v0 = vpop.permute.xlu0 %596  ;;  %6404 = vst [vmem:[#allocation32_spill] sm:$0xff] %v4401_v33 }
 0x10d   : > { %1691 = vmatpush.msrb.mxu0 %v3998_v36  ;;  %v4396_v23 = vpop.permute.xlu1 %3386  ;;  %1004 = vrot.lane.b32.xlu2 %v4290_v41, %s3698_s29  ;;  %v673_v16 = vsel %vm652_vm0, %v4394_v0, %v3378_v13  ;;  %v4423_v13 = vld [vmem:[%s3862_s9 + $0x120] sm:$0xff] }
 0x10e   : > { %v6335_v22 = vunpack.i.h.bf16 %v4396_v23  ;;  %v3388_v36 = vunpack.i.l.bf16 %v4396_v23  ;;  %1491 = vmatpush.msra.mxu1 %v673_v16 }
 0x10f   : > { %1692 = vmatpush.msrb.mxu0 %v4010_v39  ;;  %v4413_v55 = vpop.permute.xlu2 %3401  ;;  %v3475_v39 = vpack.i.bf16 %v4389_v26, %v4324_v52 }
 0x110   : > { %1543 = vmatmul.f32.gmra.mxu2 %v4401_v33  ;;  %v663_v41 = vsel %vm652_vm0, %v3388_v36, %v6335_v22  ;;  %v6340_v12 = vunpack.i.h.bf16 %v4413_v55  ;;  %v6338_v53 = vunpack.i.l.bf16 %v4413_v55 }
 0x111   : > { %1575 = vmatpush.msra.mxu3 %v663_v41 }
 0x112   : > { %1461 = vmatmul.f32.gmra.mxu0 %v4401_v33  ;;  %3471 = vrot.lane.b32.xlu0 %v3470_v57, %s3698_s29  ;;  %v443_v16 = vsel %vm435_vm1, %v6338_v53, %v4040_v46  ;;  %v442_v57 = vsel %vm435_vm1, %v6340_v12, %v4129_v17  ;;  %v4448_v33 = vld [vmem:[%s6302_s2 + $0x30] sm:$0xff]  ;;  %v671_v17 = vsel %vm652_vm0, %v4329_v35, %v3388_v36  ;;  %v4480_v36 = vld [vmem:[%s3862_s9 + $0x100] sm:$0xff] }
 0x113   : > { %808 = vrot.lane.b32.xlu1 %v4423_v13, %s3697_s27  ;;  %1693 = vmatpush.msrb.mxu0 %v443_v16  ;;  %6405 = vst [vmem:[#allocation33_spill] sm:$0xff] %v4448_v33 }
 0x114   : > { %v4436_v22 = vpop.permute.xlu0 %594 }
 0x115   : > { %v4438_v41 = vpop.permute.xlu1 %3391  ;;  %3476 = vrot.lane.b32.xlu2 %v3475_v39, %s3697_s27  ;;  %1694 = vmatpush.msrb.mxu0 %v442_v57  ;;  %v672_v53 = vsel %vm652_vm0, %v4436_v22, %v3383_v25  ;;  %v4463_v39 = vld [vmem:[%s3862_s9 + $0x198] sm:$0xff] }
 0x116   : > { %v6341_v46 = vunpack.i.h.bf16 %v4438_v41  ;;  %v3393_v16 = vunpack.i.l.bf16 %v4438_v41  ;;  %1492 = vmatpush.msra.mxu1 %v672_v53 }
 0x117   : > { %v4456_v26 = vpop.permute.xlu2 %3406 }
 0x118   : > { %1546 = vmatmul.f32.gmra.mxu2 %v4448_v33  ;;  %v662_v57 = vsel %vm652_vm0, %v3393_v16, %v6341_v46  ;;  %v6346_v12 = vunpack.i.h.bf16 %v4456_v26  ;;  %v6342_v25 = vunpack.i.l.bf16 %v4456_v26  ;;  %1493 = vmatpush.msra.mxu1 %v671_v17 }
 0x119   : > { %1576 = vmatpush.msra.mxu3 %v662_v57 }
 0x11a   : > { %1464 = vmatmul.f32.gmra.mxu0 %v4448_v33  ;;  %862 = vrot.lane.b32.xlu0 %v4463_v39, %s3697_s27  ;;  %v441_v53 = vsel %vm435_vm1, %v6342_v25, %v4079_v59  ;;  %v440_v57 = vsel %vm435_vm1, %v6346_v12, %v4107_v7  ;;  %v4496_v59 = vld [vmem:[%s6302_s2 + $0x40] sm:$0xff]  ;;  %v338_v25 = vadd.s32 384, %v4048_v49  ;;  %v4509_v7 = vld [vmem:[%s6302_s2 + $0x8] sm:$0xff]  ;;  %v2169_v49 = vld [vmem:[%s6305_s5 + $0x10] sm:$0xff] }
 0x11b   : > { %1002 = vrot.lane.b32.xlu1 %v4371_v5, %s3698_s29  ;;  %1695 = vmatpush.msrb.mxu0 %v441_v53 }
 0x11c   : > { %v4484_v46 = vpop.permute.xlu0 %3396  ;;  %v4526_v28 = vadd.s32 4, %v338_v25 }
 0x11d   : > { %v4486_v17 = vpop.permute.xlu1 %590  ;;  %v3398_v33 = vunpack.i.l.bf16 %v4484_v46  ;;  %806 = vrot.lane.b32.xlu2 %v4480_v36, %s3697_s27  ;;  %1696 = vmatpush.msrb.mxu0 %v440_v57  ;;  %v6406_v57 = vunpack.i.h.bf16 %v4484_v46 }
 0x11e   : > { %v670_v5 = vsel %vm652_vm0, %v4486_v17, %v3393_v16  ;;  %vm696_vm4 = vcmp.lt.s32.totalorder %v4526_v28, 512 }
 0x11f   : > { %1494 = vmatpush.msra.mxu1 %v670_v5  ;;  %v4511_v12 = vpop.permute.xlu2 %3411  ;;  %v669_v53 = vsel %vm652_vm0, %v4367_v51, %v3398_v33  ;;  %v661_v52 = vsel %vm652_vm0, %v3398_v33, %v6406_v57  ;;  %v4522_v5 = vld [vmem:[%s3862_s9 + $0x178] sm:$0xff] }
 0x120   : > { %1549 = vmatmul.f32.gmra.mxu2 %v4496_v59  ;;  %v3414_v16 = vunpack.i.h.bf16 %v4511_v12  ;;  %v3413_v30 = vunpack.i.l.bf16 %v4511_v12  ;;  %1577 = vmatpush.msra.mxu3 %v661_v52  ;;  %v4541_v52 = vld [vmem:[%s3862_s9 + $0x158] sm:$0xff]  ;;  %v6424_v12 = vunpack.i.l.bf16 %v4265_v48 }
 0x121   : > { %1495 = vmatpush.msra.mxu1 %v669_v53  ;;  %3023 = vmatmul.msk.f32.vlgmr.msra.gmra.mxu3 %vm1414_vm3, %v4509_v7 }
 0x122   : > { %3015 = vmatmul.msk.f32.vlgmr.msra.gmra.mxu1 %vm1414_vm3, %v4509_v7  ;;  %860 = vrot.lane.b32.xlu0 %v4522_v5, %s3697_s27  ;;  %v439_v33 = vsel %vm435_vm1, %v3413_v30, %v4263_v56  ;;  %v6407_v56 = vunpack.i.h.bf16 %v4051_v50  ;;  %v6408_v50 = vunpack.i.h.bf16 %v4195_v60  ;;  %v4592_v60 = vld [vmem:[%s3862_s9 + $0x138] sm:$0xff] }
 0x123   : > { %1603 = vmatpush.msrb.mxu1 %v3923_v14  ;;  %1000 = vrot.lane.b32.xlu1 %v4423_v13, %s3698_s29  ;;  %v438_v14 = vsel %vm435_vm1, %v3414_v16, %v4213_v21  ;;  %v4566_v21 = vld [vmem:[%s6302_s2 + $0x18] sm:$0xff] }
 0x124   : > { %1697 = vmatpush.msrb.mxu0 %v439_v33  ;;  %v651_v25 = vpop.permute.xlu0 %650 }
 0x125   : > { %1604 = vmatpush.msrb.mxu1 %v3949_v24  ;;  %v649_v53 = vpop.permute.xlu1 %648  ;;  %1467 = vmatmul.f32.gmra.mxu0 %v4496_v59  ;;  %v660_v24 = vsel %vm652_vm0, %v6407_v56, %v651_v25  ;;  %v684_v57 = vsel %vm652_vm0, %v651_v25, %v4224_v29 }
 0x126   : > { %858 = vrot.lane.b32.xlu2 %v4541_v52, %s3697_s27  ;;  %1698 = vmatpush.msrb.mxu0 %v438_v14  ;;  %v659_v14 = vsel %vm652_vm0, %v6408_v50, %v649_v53  ;;  %v683_v25 = vsel %vm652_vm0, %v649_v53, %v4180_v54  ;;  %v4603_v54 = vld [vmem:[%s3862_s9 + $0x118] sm:$0xff] }
 0x127   : > { %1605 = vmatpush.msrb.mxu1 %v3961_v27  ;;  %1652 = vmatpush.msrb.mxu3 %v660_v24  ;;  %v4568_v33 = vpop.permute.xlu2 %3416  ;;  %v4579_v27 = vld [vmem:[%s6302_s2 + $0x50] sm:$0xff] }
 0x128   : > { %3227 = vmatpush.msk.msrb.mxu2 %vm696_vm4, %v684_v57  ;;  %v3418_v29 = vunpack.i.l.bf16 %v4568_v33  ;;  %v3419_v56 = vunpack.i.h.bf16 %v4568_v33 }
 0x129   : > { %1606 = vmatpush.msrb.mxu1 %v3977_v31  ;;  %1653 = vmatpush.msrb.mxu3 %v659_v14  ;;  %v6410_v14 = vunpack.i.h.bf16 %v4304_v4 }
 0x12a   : > { %3228 = vmatpush.msk.msrb.mxu2 %vm696_vm4, %v683_v25  ;;  %3016 = vmatmul.msk.f32.gmra.mxu1 %vm1414_vm3, %v4566_v21  ;;  %v437_v31 = vsel %vm435_vm1, %v3418_v29, %v4236_v9  ;;  %v6409_v9 = vunpack.i.h.bf16 %v4226_v32  ;;  %v4636_v32 = vld [vmem:[%s6302_s2 + $0x28] sm:$0xff]  ;;  %v6413_v25 = vunpack.i.h.bf16 %v4413_v55 }
 0x12b   : > { %1552 = vmatmul.f32.gmra.mxu2 %v4579_v27  ;;  %3024 = vmatmul.msk.f32.gmra.mxu3 %vm1414_vm3, %v4566_v21 }
 0x12c   : > { %1607 = vmatpush.msrb.mxu1 %v3989_v34  ;;  %998 = vrot.lane.b32.xlu0 %v4480_v36, %s3698_s29  ;;  %v647_v53 = vpop.permute.xlu0 %646  ;;  %v436_v34 = vsel %vm435_vm1, %v3419_v56, %v4277_v6 }
 0x12d   : > { %856 = vrot.lane.b32.xlu1 %v4592_v60, %s3697_s27  ;;  %1699 = vmatpush.msrb.mxu0 %v437_v31  ;;  %v645_v24 = vpop.permute.xlu1 %644  ;;  %v658_v57 = vsel %vm652_vm0, %v6409_v9, %v647_v53  ;;  %v682_v50 = vsel %vm652_vm0, %v647_v53, %v4349_v11  ;;  %v3480_v11 = vpack.i.bf16 %v4099_v2, %v4091_v62  ;;  %v6414_v31 = vunpack.i.h.bf16 %v4093_v63 }
 0x12e   : > { %1608 = vmatpush.msrb.mxu1 %v4001_v37  ;;  %854 = vrot.lane.b32.xlu2 %v4603_v54, %s3697_s27  ;;  %v657_v6 = vsel %vm652_vm0, %v6410_v14, %v645_v24  ;;  %v681_v4 = vsel %vm652_vm0, %v645_v24, %v4394_v0  ;;  %v6412_v0 = vunpack.i.l.bf16 %v4093_v63  ;;  %v6415_v24 = vunpack.i.h.bf16 %v4351_v10 }
 0x12f   : > { %1700 = vmatpush.msrb.mxu0 %v436_v34  ;;  %1654 = vmatpush.msrb.mxu3 %v658_v57  ;;  %v4627_v37 = vpop.permute.xlu2 %820  ;;  %v450_v53 = vsel %vm435_vm1, %v6414_v31, %v6413_v25  ;;  %v6416_v63 = vunpack.i.l.bf16 %v4456_v26  ;;  %v6418_v10 = vunpack.i.h.bf16 %v4396_v23  ;;  %v6419_v23 = vunpack.i.h.bf16 %v4456_v26  ;;  %v4769_v25 = vld [vmem:[%s6302_s2 + $0x48] sm:$0xff] }
 0x130   : > { %1470 = vmatmul.f32.gmra.mxu0 %v4579_v27  ;;  %1609 = vmatpush.msrb.mxu1 %v4013_v40  ;;  %v4643_v40 = vld [vmem:[%s6302_s2 + $0x60] sm:$0xff] }
 0x131   : > { %3229 = vmatpush.msk.msrb.mxu2 %vm696_vm4, %v682_v50  ;;  %1655 = vmatpush.msrb.mxu3 %v657_v6  ;;  %v4704_v6 = vld [vmem:[%s6302_s2 + $0x38] sm:$0xff] }
 0x132   : > { %1610 = vmatpush.msrb.mxu1 %v4022_v42  ;;  %1849 = vmatpush.msra.mxu0 %v4088_v61  ;;  %v6411_v42 = vunpack.i.l.bf16 %v4413_v55  ;;  %v6417_v55 = vunpack.i.l.bf16 %v4031_v44 }
 0x133   : > { %3230 = vmatpush.msk.msrb.mxu2 %vm696_vm4, %v681_v4  ;;  %3017 = vmatmul.msk.f32.gmra.mxu1 %vm1414_vm3, %v4636_v32  ;;  %v4709_v4 = vld [vmem:[%s6302_s2 + $0x70] sm:$0xff] }
 0x134   : > { %1555 = vmatmul.f32.gmra.mxu2 %v4643_v40  ;;  %3025 = vmatmul.msk.f32.gmra.mxu3 %vm1414_vm3, %v4636_v32  ;;  %v451_v62 = vsel %vm435_vm1, %v6412_v0, %v6411_v42  ;;  %v643_v61 = vpop.permute.xlu0 %642  ;;  %v449_v57 = vsel %vm435_vm1, %v6417_v55, %v6416_v63  ;;  %v3699_v0 = vmov 0   ;;  %v6429_v63 = vld [vmem:[#allocation19_spill] sm:$0xff] }
 0x135   : > { %1611 = vmatpush.msrb.mxu1 %v451_v62  ;;  %1060 = vrot.lane.b32.xlu0 %v4251_v58, %s3698_s29  ;;  %v641_v2 = vpop.permute.xlu1 %640  ;;  %v656_v34 = vsel %vm652_vm0, %v6415_v24, %v643_v61  ;;  %v680_v9 = vsel %vm652_vm0, %v643_v61, %v4436_v22  ;;  %v6430_v55 = vld [vmem:[#allocation27_spill] sm:$0xff] }
 0x136   : > { %1058 = vrot.lane.b32.xlu1 %v4337_v3, %s3698_s29  ;;  %3481 = vrot.lane.b32.xlu2 %v3480_v11, %s3697_s27  ;;  %v655_v22 = vsel %vm652_vm0, %v6418_v10, %v641_v2  ;;  %v679_v14 = vsel %vm652_vm0, %v641_v2, %v4329_v35  ;;  %v6420_v11 = vunpack.i.h.bf16 %v4031_v44  ;;  %v3485_v35 = vpack.i.bf16 %v4175_v47, %v4135_v20 }
 0x137   : > { %1612 = vmatpush.msrb.mxu1 %v450_v53  ;;  %1656 = vmatpush.msrb.mxu3 %v656_v34  ;;  %v4690_v50 = vpop.permute.xlu2 %818  ;;  %v6421_v44 = vunpack.i.l.bf16 %v4169_v43  ;;  %v6422_v47 = vunpack.i.h.bf16 %v4169_v43  ;;  %v445_v43 = vsel %vm435_vm1, %v6424_v12, %v3418_v29  ;;  %v6426_v29 = vunpack.i.h.bf16 %v4265_v48  ;;  %v4816_v34 = vld [vmem:[%s6302_s2 + $0x58] sm:$0xff] }
 0x138   : > { %1473 = vmatmul.f32.gmra.mxu0 %v4643_v40  ;;  %3231 = vmatpush.msk.msrb.mxu2 %vm696_vm4, %v680_v9  ;;  %v448_v42 = vsel %vm435_vm1, %v6420_v11, %v6419_v23  ;;  %v3490_v53 = vpack.i.bf16 %v4261_v8, %v4211_v18  ;;  %v6428_v9 = vld [vmem:[#allocation23_spill] sm:$0xff]  ;;  %v6433_v23 = vld [vmem:[#allocation30_spill] sm:$0xff] }
 0x139   : > { %1613 = vmatpush.msrb.mxu1 %v449_v57  ;;  %1657 = vmatpush.msrb.mxu3 %v655_v22  ;;  %v447_v26 = vsel %vm435_vm1, %v6421_v44, %v3413_v30  ;;  %v446_v62 = vsel %vm435_vm1, %v6422_v47, %v3414_v16  ;;  %v6423_v30 = vunpack.i.h.bf16 %v4438_v41  ;;  %v444_v31 = vsel %vm435_vm1, %v6426_v29, %v3419_v56  ;;  %v6431_v57 = vld [vmem:[#allocation31_spill] sm:$0xff]  ;;  %v6432_v22 = vld [vmem:[#allocation26_spill] sm:$0xff] }
 0x13a   : > { %3232 = vmatpush.msk.msrb.mxu2 %vm696_vm4, %v679_v14  ;;  %1850 = vmatpush.msra.mxu0 %v4096_v1  ;;  %v3495_v10 = vpack.i.bf16 %v6431_v57, %v6430_v55  ;;  %v1373_v12 = vld [vmem:[%s6303_s3 + $0x38] sm:$0xff]  ;;  %v6439_v55 = vld [vmem:[#allocation32_spill] sm:$0xff] }
 0x13b   : > { %1614 = vmatpush.msrb.mxu1 %v448_v42  ;;  %3501 = vset.pattern.permute.xlu1 %v3699_v0 }
 0x13c   : > { %3018 = vmatmul.msk.f32.gmra.mxu1 %vm1414_vm3, %v4704_v6  ;;  %1558 = vmatmul.f32.gmra.mxu2 %v4709_v4  ;;  %v639_v1 = vpop.permute.xlu0 %638 }
 0x13d   : > { %3026 = vmatmul.msk.f32.gmra.mxu3 %vm1414_vm3, %v4704_v6  ;;  %1615 = vmatpush.msrb.mxu1 %v447_v26  ;;  %v637_v20 = vpop.permute.xlu1 %636  ;;  %v654_v61 = vsel %vm652_vm0, %v6423_v30, %v639_v1  ;;  %v678_v2 = vsel %vm652_vm0, %v639_v1, %v4486_v17  ;;  %v6425_v17 = vunpack.i.h.bf16 %v4484_v46  ;;  %v6434_v26 = vld [vmem:[#allocation20_spill] sm:$0xff]  ;;  %v4866_v30 = vld [vmem:[%s6302_s2 + $0x68] sm:$0xff] }
 0x13e   : > { %1056 = vrot.lane.b32.xlu0 %v4379_v38, %s3698_s29  ;;  %1054 = vrot.lane.b32.xlu1 %v4463_v39, %s3698_s29  ;;  %v677_v46 = vsel %vm652_vm0, %v637_v20, %v4367_v51  ;;  %v6435_v1 = vld [vmem:[#allocation28_spill] sm:$0xff] }
 0x13f   : > { %1616 = vmatpush.msrb.mxu1 %v446_v62  ;;  %3486 = vrot.lane.b32.xlu2 %v3485_v35, %s3697_s27  ;;  %v4758_v41 = vpop.permute.xlu2 %816  ;;  %v653_v16 = vsel %vm652_vm0, %v6425_v17, %v637_v20  ;;  %v6437_v17 = vld [vmem:[#allocation22_spill] sm:$0xff] }
 0x140   : > { %1476 = vmatmul.f32.gmra.mxu0 %v4709_v4  ;;  %1658 = vmatpush.msrb.mxu3 %v654_v61 }
 0x141   : > { %1617 = vmatpush.msrb.mxu1 %v445_v43  ;;  %3233 = vmatpush.msk.msrb.mxu2 %vm696_vm4, %v678_v2  ;;  %v6436_v2 = vld [vmem:[#allocation21_spill] sm:$0xff]  ;;  %v1372_v43 = vld [vmem:[%s6303_s3 + $0x30] sm:$0xff] }
 0x142   : > { %1659 = vmatpush.msrb.mxu3 %v653_v16  ;;  %1851 = vmatpush.msra.mxu0 %v4132_v19  ;;  %v1371_v16 = vld [vmem:[%s6303_s3 + $0x28] sm:$0xff] }
 0x143   : > { %1618 = vmatpush.msrb.mxu1 %v444_v31  ;;  %3234 = vmatpush.msk.msrb.mxu2 %vm696_vm4, %v677_v46  ;;  %v6438_v31 = vld [vmem:[#allocation24_spill] sm:$0xff] }
 0x144   : > { %3019 = vmatmul.msk.f32.gmra.mxu1 %vm1414_vm3, %v4769_v25  ;;  %3039 = vmatmul.msk.f32.vlgmr.msrb.gmra.mxu2 %vm1414_vm3, %v4509_v7  ;;  %v4791_v48 = vpop.permute.xlu0 %3421 }
 0x145   : > { %3027 = vmatmul.msk.f32.gmra.mxu3 %vm1414_vm3, %v4769_v25  ;;  %1852 = vmatpush.msra.mxu0 %v4172_v45  ;;  %v6364_v51 = vunpack.i.h.bf16 %v4791_v48  ;;  %v3423_v19 = vunpack.i.l.bf16 %v4791_v48  ;;  %v4800_v18 = vpop.permute.xlu1 %3426  ;;  %v6427_v45 = vld [vmem:[#allocation25_spill] sm:$0xff] }
 0x146   : > { %1052 = vrot.lane.b32.xlu0 %v4522_v5, %s3698_s29  ;;  %1050 = vrot.lane.b32.xlu1 %v4541_v52, %s3698_s29  ;;  %v6363_v8 = vunpack.i.h.bf16 %v4800_v18  ;;  %v3428_v33 = vunpack.i.l.bf16 %v4800_v18 }
 0x147   : > { %3491 = vrot.lane.b32.xlu2 %v3490_v53, %s3697_s27  ;;  %1853 = vmatpush.msra.mxu0 %v4208_v15  ;;  %v4807_v56 = vpop.permute.xlu2 %3451  ;;  %v1077_v24 = vsel %vm652_vm0, %v3423_v19, %v6364_v51 }
 0x148   : > { %1701 = vmatmul.f32.vlgmr.msrb.gmra.mxu0 %v6427_v45  ;;  %3500 = vset.pattern.permute.xlu0 %v3699_v0  ;;  %v1076_v15 = vsel %vm652_vm0, %v3428_v33, %v6363_v8 }
 0x149   : > { %1854 = vmatpush.msra.mxu0 %v6428_v9  ;;  %1898 = vmatpush.msra.mxu2 %v1077_v24 }
 0x14a   : > { %3502 = vset.pattern.permute.xlu2 %v3699_v0  ;;  %1767 = vmatpush.msra.mxu1 %v6429_v63  ;;  %v3453_v63 = vunpack.i.l.bf16 %v4807_v56 }
 0x14b   : > { %1855 = vmatpush.msra.mxu0 %v6432_v22  ;;  %1899 = vmatpush.msra.mxu2 %v1076_v15  ;;  %v6354_v15 = vunpack.i.h.bf16 %v4807_v56  ;;  %v6440_v22 = vld [vmem:[#allocation29_spill] sm:$0xff] }
 0x14c   : > { %3020 = vmatmul.msk.f32.gmra.mxu1 %vm1414_vm3, %v4816_v34  ;;  %3040 = vmatmul.msk.f32.gmra.mxu2 %vm1414_vm3, %v4566_v21  ;;  %v4835_v14 = vpop.permute.xlu0 %3431 }
 0x14d   : > { %3028 = vmatmul.msk.f32.gmra.mxu3 %vm1414_vm3, %v4816_v34  ;;  %1856 = vmatpush.msra.mxu0 %v6433_v23  ;;  %v6357_v11 = vunpack.i.h.bf16 %v4835_v14  ;;  %v6359_v42 = vunpack.i.l.bf16 %v4835_v14  ;;  %v4844_v35 = vpop.permute.xlu1 %3436 }
 0x14e   : > { %1048 = vrot.lane.b32.xlu0 %v4592_v60, %s3698_s29  ;;  %1046 = vrot.lane.b32.xlu1 %v4603_v54, %s3698_s29  ;;  %v6362_v0 = vunpack.i.h.bf16 %v4844_v35  ;;  %v3438_v44 = vunpack.i.l.bf16 %v4844_v35 }
 0x14f   : > { %3496 = vrot.lane.b32.xlu2 %v3495_v10, %s3697_s27  ;;  %1768 = vmatpush.msra.mxu1 %v6434_v26  ;;  %v4851_v20 = vpop.permute.xlu2 %1008  ;;  %v893_v47 = vsel %vm435_vm1, %v4627_v37, %v6359_v42  ;;  %v892_v62 = vsel %vm435_vm1, %v4690_v50, %v6357_v11  ;;  %v1368_v26 = vld [vmem:[%s6303_s3 + $0x10] sm:$0xff]  ;;  %s2861_s27 = sshll.u32 %s2858_s0, 4  ;;  %s2862_s27 = int_to_ptr.hbm [resolvable:$true] %s2861_s27 }
 0x150   : > { %1704 = vmatmul.f32.gmra.mxu0 %v6435_v1  ;;  %v1075_v61 = vsel %vm652_vm0, %v3438_v44, %v6362_v0  ;;  %s3628_s29 = sshra.s32 %s2862_s27, 4  ;;  %s3629_s29 = int_to_ptr.hbm [resolvable:$true] %s3628_s29 }
 0x151   : > { %1857 = vmatpush.msra.mxu0 %v893_v47  ;;  %1769 = vmatpush.msra.mxu1 %v6436_v2  ;;  %v1370_v47 = vld [vmem:[%s6303_s3 + $0x20] sm:$0xff]  ;;  %s3630_s12 = scalar_lea.hbm %s3629_s29, 512  ;;  %p3635_p2 = scmp.lt.s32.totalorder %s3629_s29, %s6306_s6 }
 0x152   : > { %1900 = vmatpush.msra.mxu2 %v1075_v61  ;;  %p3631_p1 = scmp.ne.s32.totalorder %s3629_s29, %s3630_s12  ;;  %p3636_p10 = scmp.lt.s32.totalorder %s3634_s15, %s3630_s12 }
 0x153   : > { %1858 = vmatpush.msra.mxu0 %v892_v62  ;;  %1770 = vmatpush.msra.mxu1 %v6437_v17  ;;  %v1369_v62 = vld [vmem:[%s6303_s3 + $0x18] sm:$0xff]  ;;  %v6441_v17 = vld [vmem:[#allocation33_spill] sm:$0xff] }
 0x154   : > { %3021 = vmatmul.msk.f32.gmra.mxu1 %vm1414_vm3, %v4866_v30  ;;  %3041 = vmatmul.msk.f32.gmra.mxu2 %vm1414_vm3, %v4636_v32  ;;  %v4889_v29 = vpop.permute.xlu0 %1012  ;;  %p3632_p4 = pnand %p3631_p1, %p3804_p7  ;;  %p3637_p11 = por %p3636_p10, %p3635_p2 }
 0x155   : > { %3029 = vmatmul.msk.f32.gmra.mxu3 %vm1414_vm3, %v4866_v30  ;;  %1771 = vmatpush.msra.mxu1 %v6438_v31  ;;  %v1085_v46 = vsel %vm652_vm0, %v4889_v29, %v3423_v19  ;;  %v4895_v53 = vpop.permute.xlu1 %3441  ;;  %v4908_v19 = vld [vmem:[%s6302_s2 + $0x78] sm:$0xff]  ;;  %v1083_v31 = vsel %vm652_vm0, %v4851_v20, %v3438_v44 }
 0x156   : > { %1411 = vperm.xlu0 %3500, %v1373_v12   ;;  %1406 = vperm.xlu1 %3501, %v1372_v43   ;;  %v6360_v24 = vunpack.i.h.bf16 %v4895_v53  ;;  %v3443_v9 = vunpack.i.l.bf16 %v4895_v53  ;;  %p3633_p8 = pneg %p3632_p4 }
 0x157   : > { %1401 = vperm.xlu2 %3502, %v1371_v16   ;;  %1816 = vmatpush.msra.mxu3 %v1085_v46  ;;  %v4902_v10 = vpop.permute.xlu2 %3461 }
 0x158   : > { %1707 = vmatmul.f32.gmra.mxu0 %v6439_v55  ;;  %1772 = vmatpush.msra.mxu1 %v6440_v22  ;;  %v1074_v23 = vsel %vm652_vm0, %v3443_v9, %v6360_v24  ;;  %v1366_v22 = vld [vmem:[%s6303_s3] sm:$0xff]  ;;  %p3638_p9 = pnand %p3637_p11, %p3633_p8 }
 0x159   : > { %1901 = vmatpush.msra.mxu2 %v1074_v23 }
 0x15a   : > { %1773 = vmatpush.msra.mxu1 %v4423_v13  ;;  %v1073_v13 = vsel %vm652_vm0, %v3453_v63, %v6354_v15 }
 0x15b   : > { %1902 = vmatpush.msra.mxu2 %v1073_v13  ;;  %v3503_v13 = vld [vmem:[%s3862_s9 + $0x1f0] sm:$0xff] }
 0x15c   : > { %3022 = vmatmul.msk.f32.gmra.mxu1 %vm1414_vm3, %v4908_v19  ;;  %3042 = vmatmul.msk.f32.gmra.mxu2 %vm1414_vm3, %v4704_v6  ;;  %v4938_v61 = vpop.permute.xlu0 %3446 }
 0x15d   : > { %3030 = vmatmul.msk.f32.gmra.mxu3 %vm1414_vm3, %v4908_v19  ;;  %1774 = vmatpush.msra.mxu1 %v4480_v36  ;;  %v6353_v2 = vunpack.i.l.bf16 %v4938_v61  ;;  %v4942_v12 = vpop.permute.xlu1 %1010  ;;  %v6352_v46 = vunpack.i.h.bf16 %v4938_v61 }
 0x15e   : > { %1386 = vperm.xlu0 %3500, %v1368_v26   ;;  %1396 = vperm.xlu1 %3501, %v1370_v47   ;;  %v1084_v43 = vsel %vm652_vm0, %v4942_v12, %v3428_v33  ;;  %v1367_v33 = vld [vmem:[%s6303_s3 + $0x8] sm:$0xff] }
 0x15f   : > { %1391 = vperm.xlu2 %3502, %v1369_v62   ;;  %v4950_v16 = vpop.permute.xlu2 %3466  ;;  %1817 = vmatpush.msra.mxu3 %v1084_v43  ;;  %v891_v36 = vsel %vm435_vm1, %v4758_v41, %v6353_v2  ;;  %v6355_v43 = vunpack.i.l.bf16 %v4902_v10 }
 0x160   : > { %1710 = vmatmul.f32.gmra.mxu0 %v6441_v17 }
 0x161   : > { %1859 = vmatpush.msra.mxu0 %v891_v36  ;;  %1818 = vmatpush.msra.mxu3 %v1083_v31  ;;  %v6358_v36 = vunpack.i.h.bf16 %v4950_v16  ;;  %v6365_v31 = vunpack.i.l.bf16 %v4950_v16 }
 0x163   : > { %v1071_v15 = vsel %vm652_vm0, %v6365_v31, %v6358_v36 }
 0x164   : > { %1619 = vmatmul.f32.vlgmr.msrb.gmra.mxu1 %v6427_v45  ;;  %3043 = vmatmul.msk.f32.gmra.mxu2 %vm1414_vm3, %v4769_v25  ;;  %v4972_v44 = vpop.permute.xlu0 %814 }
 0x165   : > { %3031 = vmatmul.msk.f32.vlgmr.msrb.gmra.mxu3 %vm1414_vm3, %v4509_v7  ;;  %v4974_v23 = vpop.permute.xlu1 %868  ;;  %v890_v26 = vsel %vm435_vm1, %v4972_v44, %v6352_v46 }
 0x166   : > { %1381 = vperm.xlu1 %3501, %v1367_v33   ;;  %v901_v47 = vsel %vm435_vm1, %v4974_v23, %v4627_v37  ;;  %1860 = vmatpush.msra.mxu0 %v890_v26 }
 0x167   : > { %1376 = vperm.xlu2 %3502, %v1366_v22   ;;  %v4986_v62 = vpop.permute.xlu2 %1004  ;;  %3235 = vmatpush.msk.msra.mxu1 %vm472_vm2, %v901_v47 }
 0x168   : > { %1713 = vmatmul.f32.gmra.mxu0 %v4496_v59 }
 0x16c   : > { %1622 = vmatmul.f32.gmra.mxu1 %v6435_v1  ;;  %3044 = vmatmul.msk.f32.gmra.mxu2 %vm1414_vm3, %v4816_v34  ;;  %v4998_v37 = vpop.permute.xlu0 %3456 }
 0x16d   : > { %3032 = vmatmul.msk.f32.gmra.mxu3 %vm1414_vm3, %v4566_v21  ;;  %v6356_v33 = vunpack.i.h.bf16 %v4998_v37  ;;  %v6366_v22 = vunpack.i.l.bf16 %v4998_v37  ;;  %v5002_v26 = vpop.permute.xlu1 %812 }
 0x16e   : > { %v889_v47 = vsel %vm435_vm1, %v5002_v26, %v6355_v43 }
 0x16f   : > { %v5010_v46 = vpop.permute.xlu2 %3476  ;;  %v1072_v2 = vsel %vm652_vm0, %v6366_v22, %v6356_v33  ;;  %1861 = vmatpush.msra.mxu0 %v889_v47  ;;  %2187 = vperm.xlu2 %3502, %v2169_v49  }
 0x170   : > { %1716 = vmatmul.f32.gmra.mxu0 %v4579_v27  ;;  %1903 = vmatpush.msra.mxu2 %v1072_v2  ;;  %v6368_v42 = vunpack.i.h.bf16 %v5010_v46  ;;  %v6367_v24 = vunpack.i.l.bf16 %v5010_v46 }
 0x172   : > { %1904 = vmatpush.msra.mxu2 %v1071_v15 }
 0x174   : > { %1625 = vmatmul.f32.gmra.mxu1 %v6439_v55  ;;  %3045 = vmatmul.msk.f32.gmra.mxu2 %vm1414_vm3, %v4866_v30  ;;  %v5029_v43 = vpop.permute.xlu0 %866 }
 0x175   : > { %3033 = vmatmul.msk.f32.gmra.mxu3 %vm1414_vm3, %v4636_v32  ;;  %v900_v33 = vsel %vm435_vm1, %v5029_v43, %v4690_v50  ;;  %v5035_v11 = vpop.permute.xlu1 %1006  ;;  %v1081_v50 = vsel %vm652_vm0, %v4986_v62, %v3453_v63 }
 0x176   : > { %3236 = vmatpush.msk.msra.mxu1 %vm472_vm2, %v900_v33  ;;  %v1082_v15 = vsel %vm652_vm0, %v5035_v11, %v3443_v9  ;;  %v6361_v33 = vunpack.i.h.bf16 %v4902_v10 }
 0x177   : > { %v5045_v2 = vpop.permute.xlu2 %806  ;;  %1819 = vmatpush.msra.mxu3 %v1082_v15 }
 0x178   : > { %1719 = vmatmul.f32.gmra.mxu0 %v4643_v40  ;;  %v886_v31 = vsel %vm435_vm1, %v5045_v2, %v6368_v42  ;;  %v6445_v42 = vunpack.i.l.bf16 %v4998_v37 }
 0x179   : > { %1820 = vmatpush.msra.mxu3 %v1081_v50 }
 0x17c   : > { %1628 = vmatmul.f32.gmra.mxu1 %v6441_v17  ;;  %3046 = vmatmul.msk.f32.gmra.mxu2 %vm1414_vm3, %v4908_v19  ;;  %v811_v9 = vpop.permute.xlu0 %810 }
 0x17d   : > { %3034 = vmatmul.msk.f32.gmra.mxu3 %vm1414_vm3, %v4704_v6  ;;  %v5058_v47 = vpop.permute.xlu1 %864  ;;  %v888_v15 = vsel %vm435_vm1, %v811_v9, %v6361_v33 }
 0x17e   : > { %v899_v50 = vsel %vm435_vm1, %v5058_v47, %v4758_v41  ;;  %1862 = vmatpush.msra.mxu0 %v888_v15 }
 0x17f   : > { %v5064_v63 = vpop.f32.mrf.mxu0  ;;  %3237 = vmatpush.msk.msra.mxu1 %vm472_vm2, %v899_v50 }
 0x180   : > { %1722 = vmatmul.f32.gmra.mxu0 %v4709_v4  ;;  %v5071_v36 = vpop.permute.xlu2 %858 }
 0x183   : > { %v5077_v33 = vpop.f32.mrf.mxu2 }
 0x184   : > { %6443 = vst [vmem:[#allocation25_spill] sm:$0xff] %v5077_v33  ;;  %1631 = vmatmul.f32.gmra.mxu1 %v4496_v59  ;;  %v5082_v41 = vpop.permute.xlu0 %3471 }
 0x185   : > { %3035 = vmatmul.msk.f32.gmra.mxu3 %vm1414_vm3, %v4769_v25  ;;  %v6369_v15 = vunpack.i.h.bf16 %v5082_v41  ;;  %v6370_v0 = vunpack.i.l.bf16 %v5082_v41  ;;  %v5086_v8 = vpop.permute.xlu1 %808 }
 0x186   : > { %v887_v51 = vsel %vm435_vm1, %v5086_v8, %v6367_v24 }
 0x187   : > { %v5088_v50 = vpop.f32.mrf.mxu0  ;;  %1863 = vmatpush.msra.mxu0 %v887_v51  ;;  %v1070_v33 = vsel %vm652_vm0, %v6370_v0, %v6369_v15 }
 0x188   : > { %v5100_v22 = vpop.permute.xlu2 %854  ;;  %1905 = vmatpush.msra.mxu2 %v1070_v33 }
 0x189   : > { %1864 = vmatpush.msra.mxu0 %v886_v31  ;;  %3055 = vmatmul.msk.f32.vlgmr.msra.gmra.mxu2 %vm1414_vm3, %v4509_v7 }
 0x18a   : > { %1865 = vmatmul.f32.vlgmr.msra.gmra.mxu0 %v6427_v45 }
 0x18b   : > { %v5111_v24 = vpop.f32.mrf.mxu2  ;;  %2013 = vmatpush.msrb.mxu0 %v4251_v58 }
 0x18c   : > { %6444 = vst [vmem:[#allocation23_spill] sm:$0xff] %v5111_v24  ;;  %1634 = vmatmul.f32.gmra.mxu1 %v4579_v27  ;;  %v863_v51 = vpop.permute.xlu0 %862 }
 0x18d   : > { %3036 = vmatmul.msk.f32.gmra.mxu3 %vm1414_vm3, %v4816_v34  ;;  %2014 = vmatpush.msrb.mxu0 %v4337_v3  ;;  %v898_v31 = vsel %vm435_vm1, %v863_v51, %v4972_v44  ;;  %v5121_v33 = vpop.permute.xlu1 %1002 }
 0x18e   : > { %3238 = vmatpush.msk.msra.mxu1 %vm472_vm2, %v898_v31  ;;  %v1080_v58 = vsel %vm652_vm0, %v5121_v33, %v6445_v42 }
 0x18f   : > { %v5130_v15 = vpop.f32.mrf.mxu0  ;;  %2015 = vmatpush.msrb.mxu0 %v4379_v38  ;;  %1821 = vmatpush.msra.mxu3 %v1080_v58  ;;  %v6446_v58 = vunpack.i.l.bf16 %v4950_v16 }
 0x190   : > { %v5133_v3 = vpop.permute.xlu2 %3481 }
 0x191   : > { %2016 = vmatpush.msrb.mxu0 %v4463_v39  ;;  %3056 = vmatmul.msk.f32.gmra.mxu2 %vm1414_vm3, %v4566_v21  ;;  %v6371_v31 = vunpack.i.l.bf16 %v5133_v3 }
 0x192   : > { %1868 = vmatmul.f32.gmra.mxu0 %v6435_v1 }
 0x193   : > { %v5139_v44 = vpop.f32.mrf.mxu2  ;;  %2017 = vmatpush.msrb.mxu0 %v4522_v5 }
 0x194   : > { %1637 = vmatmul.f32.gmra.mxu1 %v4643_v40  ;;  %v861_v38 = vpop.permute.xlu0 %860 }
 0x195   : > { %3037 = vmatmul.msk.f32.gmra.mxu3 %vm1414_vm3, %v4866_v30  ;;  %2018 = vmatpush.msrb.mxu0 %v4541_v52  ;;  %v897_v39 = vsel %vm435_vm1, %v861_v38, %v5002_v26  ;;  %v5149_v42 = vpop.permute.xlu1 %1000  ;;  %v896_v52 = vsel %vm435_vm1, %v5071_v36, %v811_v9  ;;  %v3484_v26 = vunpack.i.h.bf16 %v5133_v3 }
 0x196   : > { %3239 = vmatpush.msk.msra.mxu1 %vm472_vm2, %v897_v39  ;;  %v1079_v5 = vsel %vm652_vm0, %v5149_v42, %v6446_v58 }
 0x197   : > { %2019 = vmatpush.msrb.mxu0 %v4592_v60  ;;  %1822 = vmatpush.msra.mxu3 %v1079_v5  ;;  %v5168_v39 = vpop.f32.mrf.mxu0  ;;  %v877_v60 = vsel %vm435_vm1, %v6371_v31, %v4974_v23  ;;  %v876_v5 = vsel %vm435_vm1, %v3484_v26, %v5029_v43 }
 0x198   : > { %3240 = vmatpush.msk.msra.mxu1 %vm472_vm2, %v896_v52 }
 0x199   : > { %v5164_v0 = vpop.permute.xlu2 %3486  ;;  %2020 = vmatpush.msrb.mxu0 %v4603_v54  ;;  %3057 = vmatmul.msk.f32.gmra.mxu2 %vm1414_vm3, %v4636_v32  ;;  %v6447_v54 = vunpack.i.l.bf16 %v5082_v41 }
 0x19a   : > { %v6372_v58 = vunpack.i.l.bf16 %v5164_v0  ;;  %1871 = vmatmul.f32.gmra.mxu0 %v6439_v55 }
 0x19b   : > { %v5180_v9 = vpop.f32.mrf.mxu2  ;;  %2021 = vmatpush.msrb.mxu0 %v877_v60 }
 0x19c   : > { %1640 = vmatmul.f32.gmra.mxu1 %v4709_v4  ;;  %v875_v60 = vsel %vm435_vm1, %v6372_v58, %v5058_v47  ;;  %v6448_v47 = vunpack.i.h.bf16 %v5164_v0 }
 0x19d   : > { %3038 = vmatmul.msk.f32.gmra.mxu3 %vm1414_vm3, %v4908_v19  ;;  %2022 = vmatpush.msrb.mxu0 %v876_v5 }
 0x19e   : > { %v5191_v52 = vpop.permute.xlu0 %998  ;;  %v874_v58 = vsel %vm435_vm1, %v6448_v47, %v863_v51 }
 0x19f   : > { %v857_v23 = vpop.permute.xlu1 %856  ;;  %v5198_v31 = vpop.f32.mrf.mxu1  ;;  %v1078_v24 = vsel %vm652_vm0, %v5191_v52, %v6447_v54  ;;  %2023 = vmatpush.msrb.mxu0 %v875_v60  ;;  %v894_v54 = vsel %vm435_vm1, %v5100_v22, %v5045_v2  ;;  %v2168_v60 = vld [vmem:[%s6305_s5 + $0x8] sm:$0xff] }
 0x1a0   : > { %v895_v43 = vsel %vm435_vm1, %v857_v23, %v5086_v8  ;;  %1823 = vmatpush.msra.mxu3 %v1078_v24  ;;  %2182 = vperm.xlu1 %3501, %v2168_v60  }
 0x1a1   : > { %v5208_v5 = vpop.permute.xlu2 %3491  ;;  %3241 = vmatpush.msk.msra.mxu1 %vm472_vm2, %v895_v43  ;;  %2024 = vmatpush.msrb.mxu0 %v874_v58 }
 0x1a2   : > { %v6373_v8 = vunpack.i.l.bf16 %v5208_v5  ;;  %3058 = vmatmul.msk.f32.gmra.mxu2 %vm1414_vm3, %v4704_v6  ;;  %v3494_v24 = vunpack.i.h.bf16 %v5208_v5  ;;  %1874 = vmatmul.f32.gmra.mxu0 %v6441_v17  ;;  %v5227_v51 = vpop.f32.mrf.mxu0 }
 0x1a3   : > { %3242 = vmatpush.msk.msra.mxu1 %vm472_vm2, %v894_v54  ;;  %v5234_v58 = vpop.f32.mrf.mxu2 }
 0x1a4   : > { %1783 = vmatmul.f32.vlgmr.msra.gmra.mxu1 %v6427_v45  ;;  %v873_v2 = vsel %vm435_vm1, %v6373_v8, %v861_v38  ;;  %v5242_v43 = vpop.f32.mrf.mxu3  ;;  %v3504_v45 = vld [vmem:[%s3862_s9 + $0x1d0] sm:$0xff]  ;;  %v872_v38 = vsel %vm435_vm1, %v3494_v24, %v5071_v36 }
 0x1a5   : > { %3047 = vmatmul.msk.f32.vlgmr.msra.gmra.mxu3 %vm1414_vm3, %v4509_v7  ;;  %1931 = vmatpush.msrb.mxu1 %v3503_v13  ;;  %v6449_v7 = vunpack.i.h.bf16 %v4791_v48  ;;  %v3505_v8 = vld [vmem:[%s3862_s9 + $0x1b0] sm:$0xff] }
 0x1a6   : > { %2025 = vmatpush.msrb.mxu0 %v873_v2 }
 0x1a7   : > { %1932 = vmatpush.msrb.mxu1 %v3504_v45  ;;  %v1061_v47 = vpop.permute.xlu0 %1060  ;;  %v5250_v54 = vpop.f32.mrf.mxu1  ;;  %v2167_v45 = vld [vmem:[%s6305_s5] sm:$0xff] }
 0x1a8   : > { %v1069_v13 = vsel %vm652_vm0, %v6449_v7, %v1061_v47  ;;  %v1093_v2 = vsel %vm652_vm0, %v1061_v47, %v4889_v29  ;;  %v1059_v60 = vpop.permute.xlu1 %1058  ;;  %2026 = vmatpush.msrb.mxu0 %v872_v38  ;;  %v6450_v7 = vunpack.i.h.bf16 %v4800_v18  ;;  %2177 = vperm.xlu0 %3500, %v2167_v45  }
 0x1a9   : > { %1933 = vmatpush.msrb.mxu1 %v3505_v8  ;;  %v5263_v36 = vpop.permute.xlu2 %3496  ;;  %1980 = vmatpush.msrb.mxu3 %v1069_v13  ;;  %v1092_v47 = vsel %vm652_vm0, %v1059_v60, %v4942_v12  ;;  %v3506_v8 = vld [vmem:[%s3862_s9 + $0x190] sm:$0xff]  ;;  %v2171_v12 = vld [vmem:[%s6305_s5 + $0x20] sm:$0xff] }
 0x1aa   : > { %v3498_v48 = vunpack.i.l.bf16 %v5263_v36  ;;  %3243 = vmatpush.msk.msrb.mxu2 %vm696_vm4, %v1093_v2  ;;  %v1068_v29 = vsel %vm652_vm0, %v6450_v7, %v1059_v60  ;;  %v6374_v38 = vunpack.i.h.bf16 %v5263_v36  ;;  %1877 = vmatmul.f32.gmra.mxu0 %v4496_v59  ;;  %v3508_v60 = vld [vmem:[%s3862_s9 + $0x150] sm:$0xff] }
 0x1ab   : > { %1934 = vmatpush.msrb.mxu1 %v3506_v8  ;;  %1981 = vmatpush.msrb.mxu3 %v1068_v29 }
 0x1ac   : > { %3244 = vmatpush.msk.msrb.mxu2 %vm696_vm4, %v1092_v47  ;;  %1786 = vmatmul.f32.gmra.mxu1 %v6435_v1  ;;  %v871_v18 = vsel %vm435_vm1, %v3498_v48, %v857_v23  ;;  %v3507_v1 = vld [vmem:[%s3862_s9 + $0x170] sm:$0xff]  ;;  %v870_v29 = vsel %vm435_vm1, %v6374_v38, %v5100_v22  ;;  %v2170_v47 = vld [vmem:[%s6305_s5 + $0x18] sm:$0xff]  ;;  %v6452_v22 = vunpack.i.h.bf16 %v4895_v53 }
 0x1ad   : > { %3048 = vmatmul.msk.f32.gmra.mxu3 %vm1414_vm3, %v4566_v21  ;;  %v5290_v13 = vpop.f32.mrf.mxu0  ;;  %3059 = vmatmul.msk.f32.gmra.mxu2 %vm1414_vm3, %v4769_v25  ;;  %v2174_v53 = vld [vmem:[%s6305_s5 + $0x38] sm:$0xff] }
 0x1ae   : > { %1935 = vmatpush.msrb.mxu1 %v3507_v1  ;;  %v5295_v2 = vpop.f32.mrf.mxu2  ;;  %v5297_v23 = vpop.f32.mrf.mxu3  ;;  %2027 = vmatpush.msrb.mxu0 %v871_v18 }
 0x1af   : > { %2197 = vperm.xlu1 %3501, %v2171_v12   ;;  %v6451_v12 = vunpack.i.h.bf16 %v4844_v35 }
 0x1b0   : > { %1936 = vmatpush.msrb.mxu1 %v3508_v60  ;;  %v1057_v45 = vpop.permute.xlu0 %1056  ;;  %v1055_v7 = vpop.permute.xlu1 %1054  ;;  %2028 = vmatpush.msrb.mxu0 %v870_v29  ;;  %v3509_v60 = vld [vmem:[%s3862_s9 + $0x130] sm:$0xff] }
 0x1b1   : > { %v1091_v8 = vsel %vm652_vm0, %v1057_v45, %v4851_v20  ;;  %v5311_v18 = vpop.f32.mrf.mxu1  ;;  %v1067_v1 = vsel %vm652_vm0, %v6451_v12, %v1057_v45  ;;  %v1066_v38 = vsel %vm652_vm0, %v6452_v22, %v1055_v7  ;;  %2192 = vperm.xlu0 %3500, %v2170_v47   ;;  %v1090_v20 = vsel %vm652_vm0, %v1055_v7, %v5035_v11  ;;  %v2173_v12 = vld [vmem:[%s6305_s5 + $0x30] sm:$0xff] }
 0x1b2   : > { %1937 = vmatpush.msrb.mxu1 %v3509_v60  ;;  %1982 = vmatpush.msrb.mxu3 %v1067_v1  ;;  %v6453_v11 = vunpack.i.l.bf16 %v5133_v3  ;;  %v6455_v7 = vunpack.i.h.bf16 %v4835_v14  ;;  %v6456_v3 = vunpack.i.h.bf16 %v4807_v56  ;;  %v6458_v22 = vunpack.i.l.bf16 %v4938_v61 }
 0x1b3   : > { %3245 = vmatpush.msk.msrb.mxu2 %vm696_vm4, %v1091_v8  ;;  %1880 = vmatmul.f32.gmra.mxu0 %v4579_v27  ;;  %v6459_v56 = vunpack.i.h.bf16 %v4998_v37 }
 0x1b4   : > { %1938 = vmatpush.msrb.mxu1 %v6431_v57  ;;  %1983 = vmatpush.msrb.mxu3 %v1066_v38  ;;  %v6454_v57 = vunpack.i.l.bf16 %v4835_v14  ;;  %v884_v29 = vsel %vm435_vm1, %v6455_v7, %v3484_v26  ;;  %v6457_v26 = vunpack.i.l.bf16 %v5164_v0 }
 0x1b5   : > { %3246 = vmatpush.msk.msrb.mxu2 %vm696_vm4, %v1090_v20  ;;  %1789 = vmatmul.f32.gmra.mxu1 %v6439_v55  ;;  %v5331_v35 = vpop.f32.mrf.mxu0 }
 0x1b6   : > { %3049 = vmatmul.msk.f32.gmra.mxu3 %vm1414_vm3, %v4636_v32  ;;  %v885_v38 = vsel %vm435_vm1, %v6454_v57, %v6453_v11  ;;  %3060 = vmatmul.msk.f32.gmra.mxu2 %vm1414_vm3, %v4816_v34  ;;  %v883_v20 = vsel %vm435_vm1, %v6458_v22, %v6457_v26  ;;  %v6460_v11 = vunpack.i.h.bf16 %v5164_v0  ;;  %v6461_v57 = vunpack.i.h.bf16 %v4938_v61 }
 0x1b7   : > { %1939 = vmatpush.msrb.mxu1 %v885_v38  ;;  %v5347_v55 = vpop.f32.mrf.mxu2  ;;  %v5349_v45 = vpop.f32.mrf.mxu3  ;;  %2212 = vperm.xlu1 %3501, %v2174_v53   ;;  %v6462_v0 = vunpack.i.l.bf16 %v5208_v5  ;;  %v6463_v61 = vunpack.i.l.bf16 %v4902_v10  ;;  %v6468_v22 = vunpack.i.h.bf16 %v5263_v36 }
 0x1b8   : > { %v1053_v47 = vpop.permute.xlu0 %1052  ;;  %v1051_v8 = vpop.permute.xlu1 %1050  ;;  %v882_v38 = vsel %vm435_vm1, %v6461_v57, %v6460_v11  ;;  %v3511_v57 = vld [vmem:[%s6302_s2 + $0x8] sm:$0xff] }
 0x1b9   : > { %1940 = vmatpush.msrb.mxu1 %v884_v29  ;;  %v1089_v1 = vsel %vm652_vm0, %v1053_v47, %v4986_v62  ;;  %v5363_v60 = vpop.f32.mrf.mxu1  ;;  %v1065_v14 = vsel %vm652_vm0, %v6456_v3, %v1053_v47  ;;  %v1088_v62 = vsel %vm652_vm0, %v1051_v8, %v5121_v33  ;;  %v1064_v53 = vsel %vm652_vm0, %v6459_v56, %v1051_v8  ;;  %v5479_v11 = vpop.permute.xlu2 %1401 }
 0x1ba   : > { %1984 = vmatpush.msrb.mxu3 %v1065_v14  ;;  %3247 = vmatpush.msk.msrb.mxu2 %vm696_vm4, %v1089_v1  ;;  %v881_v37 = vsel %vm435_vm1, %v6463_v61, %v6462_v0  ;;  %v6464_v47 = vunpack.i.h.bf16 %v4902_v10  ;;  %v6465_v3 = vunpack.i.h.bf16 %v4950_v16  ;;  %v6466_v10 = vunpack.i.l.bf16 %v5010_v46 }
 0x1bb   : > { %1941 = vmatpush.msrb.mxu1 %v883_v20  ;;  %2207 = vperm.xlu0 %3500, %v2173_v12   ;;  %v6469_v20 = vunpack.i.h.bf16 %v5010_v46 }
 0x1bc   : > { %1985 = vmatpush.msrb.mxu3 %v1064_v53  ;;  %3248 = vmatpush.msk.msrb.mxu2 %vm696_vm4, %v1088_v62  ;;  %v880_v8 = vsel %vm435_vm1, %v6464_v47, %v3494_v24  ;;  %v879_v5 = vsel %vm435_vm1, %v6466_v10, %v3498_v48  ;;  %v2172_v53 = vld [vmem:[%s6305_s5 + $0x28] sm:$0xff] }
 0x1bd   : > { %1942 = vmatpush.msrb.mxu1 %v882_v38  ;;  %v1477_v33 = vpop.f32.mrf.mxu0  ;;  %1883 = vmatmul.f32.gmra.mxu0 %v4643_v40  ;;  %v878_v48 = vsel %vm435_vm1, %v6469_v20, %v6468_v22 }
 0x1be   : > { %1792 = vmatmul.f32.gmra.mxu1 %v6441_v17  ;;  %3050 = vmatmul.msk.f32.gmra.mxu3 %vm1414_vm3, %v4704_v6 }
 0x1bf   : > { %3061 = vmatmul.msk.f32.gmra.mxu2 %vm1414_vm3, %v4866_v30  ;;  %v5404_v7 = vpop.f32.mrf.mxu2  ;;  %1943 = vmatpush.msrb.mxu1 %v881_v37 }
 0x1c0   : > { %v1049_v29 = vpop.permute.xlu0 %1048  ;;  %v1047_v17 = vpop.permute.xlu1 %1046  ;;  %2202 = vperm.xlu2 %3502, %v2172_v53  }
 0x1c1   : > { %v1087_v12 = vsel %vm652_vm0, %v1049_v29, %v5149_v42  ;;  %v5415_v1 = vpop.f32.mrf.mxu3  ;;  %v1063_v14 = vsel %vm652_vm0, %v6465_v3, %v1049_v29  ;;  %1944 = vmatpush.msrb.mxu1 %v880_v8  ;;  %v5421_v26 = vpop.f32.mrf.mxu1  ;;  %v6467_v42 = vunpack.i.h.bf16 %v5082_v41  ;;  %v1086_v24 = vsel %vm652_vm0, %v1047_v17, %v5191_v52  ;;  %v5497_v29 = vld [vmem:[%s6302_s2 + $0x10] sm:$0xff] }
 0x1c2   : > { %1986 = vmatpush.msrb.mxu3 %v1063_v14  ;;  %3249 = vmatpush.msk.msrb.mxu2 %vm696_vm4, %v1087_v12  ;;  %v5507_v3 = vpop.permute.xlu2 %1391 }
 0x1c3   : > { %v1062_v16 = vsel %vm652_vm0, %v6467_v42, %v1047_v17  ;;  %1945 = vmatpush.msrb.mxu1 %v879_v5 }
 0x1c4   : > { %1987 = vmatpush.msrb.mxu3 %v1062_v16  ;;  %3250 = vmatpush.msk.msrb.mxu2 %vm696_vm4, %v1086_v24 }
 0x1c5   : > { %v5446_v41 = vpop.f32.mrf.mxu0  ;;  %1946 = vmatpush.msrb.mxu1 %v878_v48  ;;  %1886 = vmatmul.f32.gmra.mxu0 %v4709_v4 }
 0x1c6   : > { %3051 = vmatmul.msk.f32.gmra.mxu3 %vm1414_vm3, %v4769_v25  ;;  %1795 = vmatmul.f32.gmra.mxu1 %v4496_v59  ;;  %v5471_v59 = vld [vmem:[%s6302_s2] sm:$0xff] }
 0x1c7   : > { %v5452_v52 = vpop.f32.mrf.mxu2  ;;  %3062 = vmatmul.msk.f32.gmra.mxu2 %vm1414_vm3, %v4908_v19 }
 0x1c8   : > { %v5461_v36 = vpop.permute.xlu1 %1406  ;;  %v5485_v0 = vpop.permute.xlu0 %1411 }
 0x1c9   : > { %v5459_v28 = vpop.f32.mrf.mxu3  ;;  %v1512_v46 = vpop.f32.mrf.mxu1  ;;  %v1478_v47 = vadd.f32 %v1477_v33, %v5485_v0  ;;  %v1475_v8 = vadd.f32 %v5331_v35, %v5461_v36  ;;  %v1557_v53 = vadd.f32 %v5347_v55, %v5461_v36 }
 0x1cd   : > { %v5463_v62 = vpop.f32.mrf.mxu0  ;;  %2029 = vmatmul.f32.vlgmr.msrb.gmra.mxu0 %v5471_v59 }
 0x1ce   : > { %3052 = vmatmul.msk.f32.gmra.mxu3 %vm1414_vm3, %v4816_v34  ;;  %1798 = vmatmul.f32.gmra.mxu1 %v4579_v27 }
 0x1cf   : > { %v5474_v56 = vpop.f32.mrf.mxu2  ;;  %3071 = vmatmul.msk.f32.vlgmr.msrb.gmra.mxu2 %vm1414_vm3, %v3511_v57 }
 0x1d0   : > { %v5489_v37 = vpop.permute.xlu1 %1396  ;;  %v5515_v35 = vpop.permute.xlu0 %1386 }
 0x1d1   : > { %v1594_v27 = vpop.f32.mrf.mxu3  ;;  %v1515_v38 = vpop.f32.mrf.mxu1  ;;  %v1469_v42 = vadd.f32 %v5227_v51, %v5489_v37  ;;  %v1463_v49 = vadd.f32 %v5130_v15, %v5515_v35  ;;  %v1551_v55 = vadd.f32 %v5234_v58, %v5489_v37 }
 0x1d2   : > { %v1516_v5 = vadd.f32 %v1515_v38, %v1475_v8  ;;  %v1554_v8 = vadd.f32 %v5295_v2, %v5479_v11 }
 0x1d4   : > { %v2143_v22 = vmax.f32 %v1516_v5, 0.0  ;;  %v1504_v5 = vadd.f32 %v5311_v18, %v1463_v49 }
 0x1d5   : > { %v5487_v61 = vpop.f32.mrf.mxu0  ;;  %2032 = vmatmul.f32.gmra.mxu0 %v5497_v29 }
 0x1d6   : > { %3053 = vmatmul.msk.f32.gmra.mxu3 %vm1414_vm3, %v4866_v30  ;;  %1801 = vmatmul.f32.gmra.mxu1 %v4643_v40  ;;  %v1472_v40 = vadd.f32 %v5290_v13, %v5479_v11  ;;  %v5525_v13 = vld [vmem:[%s6302_s2 + $0x20] sm:$0xff] }
 0x1d7   : > { %v5500_v17 = vpop.f32.mrf.mxu2  ;;  %3072 = vmatmul.msk.f32.gmra.mxu2 %vm1414_vm3, %v4566_v21  ;;  %v1466_v21 = vadd.f32 %v5168_v39, %v5507_v3  ;;  %v1560_v39 = vadd.f32 %v5404_v7, %v5485_v0 }
 0x1d8   : > { %v1513_v24 = vadd.f32 %v1512_v46, %v1472_v40  ;;  %v5530_v20 = vpop.permute.xlu1 %1381 }
 0x1d9   : > { %v1597_v12 = vpop.f32.mrf.mxu3  ;;  %v1518_v14 = vpop.f32.mrf.mxu1  ;;  %v1460_v7 = vadd.f32 %v5088_v50, %v5530_v20  ;;  %v5560_v50 = vld [vmem:[%s6302_s2 + $0x30] sm:$0xff] }
 0x1da   : > { %v1519_v10 = vadd.f32 %v1518_v14, %v1478_v47  ;;  %v2135_v46 = vmax.f32 %v1513_v24, 0.0  ;;  %v1598_v40 = vadd.f32 %v1597_v12, %v1557_v53 }
 0x1db   : > { %v1501_v58 = vadd.f32 %v5250_v54, %v1460_v7  ;;  %v1545_v54 = vadd.f32 %v5139_v44, %v5515_v35  ;;  %v6471_v44 = vld [vmem:[#allocation25_spill] sm:$0xff] }
 0x1dc   : > { %v2151_v16 = vmax.f32 %v1519_v10, 0.0 }
 0x1dd   : > { %v5513_v33 = vpop.f32.mrf.mxu0  ;;  %2035 = vmatmul.f32.gmra.mxu0 %v5525_v13 }
 0x1de   : > { %3054 = vmatmul.msk.f32.gmra.mxu3 %vm1414_vm3, %v4908_v19  ;;  %1804 = vmatmul.f32.gmra.mxu1 %v4709_v4  ;;  %v1510_v4 = vadd.f32 %v5421_v26, %v1469_v42  ;;  %v5548_v26 = vpop.permute.xlu2 %1376 }
 0x1df   : > { %v5528_v51 = vpop.f32.mrf.mxu2  ;;  %3073 = vmatmul.msk.f32.gmra.mxu2 %vm1414_vm3, %v4636_v32  ;;  %2247 = vmatpush.msra.mxu1 %v2151_v16  ;;  %v1507_v32 = vadd.f32 %v5363_v60, %v1466_v21  ;;  %v1595_v60 = vadd.f32 %v1594_v27, %v1554_v8  ;;  %v1457_v18 = vadd.f32 %v5064_v63, %v5548_v26  ;;  %v2144_v27 = vmax.f32 %v1598_v40, 0.0 }
 0x1e0   : > { %v2127_v14 = vmax.f32 %v1510_v4, 0.0  ;;  %v2111_v16 = vmax.f32 %v1504_v5, 0.0  ;;  %v1539_v49 = vadd.f32 %v6471_v44, %v5548_v26 }
 0x1e1   : > { %v1600_v48 = vpop.f32.mrf.mxu3  ;;  %2248 = vmatpush.msra.mxu1 %v2143_v22  ;;  %v5541_v47 = vpop.f32.mrf.mxu1  ;;  %v2119_v2 = vmax.f32 %v1507_v32, 0.0  ;;  %v2136_v24 = vmax.f32 %v1595_v60, 0.0  ;;  %v6470_v22 = vld [vmem:[#allocation23_spill] sm:$0xff] }
 0x1e2   : > { %v1601_v38 = vadd.f32 %v1600_v48, %v1560_v39  ;;  %v1586_v48 = vadd.f32 %v5349_v45, %v1545_v54  ;;  %v3516_v45 = vld [vmem:[%s6302_s2 + $0x40] sm:$0xff]  ;;  %v1580_v8 = vadd.f32 %v5242_v43, %v1539_v49  ;;  %v3518_v43 = vld [vmem:[%s6302_s2 + $0x50] sm:$0xff] }
 0x1e3   : > { %2249 = vmatpush.msra.mxu1 %v2135_v46 }
 0x1e4   : > { %v2152_v15 = vmax.f32 %v1601_v38, 0.0 }
 0x1e5   : > { %v5552_v10 = vpop.f32.mrf.mxu0  ;;  %2250 = vmatpush.msra.mxu1 %v2127_v14  ;;  %2038 = vmatmul.f32.gmra.mxu0 %v5560_v50 }
 0x1e6   : > { %3063 = vmatmul.msk.f32.vlgmr.msrb.gmra.mxu3 %vm1414_vm3, %v3511_v57  ;;  %1947 = vmatmul.f32.vlgmr.msrb.gmra.mxu1 %v5471_v59  ;;  %v1592_v59 = vadd.f32 %v5459_v28, %v1551_v55  ;;  %v1548_v57 = vadd.f32 %v5180_v9, %v5507_v3  ;;  %v1498_v28 = vadd.f32 %v5198_v31, %v1457_v18  ;;  %v3515_v31 = vld [vmem:[%s6302_s2 + $0x18] sm:$0xff] }
 0x1e7   : > { %v5563_v12 = vpop.f32.mrf.mxu2  ;;  %3074 = vmatmul.msk.f32.gmra.mxu2 %vm1414_vm3, %v4704_v6  ;;  %2288 = vmatpush.msra.mxu3 %v2152_v15  ;;  %v2103_v6 = vmax.f32 %v1501_v58, 0.0  ;;  %v1542_v9 = vadd.f32 %v6470_v22, %v5530_v20  ;;  %v1709_v22 = vadd.f32 %v5487_v61, %v5515_v35  ;;  %v1706_v61 = vadd.f32 %v5463_v62, %v5530_v20 }
 0x1e8   : > { %2251 = vmatpush.msra.mxu1 %v2119_v2  ;;  %v1589_v21 = vadd.f32 %v5415_v1, %v1548_v57  ;;  %v2128_v39 = vmax.f32 %v1592_v59, 0.0  ;;  %v2095_v1 = vmax.f32 %v1498_v28, 0.0  ;;  %v3519_v59 = vld [vmem:[%s6302_s2 + $0x38] sm:$0xff]  ;;  %v1712_v28 = vadd.f32 %v5513_v33, %v5507_v3  ;;  %v3522_v33 = vld [vmem:[%s6302_s2 + $0x70] sm:$0xff] }
 0x1e9   : > { %v5573_v42 = vpop.f32.mrf.mxu3  ;;  %2289 = vmatpush.msra.mxu3 %v2144_v27  ;;  %v5577_v63 = vpop.f32.mrf.mxu1  ;;  %v1583_v38 = vadd.f32 %v5297_v23, %v1542_v9  ;;  %v2096_v23 = vmax.f32 %v1580_v8, 0.0  ;;  %v1750_v44 = vadd.f32 %v5500_v17, %v1709_v22 }
 0x1ea   : > { %2252 = vmatpush.msra.mxu1 %v2111_v16  ;;  %v2120_v46 = vmax.f32 %v1589_v21, 0.0  ;;  %v1624_v22 = vadd.f32 %v5577_v63, %v5530_v20  ;;  %v5715_v63 = vld [vmem:[#allocation8 + $0x18] sm:$0xff] }
 0x1eb   : > { %2290 = vmatpush.msra.mxu3 %v2136_v24  ;;  %v2104_v40 = vmax.f32 %v1583_v38, 0.0  ;;  %v2114_v38 = vmax.f32 %v1750_v44, 0.0 }
 0x1ec   : > { %2253 = vmatpush.msra.mxu1 %v2103_v6 }
 0x1ed   : > { %v1717_v4 = vpop.f32.mrf.mxu0  ;;  %2291 = vmatpush.msra.mxu3 %v2128_v39  ;;  %2041 = vmatmul.f32.gmra.mxu0 %v3516_v45 }
 0x1ee   : > { %1950 = vmatmul.f32.gmra.mxu1 %v5497_v29  ;;  %3064 = vmatmul.msk.f32.gmra.mxu3 %vm1414_vm3, %v3515_v31  ;;  %v2112_v29 = vmax.f32 %v1586_v48, 0.0  ;;  %v1718_v2 = vadd.f32 %v1717_v4, %v5479_v11  ;;  %v1753_v4 = vadd.f32 %v5528_v51, %v1712_v28 }
 0x1ef   : > { %v1758_v53 = vpop.f32.mrf.mxu2  ;;  %3075 = vmatmul.msk.f32.gmra.mxu2 %vm1414_vm3, %v4769_v25  ;;  %2254 = vmatpush.msra.mxu1 %v2095_v1  ;;  %v3517_v25 = vld [vmem:[%s6302_s2 + $0x28] sm:$0xff]  ;;  %v1747_v1 = vadd.f32 %v5474_v56, %v1706_v61 }
 0x1f0   : > { %2292 = vmatpush.msra.mxu3 %v2120_v46  ;;  %v1759_v54 = vadd.f32 %v1758_v53, %v1718_v2  ;;  %v2122_v31 = vmax.f32 %v1753_v4, 0.0 }
 0x1f1   : > { %v5597_v32 = vpop.f32.mrf.mxu3  ;;  %v5600_v7 = vpop.f32.mrf.mxu1  ;;  %v2106_v17 = vmax.f32 %v1747_v1, 0.0 }
 0x1f2   : > { %2293 = vmatpush.msra.mxu3 %v2112_v29  ;;  %v2138_v39 = vmax.f32 %v1759_v54, 0.0 }
 0x1f4   : > { %2294 = vmatpush.msra.mxu3 %v2104_v40  ;;  %v5665_v40 = vld [vmem:[#allocation8] sm:$0xff] }
 0x1f5   : > { %v1720_v15 = vpop.f32.mrf.mxu0  ;;  %2044 = vmatmul.f32.gmra.mxu0 %v3518_v43 }
 0x1f6   : > { %2295 = vmatpush.msra.mxu3 %v2096_v23  ;;  %1953 = vmatmul.f32.gmra.mxu1 %v5525_v13  ;;  %v1721_v5 = vadd.f32 %v1720_v15, %v5461_v36 }
 0x1f7   : > { %v1761_v14 = vpop.f32.mrf.mxu2  ;;  %3065 = vmatmul.msk.f32.gmra.mxu3 %vm1414_vm3, %v3517_v25  ;;  %3076 = vmatmul.msk.f32.gmra.mxu2 %vm1414_vm3, %v4816_v34  ;;  %v3520_v34 = vld [vmem:[%s6302_s2 + $0x60] sm:$0xff]  ;;  %v5675_v25 = vld [vmem:[#allocation8 + $0x8] sm:$0xff] }
 0x1f8   : > { %v1762_v58 = vadd.f32 %v1761_v14, %v1721_v5 }
 0x1f9   : > { %v5612_v55 = vpop.f32.mrf.mxu3  ;;  %v5615_v13 = vpop.f32.mrf.mxu1 }
 0x1fa   : > { %v2146_v24 = vmax.f32 %v1762_v58, 0.0 }
 0x1fd   : > { %v1723_v60 = vpop.f32.mrf.mxu0  ;;  %2047 = vmatmul.f32.gmra.mxu0 %v3520_v34 }
 0x1fe   : > { %v1724_v18 = vadd.f32 %v1723_v60, %v5485_v0  ;;  %1956 = vmatmul.f32.gmra.mxu1 %v5560_v50  ;;  %v1715_v50 = vadd.f32 %v5552_v10, %v5489_v37  ;;  %v3521_v10 = vld [vmem:[%s6302_s2 + $0x48] sm:$0xff] }
 0x1ff   : > { %v1764_v27 = vpop.f32.mrf.mxu2  ;;  %3066 = vmatmul.msk.f32.gmra.mxu3 %vm1414_vm3, %v3519_v59  ;;  %3077 = vmatmul.msk.f32.gmra.mxu2 %vm1414_vm3, %v4866_v30 }
 0x200   : > { %v1765_v57 = vadd.f32 %v1764_v27, %v1724_v18  ;;  %v1756_v9 = vadd.f32 %v5563_v12, %v1715_v50  ;;  %v1703_v12 = vadd.f32 %v5446_v41, %v5548_v26  ;;  %v3523_v41 = vld [vmem:[%s6302_s2 + $0x58] sm:$0xff]  ;;  %v1630_v50 = vadd.f32 %v5615_v13, %v5507_v3 }
 0x201   : > { %v5629_v16 = vpop.f32.mrf.mxu3  ;;  %v1632_v6 = vpop.f32.mrf.mxu1 }
 0x202   : > { %v2154_v21 = vmax.f32 %v1765_v57, 0.0  ;;  %v2130_v49 = vmax.f32 %v1756_v9, 0.0  ;;  %v1744_v62 = vadd.f32 %v5452_v52, %v1703_v12  ;;  %v1633_v18 = vadd.f32 %v1632_v6, %v5489_v37  ;;  %v5691_v57 = vld [vmem:[#allocation8 + $0x10] sm:$0xff] }
 0x203   : > { %v1671_v13 = vadd.f32 %v5629_v16, %v1630_v50  ;;  %v1665_v16 = vadd.f32 %v5597_v32, %v1624_v22 }
 0x204   : > { %2370 = vmatpush.msra.mxu2 %v2154_v21  ;;  %v2098_v8 = vmax.f32 %v1744_v62, 0.0 }
 0x205   : > { %2050 = vmatmul.f32.gmra.mxu0 %v3522_v33 }
 0x206   : > { %2371 = vmatpush.msra.mxu2 %v2146_v24  ;;  %1959 = vmatmul.f32.gmra.mxu1 %v3516_v45 }
 0x207   : > { %3067 = vmatmul.msk.f32.gmra.mxu3 %vm1414_vm3, %v3521_v10  ;;  %v5646_v48 = vpop.f32.mrf.mxu0  ;;  %3078 = vmatmul.msk.f32.gmra.mxu2 %vm1414_vm3, %v4908_v19 }
 0x208   : > { %2372 = vmatpush.msra.mxu2 %v2138_v39 }
 0x209   : > { %v1673_v51 = vpop.f32.mrf.mxu3  ;;  %v1635_v46 = vpop.f32.mrf.mxu1 }
 0x20a   : > { %2373 = vmatpush.msra.mxu2 %v2130_v49  ;;  %v1636_v2 = vadd.f32 %v1635_v46, %v5479_v11  ;;  %v1674_v21 = vadd.f32 %v1673_v51, %v1633_v18  ;;  %v2121_v51 = vmax.f32 %v1671_v13, 0.0 }
 0x20c   : > { %v5656_v53 = vpop.f32.mrf.mxu2  ;;  %2374 = vmatpush.msra.mxu2 %v2122_v31  ;;  %v2129_v10 = vmax.f32 %v1674_v21, 0.0  ;;  %v5729_v31 = vld [vmem:[#allocation8 + $0x20] sm:$0xff] }
 0x20e   : > { %1962 = vmatmul.f32.gmra.mxu1 %v3518_v43  ;;  %2375 = vmatpush.msra.mxu2 %v2114_v38  ;;  %v5741_v38 = vld [vmem:[#allocation8 + $0x28] sm:$0xff] }
 0x20f   : > { %3068 = vmatmul.msk.f32.gmra.mxu3 %vm1414_vm3, %v3523_v41  ;;  %v5663_v45 = vpop.f32.mrf.mxu0 }
 0x210   : > { %2376 = vmatpush.msra.mxu2 %v2106_v17 }
 0x211   : > { %v1676_v29 = vpop.f32.mrf.mxu3  ;;  %v1638_v56 = vpop.f32.mrf.mxu1 }
 0x212   : > { %2377 = vmatpush.msra.mxu2 %v2098_v8  ;;  %v1639_v5 = vadd.f32 %v1638_v56, %v5461_v36  ;;  %v1677_v54 = vadd.f32 %v1676_v29, %v1636_v2  ;;  %v5755_v56 = vld [vmem:[#allocation8 + $0x30] sm:$0xff] }
 0x213   : > { %3103 = vmatmul.msk.f32.vlgmr.msra.gmra.mxu2 %vm1414_vm3, %v5665_v40 }
 0x214   : > { %v5669_v52 = vpop.f32.mrf.mxu2  ;;  %v2137_v9 = vmax.f32 %v1677_v54, 0.0 }
 0x216   : > { %1965 = vmatmul.f32.gmra.mxu1 %v3520_v34 }
 0x217   : > { %3069 = vmatmul.msk.f32.gmra.mxu3 %vm1414_vm3, %v4866_v30  ;;  %v5673_v23 = vpop.f32.mrf.mxu0 }
 0x218   : > { %v1873_v13 = vadd.f32 %v5673_v23, %v5515_v35  ;;  %v1867_v23 = vadd.f32 %v5646_v48, %v5548_v26 }
 0x219   : > { %v1679_v15 = vpop.f32.mrf.mxu3  ;;  %v1641_v14 = vpop.f32.mrf.mxu1 }
 0x21a   : > { %v1642_v60 = vadd.f32 %v1641_v14, %v5485_v0  ;;  %v1680_v27 = vadd.f32 %v1679_v15, %v1639_v5 }
 0x21b   : > { %3104 = vmatmul.msk.f32.gmra.mxu2 %vm1414_vm3, %v5675_v25 }
 0x21c   : > { %v5679_v43 = vpop.f32.mrf.mxu2  ;;  %v2145_v28 = vmax.f32 %v1680_v27, 0.0 }
 0x21e   : > { %1968 = vmatmul.f32.gmra.mxu1 %v3522_v33 }
 0x21f   : > { %3070 = vmatmul.msk.f32.gmra.mxu3 %vm1414_vm3, %v4908_v19  ;;  %v5686_v30 = vpop.f32.mrf.mxu0  ;;  %v1627_v19 = vadd.f32 %v5600_v7, %v5515_v35  ;;  %v1621_v7 = vadd.f32 %v5541_v47, %v5548_v26  ;;  %v2105_v47 = vmax.f32 %v1665_v16, 0.0 }
 0x221   : > { %v1682_v58 = vpop.f32.mrf.mxu3  ;;  %v5689_v34 = vpop.f32.mrf.mxu1  ;;  %v1668_v4 = vadd.f32 %v5612_v55, %v1627_v19  ;;  %v1662_v12 = vadd.f32 %v5573_v42, %v1621_v7 }
 0x222   : > { %v1683_v59 = vadd.f32 %v1682_v58, %v1642_v60  ;;  %v5771_v58 = vld [vmem:[#allocation8 + $0x38] sm:$0xff] }
 0x223   : > { %3105 = vmatmul.msk.f32.gmra.mxu2 %vm1414_vm3, %v5691_v57  ;;  %v2113_v44 = vmax.f32 %v1668_v4, 0.0  ;;  %v2097_v49 = vmax.f32 %v1662_v12, 0.0 }
 0x224   : > { %v2153_v24 = vmax.f32 %v1683_v59, 0.0 }
 0x225   : > { %v5701_v6 = vpop.f32.mrf.mxu2 }
 0x226   : > { %2329 = vmatpush.msra.mxu0 %v2153_v24  ;;  %3079 = vmatmul.msk.f32.vlgmr.msra.gmra.mxu1 %vm1414_vm3, %v5665_v40 }
 0x227   : > { %3087 = vmatmul.msk.f32.vlgmr.msra.gmra.mxu3 %vm1414_vm3, %v5665_v40  ;;  %v1878_v61 = vpop.f32.mrf.mxu0 }
 0x228   : > { %2330 = vmatpush.msra.mxu0 %v2145_v28  ;;  %v1879_v24 = vadd.f32 %v1878_v61, %v5489_v37  ;;  %v1876_v28 = vadd.f32 %v5686_v30, %v5507_v3  ;;  %v1870_v61 = vadd.f32 %v5663_v45, %v5530_v20 }
 0x229   : > { %v5708_v39 = vpop.f32.mrf.mxu3  ;;  %v5713_v33 = vpop.f32.mrf.mxu1 }
 0x22a   : > { %2331 = vmatpush.msra.mxu0 %v2137_v9  ;;  %v1917_v30 = vadd.f32 %v5701_v6, %v1876_v28  ;;  %v1911_v45 = vadd.f32 %v5669_v52, %v1870_v61  ;;  %v1785_v61 = vadd.f32 %v5689_v34, %v5548_v26 }
 0x22b   : > { %3106 = vmatmul.msk.f32.gmra.mxu2 %vm1414_vm3, %v5715_v63 }
 0x22c   : > { %2332 = vmatpush.msra.mxu0 %v2129_v10  ;;  %v2124_v6 = vmax.f32 %v1917_v30, 0.0 }
 0x22e   : > { %2333 = vmatpush.msra.mxu0 %v2121_v51  ;;  %3080 = vmatmul.msk.f32.gmra.mxu1 %vm1414_vm3, %v5675_v25 }
 0x22f   : > { %3088 = vmatmul.msk.f32.gmra.mxu3 %vm1414_vm3, %v5675_v25 }
 0x230   : > { %2334 = vmatpush.msra.mxu0 %v2113_v44  ;;  %v1919_v32 = vpop.f32.mrf.mxu2  ;;  %v1881_v42 = vpop.f32.mrf.mxu0 }
 0x231   : > { %v5725_v55 = vpop.f32.mrf.mxu3  ;;  %v1882_v18 = vadd.f32 %v1881_v42, %v5479_v11  ;;  %v1920_v9 = vadd.f32 %v1919_v32, %v1879_v24  ;;  %v1914_v32 = vadd.f32 %v5679_v43, %v1873_v13  ;;  %v1908_v42 = vadd.f32 %v5656_v53, %v1867_v23 }
 0x232   : > { %2335 = vmatpush.msra.mxu0 %v2105_v47  ;;  %v5727_v46 = vpop.f32.mrf.mxu1 }
 0x233   : > { %3107 = vmatmul.msk.f32.gmra.mxu2 %vm1414_vm3, %v5729_v31  ;;  %v2116_v48 = vmax.f32 %v1914_v32, 0.0  ;;  %v2100_v52 = vmax.f32 %v1908_v42, 0.0 }
 0x234   : > { %2336 = vmatpush.msra.mxu0 %v2097_v49  ;;  %v2132_v49 = vmax.f32 %v1920_v9, 0.0 }
 0x235   : > { %3095 = vmatmul.msk.f32.vlgmr.msra.gmra.mxu0 %vm1414_vm3, %v5665_v40 }
 0x236   : > { %3081 = vmatmul.msk.f32.gmra.mxu1 %vm1414_vm3, %v5691_v57 }
 0x237   : > { %3089 = vmatmul.msk.f32.gmra.mxu3 %vm1414_vm3, %v5691_v57 }
 0x239   : > { %v5739_v1 = vpop.f32.mrf.mxu3  ;;  %v1922_v62 = vpop.f32.mrf.mxu2 }
 0x23a   : > { %v1884_v17 = vpop.f32.mrf.mxu0  ;;  %v1923_v22 = vadd.f32 %v1922_v62, %v1882_v18  ;;  %v2108_v62 = vmax.f32 %v1911_v45, 0.0 }
 0x23b   : > { %v5743_v41 = vpop.f32.mrf.mxu1  ;;  %3108 = vmatmul.msk.f32.gmra.mxu2 %vm1414_vm3, %v5741_v38  ;;  %v1885_v60 = vadd.f32 %v1884_v17, %v5461_v36 }
 0x23c   : > { %v2140_v16 = vmax.f32 %v1923_v22, 0.0  ;;  %v1794_v24 = vadd.f32 %v5743_v41, %v5507_v3  ;;  %v1788_v41 = vadd.f32 %v5713_v33, %v5530_v20 }
 0x23d   : > { %3096 = vmatmul.msk.f32.gmra.mxu0 %vm1414_vm3, %v5675_v25 }
 0x23e   : > { %3082 = vmatmul.msk.f32.gmra.mxu1 %vm1414_vm3, %v5715_v63 }
 0x23f   : > { %3090 = vmatmul.msk.f32.gmra.mxu3 %vm1414_vm3, %v5715_v63 }
 0x241   : > { %v5753_v29 = vpop.f32.mrf.mxu3 }
 0x242   : > { %v1925_v8 = vpop.f32.mrf.mxu2  ;;  %v1887_v14 = vpop.f32.mrf.mxu0 }
 0x243   : > { %v5757_v15 = vpop.f32.mrf.mxu1  ;;  %3109 = vmatmul.msk.f32.gmra.mxu2 %vm1414_vm3, %v5755_v56  ;;  %v1888_v5 = vadd.f32 %v1887_v14, %v5485_v0  ;;  %v1926_v19 = vadd.f32 %v1925_v8, %v1885_v60 }
 0x245   : > { %3097 = vmatmul.msk.f32.gmra.mxu0 %vm1414_vm3, %v5691_v57  ;;  %v2148_v7 = vmax.f32 %v1926_v19, 0.0  ;;  %v1797_v19 = vadd.f32 %v5757_v15, %v5489_v37  ;;  %v1835_v15 = vadd.f32 %v5753_v29, %v1794_v24 }
 0x246   : > { %3083 = vmatmul.msk.f32.gmra.mxu1 %vm1414_vm3, %v5729_v31 }
 0x247   : > { %3091 = vmatmul.msk.f32.gmra.mxu3 %vm1414_vm3, %v5729_v31  ;;  %v2123_v33 = vmax.f32 %v1835_v15, 0.0 }
 0x249   : > { %v5769_v2 = vpop.f32.mrf.mxu3 }
 0x24a   : > { %v1928_v27 = vpop.f32.mrf.mxu2  ;;  %v2030_v54 = vpop.f32.mrf.mxu0  ;;  %v1838_v9 = vadd.f32 %v5769_v2, %v1797_v19 }
 0x24b   : > { %v1929_v59 = vadd.f32 %v1928_v27, %v1888_v5  ;;  %v1799_v50 = vpop.f32.mrf.mxu1  ;;  %3110 = vmatmul.msk.f32.gmra.mxu2 %vm1414_vm3, %v5771_v58  ;;  %v2031_v10 = vadd.f32 %v2030_v54, %v5548_v26 }
 0x24c   : > { %v1800_v18 = vadd.f32 %v1799_v50, %v5479_v11  ;;  %v1791_v50 = vadd.f32 %v5727_v46, %v5515_v35  ;;  %v2131_v2 = vmax.f32 %v1838_v9, 0.0 }
 0x24d   : > { %3098 = vmatmul.msk.f32.gmra.mxu0 %vm1414_vm3, %v5715_v63  ;;  %v2156_v21 = vmax.f32 %v1929_v59, 0.0 }
 0x24e   : > { %3084 = vmatmul.msk.f32.gmra.mxu1 %vm1414_vm3, %v5741_v38  ;;  %v1832_v46 = vadd.f32 %v5739_v1, %v1791_v50 }
 0x24f   : > { %3092 = vmatmul.msk.f32.gmra.mxu3 %vm1414_vm3, %v5741_v38 }
 0x250   : > { %2452 = vmatpush.msrb.mxu3 %v2156_v21  ;;  %v2115_v23 = vmax.f32 %v1832_v46, 0.0 }
 0x251   : > { %v1840_v4 = vpop.f32.mrf.mxu3 }
 0x252   : > { %2453 = vmatpush.msrb.mxu3 %v2148_v7  ;;  %v2071_v51 = vpop.f32.mrf.mxu2  ;;  %v5793_v47 = vpop.f32.mrf.mxu0  ;;  %v1841_v21 = vadd.f32 %v1840_v4, %v1800_v18 }
 0x253   : > { %v5791_v12 = vadd.f32 %v2071_v51, %v2031_v10  ;;  %v1802_v44 = vpop.f32.mrf.mxu1 }
 0x254   : > { %2454 = vmatpush.msrb.mxu3 %v2140_v16  ;;  %v1803_v53 = vadd.f32 %v1802_v44, %v5461_v36  ;;  %v2139_v4 = vmax.f32 %v1841_v21, 0.0  ;;  %v1829_v16 = vadd.f32 %v5725_v55, %v1788_v41  ;;  %v1826_v44 = vadd.f32 %v5708_v39, %v1785_v61 }
 0x255   : > { %3099 = vmatmul.msk.f32.gmra.mxu0 %vm1414_vm3, %v5729_v31 }
 0x256   : > { %2455 = vmatpush.msrb.mxu3 %v2132_v49  ;;  %3085 = vmatmul.msk.f32.gmra.mxu1 %vm1414_vm3, %v5755_v56  ;;  %v2107_v34 = vmax.f32 %v1829_v16, 0.0  ;;  %v2099_v1 = vmax.f32 %v1826_v44, 0.0  ;;  %v2034_v16 = vadd.f32 %v5793_v47, %v5530_v20  ;;  %v5901_v44 = vpop.permute.xlu0 %2177 }
 0x257   : > { %3093 = vmatmul.msk.f32.gmra.mxu3 %vm1414_vm3, %v5755_v56 }
 0x258   : > { %2456 = vmatpush.msrb.mxu3 %v2124_v6 }
 0x259   : > { %v1843_v43 = vpop.f32.mrf.mxu3 }
 0x25a   : > { %2457 = vmatpush.msrb.mxu3 %v2116_v48  ;;  %v5806_v17 = vpop.f32.mrf.mxu2  ;;  %v5808_v14 = vpop.f32.mrf.mxu0  ;;  %v1844_v27 = vadd.f32 %v1843_v43, %v1803_v53 }
 0x25b   : > { %v1805_v8 = vpop.f32.mrf.mxu1  ;;  %v2037_v15 = vadd.f32 %v5808_v14, %v5515_v35  ;;  %v2075_v14 = vadd.f32 %v5806_v17, %v2034_v16 }
 0x25c   : > { %2458 = vmatpush.msrb.mxu3 %v2108_v62  ;;  %v1806_v5 = vadd.f32 %v1805_v8, %v5485_v0  ;;  %v2147_v7 = vmax.f32 %v1844_v27, 0.0 }
 0x25d   : > { %3100 = vmatmul.msk.f32.gmra.mxu0 %vm1414_vm3, %v5741_v38  ;;  %v2110_v17 = vmax.f32 %v2075_v14, 0.0 }
 0x25e   : > { %2459 = vmatpush.msrb.mxu3 %v2100_v52  ;;  %3086 = vmatmul.msk.f32.gmra.mxu1 %vm1414_vm3, %v5771_v58 }
 0x25f   : > { %3094 = vmatmul.msk.f32.gmra.mxu3 %vm1414_vm3, %v5771_v58 }
 0x261   : > { %v1846_v60 = vpop.f32.mrf.mxu3 }
 0x262   : > { %v1847_v59 = vadd.f32 %v1846_v60, %v1806_v5  ;;  %v5819_v54 = vpop.f32.mrf.mxu2  ;;  %v5827_v13 = vpop.f32.mrf.mxu0 }
 0x263   : > { %v5825_v22 = vpop.f32.mrf.mxu1  ;;  %v2040_v9 = vadd.f32 %v5827_v13, %v5507_v3  ;;  %v2078_v13 = vadd.f32 %v5819_v54, %v2037_v15  ;;  %v2570_v54 = vld [vmem:[%s3862_s9 + $0x18] sm:$0xff] }
 0x264   : > { %v2155_v28 = vmax.f32 %v1847_v59, 0.0 }
 0x265   : > { %3101 = vmatmul.msk.f32.gmra.mxu0 %vm1414_vm3, %v5755_v56 }
 0x266   : > { %2411 = vmatpush.msrb.mxu1 %v2155_v28 }
 0x267   : > { %3119 = vmatmul.msk.f32.vlgmr.msrb.gmra.mxu3 %vm1414_vm3, %v5665_v40 }
 0x268   : > { %2412 = vmatpush.msrb.mxu1 %v2147_v7 }
 0x269   : > { %v5839_v10 = vpop.f32.mrf.mxu3 }
 0x26a   : > { %2413 = vmatpush.msrb.mxu1 %v2139_v4  ;;  %v2080_v30 = vpop.f32.mrf.mxu2  ;;  %v2042_v29 = vpop.f32.mrf.mxu0 }
 0x26b   : > { %v5845_v51 = vpop.f32.mrf.mxu1  ;;  %v2043_v21 = vadd.f32 %v2042_v29, %v5489_v37  ;;  %v2081_v4 = vadd.f32 %v2080_v30, %v2040_v9  ;;  %v5898_v29 = vld [vmem:[%s3870_s20] sm:$0xf] }
 0x26c   : > { %2414 = vmatpush.msrb.mxu1 %v2131_v2  ;;  %v1952_v14 = vadd.f32 %v5845_v51, %v5530_v20  ;;  %v1949_v51 = vadd.f32 %v5825_v22, %v5548_v26 }
 0x26d   : > { %3102 = vmatmul.msk.f32.gmra.mxu0 %vm1414_vm3, %v5771_v58  ;;  %v2126_v30 = vmax.f32 %v2081_v4, 0.0  ;;  %v5935_v4 = vperm.slane %v5898_v29, 0 }
 0x26e   : > { %2415 = vmatpush.msrb.mxu1 %v2123_v33 }
 0x26f   : > { %3120 = vmatmul.msk.f32.gmra.mxu3 %vm1414_vm3, %v5675_v25 }
 0x270   : > { %2416 = vmatpush.msrb.mxu1 %v2115_v23  ;;  %v2118_v23 = vmax.f32 %v2078_v13, 0.0 }
 0x271   : > { %v5852_v32 = vpop.f32.mrf.mxu3 }
 0x272   : > { %2417 = vmatpush.msrb.mxu1 %v2107_v34  ;;  %v2083_v55 = vpop.f32.mrf.mxu2  ;;  %v2045_v45 = vpop.f32.mrf.mxu0 }
 0x273   : > { %v5854_v49 = vpop.f32.mrf.mxu1  ;;  %v2046_v59 = vadd.f32 %v2045_v45, %v5479_v11  ;;  %v2084_v7 = vadd.f32 %v2083_v55, %v2043_v21 }
 0x274   : > { %2418 = vmatpush.msrb.mxu1 %v2099_v1  ;;  %v5908_v1 = vperm.slane %v5898_v29, 3 }
 0x275   : > { %3111 = vmatmul.msk.f32.vlgmr.msrb.gmra.mxu1 %vm1414_vm3, %v5665_v40  ;;  %v2134_v33 = vmax.f32 %v2084_v7, 0.0  ;;  %v2567_v7 = vld [vmem:[%s3862_s9] sm:$0xff] }
 0x277   : > { %3121 = vmatmul.msk.f32.gmra.mxu3 %vm1414_vm3, %v5691_v57 }
 0x27a   : > { %v5860_v39 = vpop.f32.mrf.mxu3  ;;  %v2086_v6 = vpop.f32.mrf.mxu2 }
 0x27b   : > { %v5862_v42 = vpop.f32.mrf.mxu1  ;;  %v2048_v48 = vpop.f32.mrf.mxu0  ;;  %v2087_v28 = vadd.f32 %v2086_v6, %v2046_v59 }
 0x27c   : > { %v2049_v53 = vadd.f32 %v2048_v48, %v5461_v36  ;;  %v2102_v48 = vmax.f32 %v5791_v12, 0.0 }
 0x27d   : > { %3112 = vmatmul.msk.f32.gmra.mxu1 %vm1414_vm3, %v5675_v25  ;;  %v2142_v61 = vmax.f32 %v2087_v28, 0.0 }
 0x27f   : > { %3122 = vmatmul.msk.f32.gmra.mxu3 %vm1414_vm3, %v5715_v63 }
 0x282   : > { %v5868_v43 = vpop.f32.mrf.mxu3  ;;  %v2089_v62 = vpop.f32.mrf.mxu2 }
 0x283   : > { %v5870_v8 = vpop.f32.mrf.mxu1  ;;  %v2051_v52 = vpop.f32.mrf.mxu0  ;;  %v2090_v24 = vadd.f32 %v2089_v62, %v2049_v53  ;;  %v2574_v53 = vld [vmem:[%s3862_s9 + $0x38] sm:$0xff] }
 0x284   : > { %v2052_v5 = vadd.f32 %v2051_v52, %v5485_v0  ;;  %v5919_v52 = vpop.permute.xlu1 %2182 }
 0x285   : > { %3113 = vmatmul.msk.f32.gmra.mxu1 %vm1414_vm3, %v5691_v57  ;;  %v2150_v41 = vmax.f32 %v2090_v24, 0.0 }
 0x287   : > { %3123 = vmatmul.msk.f32.gmra.mxu3 %vm1414_vm3, %v5729_v31 }
 0x28a   : > { %v5878_v60 = vpop.f32.mrf.mxu3  ;;  %v2092_v18 = vpop.f32.mrf.mxu2 }
 0x28b   : > { %v5880_v27 = vpop.f32.mrf.mxu1  ;;  %v2093_v19 = vadd.f32 %v2092_v18, %v2052_v5 }
 0x28c   : > { %v1964_v21 = vadd.f32 %v5880_v27, %v5479_v11  ;;  %v5942_v27 = vpop.permute.xlu2 %2187 }
 0x28d   : > { %3114 = vmatmul.msk.f32.gmra.mxu1 %vm1414_vm3, %v5715_v63  ;;  %v2158_v50 = vmax.f32 %v2093_v19, 0.0 }
 0x28f   : > { %3124 = vmatmul.msk.f32.gmra.mxu3 %vm1414_vm3, %v5741_v38  ;;  %2534 = vmatpush.msrb.mxu2 %v2158_v50 }
 0x290   : > { %3259 = vmatpush.msra.mxu3 %v2158_v50 }
 0x291   : > { %2535 = vmatpush.msrb.mxu2 %v2150_v41 }
 0x292   : > { %3260 = vmatpush.msra.mxu3 %v2150_v41  ;;  %v2004_v46 = vpop.f32.mrf.mxu3 }
 0x293   : > { %v1966_v2 = vpop.f32.mrf.mxu1  ;;  %2536 = vmatpush.msrb.mxu2 %v2142_v61 }
 0x294   : > { %3261 = vmatpush.msra.mxu3 %v2142_v61  ;;  %v1967_v18 = vadd.f32 %v1966_v2, %v5461_v36  ;;  %v1961_v36 = vadd.f32 %v5870_v8, %v5489_v37  ;;  %v1958_v2 = vadd.f32 %v5862_v42, %v5507_v3  ;;  %v2578_v8 = vld [vmem:[%s3862_s9 + $0x58] sm:$0xff]  ;;  %v1955_v3 = vadd.f32 %v5854_v49, %v5515_v35 }
 0x295   : > { %3115 = vmatmul.msk.f32.gmra.mxu1 %vm1414_vm3, %v5729_v31  ;;  %2537 = vmatpush.msrb.mxu2 %v2134_v33  ;;  %v5964_v35 = vperm.slane %v5898_v29, 1 }
 0x296   : > { %3262 = vmatpush.msra.mxu3 %v2134_v33  ;;  %v2379_v47 = vpop.f32.mrf.mxu2  ;;  %v2002_v16 = vadd.f32 %v5878_v60, %v1961_v36  ;;  %v1999_v42 = vadd.f32 %v5868_v43, %v1958_v2  ;;  %v2571_v43 = vld [vmem:[%s3862_s9 + $0x20] sm:$0xff] }
 0x297   : > { %3125 = vmatmul.msk.f32.gmra.mxu3 %vm1414_vm3, %v5755_v56  ;;  %2538 = vmatpush.msrb.mxu2 %v2126_v30  ;;  %v2380_v34 = vadd.f32 %v2379_v47, %v5901_v44  ;;  %v2575_v36 = vld [vmem:[%s3862_s9 + $0x40] sm:$0xff] }
 0x298   : > { %3263 = vmatpush.msra.mxu3 %v2126_v30 }
 0x299   : > { %v2602_v55 = vadd.f32 %v2570_v54, %v2380_v34  ;;  %2539 = vmatpush.msrb.mxu2 %v2118_v23  ;;  %v2568_v54 = vld [vmem:[%s3862_s9 + $0x8] sm:$0xff]  ;;  %v2133_v34 = vmax.f32 %v2002_v16, 0.0 }
 0x29a   : > { %3264 = vmatpush.msra.mxu3 %v2118_v23  ;;  %v2007_v45 = vpop.f32.mrf.mxu3  ;;  %v1996_v23 = vadd.f32 %v5860_v39, %v1955_v3  ;;  %v1993_v39 = vadd.f32 %v5852_v32, %v1952_v14 }
 0x29b   : > { %v1969_v6 = vpop.f32.mrf.mxu1  ;;  %v2644_v62 = vmul.f32 %v5908_v1, %v2602_v55  ;;  %2540 = vmatpush.msrb.mxu2 %v2110_v17  ;;  %v2008_v28 = vadd.f32 %v2007_v45, %v1967_v18  ;;  %v2125_v45 = vmax.f32 %v1999_v42, 0.0  ;;  %v2573_v42 = vld [vmem:[%s3862_s9 + $0x30] sm:$0xff] }
 0x29c   : > { %3265 = vmatpush.msra.mxu3 %v2110_v17  ;;  %v1970_v59 = vadd.f32 %v1969_v6, %v5485_v0  ;;  %v2005_v0 = vadd.f32 %v2004_v46, %v1964_v21  ;;  %v2117_v26 = vmax.f32 %v1996_v23, 0.0  ;;  %v2579_v23 = vld [vmem:[%s3862_s9 + $0x60] sm:$0xff] }
 0x29d   : > { %3116 = vmatmul.msk.f32.gmra.mxu1 %vm1414_vm3, %v5741_v38  ;;  %2676 = vst [vmem:[%s5916_s23 + $0x18] sm:$0xff] %v2644_v62  ;;  %2541 = vmatpush.msrb.mxu2 %v2102_v48  ;;  %v2149_v13 = vmax.f32 %v2008_v28, 0.0  ;;  %v5975_v62 = vpop.permute.xlu0 %2192  ;;  %v2572_v28 = vld [vmem:[%s3862_s9 + $0x28] sm:$0xff] }
 0x29e   : > { %3266 = vmatpush.msra.mxu3 %v2102_v48  ;;  %3135 = vmatmul.msk.f32.vlgmr.msrb.gmra.mxu2 %vm1414_vm3, %v5665_v40  ;;  %v2382_v12 = vpop.f32.mrf.mxu2  ;;  %v2141_v60 = vmax.f32 %v2005_v0, 0.0 }
 0x29f   : > { %3126 = vmatmul.msk.f32.gmra.mxu3 %vm1414_vm3, %v5771_v58  ;;  %v2383_v5 = vadd.f32 %v2382_v12, %v5919_v52  ;;  %v1990_v12 = vadd.f32 %v5839_v10, %v1949_v51  ;;  %v6024_v51 = vpop.permute.xlu2 %2202 }
 0x2a1   : > { %v2606_v24 = vadd.f32 %v2574_v53, %v2383_v5  ;;  %v2582_v53 = vld [vmem:[%s3862_s9 + $0x78] sm:$0xff] }
 0x2a2   : > { %v2010_v19 = vpop.f32.mrf.mxu3 }
 0x2a3   : > { %v2011_v50 = vadd.f32 %v2010_v19, %v1970_v59  ;;  %v2256_v9 = vpop.f32.mrf.mxu1  ;;  %v2648_v41 = vmul.f32 %v5908_v1, %v2606_v24  ;;  %v2109_v59 = vmax.f32 %v1993_v39, 0.0  ;;  %v2569_v24 = vld [vmem:[%s3862_s9 + $0x10] sm:$0xff] }
 0x2a4   : > { %v2257_v15 = vadd.f32 %v2256_v9, %v5901_v44  ;;  %v5990_v9 = vperm.slane %v5898_v29, 2 }
 0x2a5   : > { %v2157_v61 = vmax.f32 %v2011_v50, 0.0  ;;  %3117 = vmatmul.msk.f32.gmra.mxu1 %vm1414_vm3, %v5755_v56  ;;  %2680 = vst [vmem:[%s5916_s23 + $0x38] sm:$0xff] %v2648_v41 }
 0x2a6   : > { %v2599_v11 = vadd.f32 %v2567_v7, %v2257_v15  ;;  %3136 = vmatmul.msk.f32.gmra.mxu2 %vm1414_vm3, %v5675_v25  ;;  %v2385_v37 = vpop.f32.mrf.mxu2  ;;  %v2101_v7 = vmax.f32 %v1990_v12, 0.0 }
 0x2a7   : > { %2493 = vmatpush.msrb.mxu0 %v2157_v61  ;;  %3251 = vmatpush.msra.mxu1 %v2157_v61  ;;  %v2386_v33 = vadd.f32 %v2385_v37, %v5942_v27 }
 0x2a8   : > { %v2641_v46 = vmul.f32 %v5935_v4, %v2599_v11  ;;  %3142 = vmatmul.msk.f32.vlgmr.msra.gmra.mxu3 %vm1414_vm3, %v5771_v58 }
 0x2a9   : > { %2494 = vmatpush.msrb.mxu0 %v2149_v13  ;;  %v2610_v30 = vadd.f32 %v2578_v8, %v2386_v33  ;;  %3252 = vmatpush.msra.mxu1 %v2149_v13  ;;  %v6000_v13 = vpop.permute.xlu1 %2197 }
 0x2aa   : > { %2673 = vst [vmem:[%s5916_s23] sm:$0xff] %v2641_v46  ;;  %v2297_v47 = vpop.f32.mrf.mxu3  ;;  %v2586_v46 = vld [vmem:[%s3862_s9 + $0x98] sm:$0xff] }
 0x2ab   : > { %v2298_v17 = vadd.f32 %v2297_v47, %v5901_v44  ;;  %2495 = vmatpush.msrb.mxu0 %v2141_v60  ;;  %v2259_v49 = vpop.f32.mrf.mxu1  ;;  %v2652_v55 = vmul.f32 %v5908_v1, %v2610_v30  ;;  %3253 = vmatpush.msra.mxu1 %v2141_v60  ;;  %v2576_v30 = vld [vmem:[%s3862_s9 + $0x48] sm:$0xff] }
 0x2ac   : > { %v2260_v20 = vadd.f32 %v2259_v49, %v5919_v52 }
 0x2ad   : > { %v2600_v6 = vadd.f32 %v2568_v54, %v2298_v17  ;;  %2496 = vmatpush.msrb.mxu0 %v2133_v34  ;;  %3118 = vmatmul.msk.f32.gmra.mxu1 %vm1414_vm3, %v5771_v58  ;;  %2684 = vst [vmem:[%s5916_s23 + $0x58] sm:$0xff] %v2652_v55 }
 0x2ae   : > { %v2603_v48 = vadd.f32 %v2571_v43, %v2260_v20  ;;  %3254 = vmatpush.msra.mxu1 %v2133_v34  ;;  %3137 = vmatmul.msk.f32.gmra.mxu2 %vm1414_vm3, %v5691_v57  ;;  %v2388_v32 = vpop.f32.mrf.mxu2 }
 0x2af   : > { %v2642_v22 = vmul.f32 %v5964_v35, %v2600_v6  ;;  %2497 = vmatpush.msrb.mxu0 %v2125_v45  ;;  %v2389_v18 = vadd.f32 %v2388_v32, %v5975_v62  ;;  %v2590_v6 = vld [vmem:[%s3862_s9 + $0xb8] sm:$0xff] }
 0x2b0   : > { %v2645_v5 = vmul.f32 %v5935_v4, %v2603_v48  ;;  %3255 = vmatpush.msra.mxu1 %v2125_v45 }
 0x2b1   : > { %2674 = vst [vmem:[%s5916_s23 + $0x8] sm:$0xff] %v2642_v22  ;;  %2498 = vmatpush.msrb.mxu0 %v2117_v26  ;;  %v2614_v19 = vadd.f32 %v2582_v53, %v2389_v18  ;;  %v2577_v22 = vld [vmem:[%s3862_s9 + $0x50] sm:$0xff]  ;;  %v2580_v53 = vld [vmem:[%s3862_s9 + $0x68] sm:$0xff] }
 0x2b2   : > { %v2338_v10 = vpop.f32.mrf.mxu0  ;;  %2677 = vst [vmem:[%s5916_s23 + $0x20] sm:$0xff] %v2645_v5  ;;  %3256 = vmatpush.msra.mxu1 %v2117_v26  ;;  %v2300_v21 = vpop.f32.mrf.mxu3 }
 0x2b3   : > { %v2339_v50 = vadd.f32 %v2338_v10, %v5901_v44  ;;  %v2301_v41 = vadd.f32 %v2300_v21, %v5919_v52  ;;  %2499 = vmatpush.msrb.mxu0 %v2109_v59  ;;  %v2262_v15 = vpop.f32.mrf.mxu1  ;;  %v2656_v0 = vmul.f32 %v5908_v1, %v2614_v19  ;;  %v2583_v10 = vld [vmem:[%s3862_s9 + $0x80] sm:$0xff] }
 0x2b4   : > { %3257 = vmatpush.msra.mxu1 %v2109_v59  ;;  %v2263_v11 = vadd.f32 %v2262_v15, %v5942_v27 }
 0x2b5   : > { %v2601_v61 = vadd.f32 %v2569_v24, %v2339_v50  ;;  %v2604_v2 = vadd.f32 %v2572_v28, %v2301_v41  ;;  %2500 = vmatpush.msrb.mxu0 %v2101_v7  ;;  %2688 = vst [vmem:[%s5916_s23 + $0x78] sm:$0xff] %v2656_v0  ;;  %v6046_v41 = vpop.permute.xlu0 %2207  ;;  %v2594_v0 = vld [vmem:[%s3862_s9 + $0xd8] sm:$0xff] }
 0x2b6   : > { %v2607_v16 = vadd.f32 %v2575_v36, %v2263_v11  ;;  %3258 = vmatpush.msra.mxu1 %v2101_v7  ;;  %3127 = vmatmul.msk.f32.vlgmr.msrb.gmra.mxu0 %vm1414_vm3, %v5665_v40  ;;  %v2391_v8 = vpop.f32.mrf.mxu2 }
 0x2b7   : > { %v2643_v29 = vmul.f32 %v5990_v9, %v2601_v61  ;;  %v2646_v37 = vmul.f32 %v5964_v35, %v2604_v2  ;;  %3134 = vmatmul.msk.f32.vlgmr.msra.gmra.mxu1 %vm1414_vm3, %v5771_v58  ;;  %3138 = vmatmul.msk.f32.gmra.mxu2 %vm1414_vm3, %v5715_v63  ;;  %v2392_v3 = vadd.f32 %v2391_v8, %v6000_v13 }
 0x2b8   : > { %v2649_v33 = vmul.f32 %v5935_v4, %v2607_v16 }
 0x2b9   : > { %2675 = vst [vmem:[%s5916_s23 + $0x10] sm:$0xff] %v2643_v29  ;;  %v2618_v60 = vadd.f32 %v2586_v46, %v2392_v3  ;;  %v2581_v29 = vld [vmem:[%s3862_s9 + $0x70] sm:$0xff]  ;;  %v2587_v3 = vld [vmem:[%s3862_s9 + $0xa0] sm:$0xff] }
 0x2ba   : > { %2678 = vst [vmem:[%s5916_s23 + $0x28] sm:$0xff] %v2646_v37  ;;  %v2341_v40 = vpop.f32.mrf.mxu0  ;;  %v2303_v14 = vpop.f32.mrf.mxu3  ;;  %v2584_v37 = vld [vmem:[%s3862_s9 + $0x88] sm:$0xff] }
 0x2bb   : > { %2681 = vst [vmem:[%s5916_s23 + $0x40] sm:$0xff] %v2649_v33  ;;  %v2342_v58 = vadd.f32 %v2341_v40, %v5919_v52  ;;  %v2304_v47 = vadd.f32 %v2303_v14, %v5942_v27  ;;  %v2265_v54 = vpop.f32.mrf.mxu1  ;;  %v2660_v34 = vmul.f32 %v5908_v1, %v2618_v60 }
 0x2bc   : > { %v2266_v49 = vadd.f32 %v2265_v54, %v5975_v62 }
 0x2bd   : > { %v2605_v17 = vadd.f32 %v2573_v42, %v2342_v58  ;;  %v2608_v43 = vadd.f32 %v2576_v30, %v2304_v47  ;;  %2692 = vst [vmem:[%s5916_s23 + $0x98] sm:$0xff] %v2660_v34  ;;  %v6068_v47 = vpop.permute.xlu1 %2212  ;;  %v2598_v34 = vld [vmem:[%s3862_s9 + $0xf8] sm:$0xff] }
 0x2be   : > { %v2611_v20 = vadd.f32 %v2579_v23, %v2266_v49  ;;  %3128 = vmatmul.msk.f32.gmra.mxu0 %vm1414_vm3, %v5675_v25  ;;  %v2394_v45 = vpop.f32.mrf.mxu2 }
 0x2bf   : > { %v2647_v55 = vmul.f32 %v5990_v9, %v2605_v17  ;;  %v2650_v39 = vmul.f32 %v5964_v35, %v2608_v43  ;;  %3139 = vmatmul.msk.f32.gmra.mxu2 %vm1414_vm3, %v5729_v31  ;;  %v2395_v12 = vadd.f32 %v2394_v45, %v6024_v51 }
 0x2c0   : > { %v2653_v48 = vmul.f32 %v5935_v4, %v2611_v20 }
 0x2c1   : > { %2679 = vst [vmem:[%s5916_s23 + $0x30] sm:$0xff] %v2647_v55  ;;  %v2622_v25 = vadd.f32 %v2590_v6, %v2395_v12  ;;  %v2585_v55 = vld [vmem:[%s3862_s9 + $0x90] sm:$0xff]  ;;  %v2591_v12 = vld [vmem:[%s3862_s9 + $0xc0] sm:$0xff] }
 0x2c2   : > { %2682 = vst [vmem:[%s5916_s23 + $0x48] sm:$0xff] %v2650_v39  ;;  %v2344_v26 = vpop.f32.mrf.mxu0  ;;  %v2306_v32 = vpop.f32.mrf.mxu3  ;;  %v2588_v39 = vld [vmem:[%s3862_s9 + $0xa8] sm:$0xff] }
 0x2c3   : > { %2685 = vst [vmem:[%s5916_s23 + $0x60] sm:$0xff] %v2653_v48  ;;  %v2345_v5 = vadd.f32 %v2344_v26, %v5942_v27  ;;  %v2307_v18 = vadd.f32 %v2306_v32, %v5975_v62  ;;  %v2268_v59 = vpop.f32.mrf.mxu1  ;;  %v2664_v24 = vmul.f32 %v5908_v1, %v2622_v25 }
 0x2c4   : > { %v2269_v21 = vadd.f32 %v2268_v59, %v6000_v13 }
 0x2c5   : > { %v2609_v19 = vadd.f32 %v2577_v22, %v2345_v5  ;;  %v2612_v28 = vadd.f32 %v2580_v53, %v2307_v18  ;;  %2696 = vst [vmem:[%s5916_s23 + $0xb8] sm:$0xff] %v2664_v24 }
 0x2c6   : > { %v2615_v7 = vadd.f32 %v2583_v10, %v2269_v21  ;;  %3129 = vmatmul.msk.f32.gmra.mxu0 %vm1414_vm3, %v5691_v57  ;;  %v2397_v36 = vpop.f32.mrf.mxu2  ;;  %v2589_v10 = vld [vmem:[%s3862_s9 + $0xb0] sm:$0xff] }
 0x2c7   : > { %v2651_v50 = vmul.f32 %v5990_v9, %v2609_v19  ;;  %v2654_v15 = vmul.f32 %v5964_v35, %v2612_v28  ;;  %3140 = vmatmul.msk.f32.gmra.mxu2 %vm1414_vm3, %v5741_v38  ;;  %v2398_v11 = vadd.f32 %v2397_v36, %v6046_v41  ;;  %v2592_v19 = vld [vmem:[%s3862_s9 + $0xc8] sm:$0xff] }
 0x2c8   : > { %v2657_v61 = vmul.f32 %v5935_v4, %v2615_v7 }
 0x2c9   : > { %2683 = vst [vmem:[%s5916_s23 + $0x50] sm:$0xff] %v2651_v50  ;;  %v2626_v57 = vadd.f32 %v2594_v0, %v2398_v11  ;;  %v2595_v50 = vld [vmem:[%s3862_s9 + $0xe0] sm:$0xff] }
 0x2ca   : > { %2686 = vst [vmem:[%s5916_s23 + $0x68] sm:$0xff] %v2654_v15  ;;  %v2347_v2 = vpop.f32.mrf.mxu0  ;;  %v2309_v16 = vpop.f32.mrf.mxu3 }
 0x2cb   : > { %2689 = vst [vmem:[%s5916_s23 + $0x80] sm:$0xff] %v2657_v61  ;;  %v2348_v8 = vadd.f32 %v2347_v2, %v5975_v62  ;;  %v2310_v46 = vadd.f32 %v2309_v16, %v6000_v13  ;;  %v2271_v33 = vpop.f32.mrf.mxu1  ;;  %v2668_v40 = vmul.f32 %v5908_v1, %v2626_v57  ;;  %v2593_v57 = vld [vmem:[%s3862_s9 + $0xd0] sm:$0xff] }
 0x2cc   : > { %v2272_v60 = vadd.f32 %v2271_v33, %v6024_v51 }
 0x2cd   : > { %v2613_v42 = vadd.f32 %v2581_v29, %v2348_v8  ;;  %v2616_v14 = vadd.f32 %v2584_v37, %v2310_v46  ;;  %2700 = vst [vmem:[%s5916_s23 + $0xd8] sm:$0xff] %v2668_v40  ;;  %v2596_v37 = vld [vmem:[%s3862_s9 + $0xe8] sm:$0xff] }
 0x2ce   : > { %v2619_v58 = vadd.f32 %v2587_v3, %v2272_v60  ;;  %3130 = vmatmul.msk.f32.gmra.mxu0 %vm1414_vm3, %v5715_v63  ;;  %v2400_v23 = vpop.f32.mrf.mxu2  ;;  %v6119_v40 = vld [vmem:[%s3870_s20 + $0x4] sm:$0xf]  ;;  %v2597_v60 = vld [vmem:[%s3862_s9 + $0xf0] sm:$0xff] }
 0x2cf   : > { %v2655_v30 = vmul.f32 %v5990_v9, %v2613_v42  ;;  %v2658_v54 = vmul.f32 %v5964_v35, %v2616_v14  ;;  %3141 = vmatmul.msk.f32.gmra.mxu2 %vm1414_vm3, %v5755_v56  ;;  %v2401_v49 = vadd.f32 %v2400_v23, %v6068_v47 }
 0x2d0   : > { %v2661_v17 = vmul.f32 %v5935_v4, %v2619_v58 }
 0x2d1   : > { %2687 = vst [vmem:[%s5916_s23 + $0x70] sm:$0xff] %v2655_v30  ;;  %v2630_v63 = vadd.f32 %v2598_v34, %v2401_v49  ;;  %v3144_v30 = vld [vmem:[%s3862_s9 + $0x108] sm:$0xff] }
 0x2d2   : > { %2690 = vst [vmem:[%s5916_s23 + $0x88] sm:$0xff] %v2658_v54  ;;  %v2350_v43 = vpop.f32.mrf.mxu0  ;;  %v2312_v20 = vpop.f32.mrf.mxu3 }
 0x2d3   : > { %2693 = vst [vmem:[%s5916_s23 + $0xa0] sm:$0xff] %v2661_v17  ;;  %v2351_v45 = vadd.f32 %v2350_v43, %v6000_v13  ;;  %v2313_v6 = vadd.f32 %v2312_v20, %v6024_v51  ;;  %v2274_v48 = vpop.f32.mrf.mxu1  ;;  %v2672_v26 = vmul.f32 %v5908_v1, %v2630_v63  ;;  %v3143_v43 = vld [vmem:[%s3862_s9 + $0x100] sm:$0xff]  ;;  %v3148_v63 = vld [vmem:[%s3862_s9 + $0x128] sm:$0xff] }
 0x2d4   : > { %v2275_v25 = vadd.f32 %v2274_v48, %v6046_v41 }
 0x2d5   : > { %v2617_v22 = vadd.f32 %v2585_v55, %v2351_v45  ;;  %v2620_v32 = vadd.f32 %v2588_v39, %v2313_v6  ;;  %2704 = vst [vmem:[%s5916_s23 + $0xf8] sm:$0xff] %v2672_v26  ;;  %v6137_v39 = vperm.slane %v6119_v40, 0 }
 0x2d6   : > { %v2623_v5 = vadd.f32 %v2591_v12, %v2275_v25  ;;  %3131 = vmatmul.msk.f32.gmra.mxu0 %vm1414_vm3, %v5729_v31 }
 0x2d7   : > { %v2659_v53 = vmul.f32 %v5990_v9, %v2617_v22  ;;  %v2662_v18 = vmul.f32 %v5964_v35, %v2620_v32  ;;  %v3147_v22 = vld [vmem:[%s3862_s9 + $0x120] sm:$0xff]  ;;  %v3152_v32 = vld [vmem:[%s3862_s9 + $0x148] sm:$0xff] }
 0x2d8   : > { %v2665_v59 = vmul.f32 %v5935_v4, %v2623_v5 }
 0x2d9   : > { %2691 = vst [vmem:[%s5916_s23 + $0x90] sm:$0xff] %v2659_v53 }
 0x2da   : > { %2694 = vst [vmem:[%s5916_s23 + $0xa8] sm:$0xff] %v2662_v18  ;;  %v2353_v1 = vpop.f32.mrf.mxu0  ;;  %v2315_v24 = vpop.f32.mrf.mxu3 }
 0x2db   : > { %2697 = vst [vmem:[%s5916_s23 + $0xc0] sm:$0xff] %v2665_v59  ;;  %v2354_v21 = vadd.f32 %v2353_v1, %v6024_v51  ;;  %v2316_v28 = vadd.f32 %v2315_v24, %v6046_v41  ;;  %v2277_v31 = vpop.f32.mrf.mxu1 }
 0x2dc   : > { %v2278_v15 = vadd.f32 %v2277_v31, %v6068_v47 }
 0x2dd   : > { %v2621_v7 = vadd.f32 %v2589_v10, %v2354_v21  ;;  %v2624_v36 = vadd.f32 %v2592_v19, %v2316_v28  ;;  %v3151_v19 = vld [vmem:[%s3862_s9 + $0x140] sm:$0xff]  ;;  %v3156_v28 = vld [vmem:[%s3862_s9 + $0x168] sm:$0xff] }
 0x2de   : > { %v2627_v61 = vadd.f32 %v2595_v50, %v2278_v15  ;;  %3132 = vmatmul.msk.f32.gmra.mxu0 %vm1414_vm3, %v5741_v38 }
 0x2df   : > { %v2663_v0 = vmul.f32 %v5990_v9, %v2621_v7  ;;  %v2666_v11 = vmul.f32 %v5964_v35, %v2624_v36 }
 0x2e0   : > { %v2669_v2 = vmul.f32 %v5935_v4, %v2627_v61 }
 0x2e1   : > { %2695 = vst [vmem:[%s5916_s23 + $0xb0] sm:$0xff] %v2663_v0 }
 0x2e2   : > { %2698 = vst [vmem:[%s5916_s23 + $0xc8] sm:$0xff] %v2666_v11  ;;  %v2356_v29 = vpop.f32.mrf.mxu0  ;;  %v2318_v16 = vpop.f32.mrf.mxu3  ;;  %v3155_v11 = vld [vmem:[%s3862_s9 + $0x160] sm:$0xff] }
 0x2e3   : > { %2701 = vst [vmem:[%s5916_s23 + $0xe0] sm:$0xff] %v2669_v2  ;;  %v2357_v8 = vadd.f32 %v2356_v29, %v6046_v41  ;;  %v2319_v38 = vadd.f32 %v2318_v16, %v6068_v47  ;;  %v3160_v29 = vld [vmem:[%s3862_s9 + $0x188] sm:$0xff] }
 0x2e5   : > { %v2625_v46 = vadd.f32 %v2593_v57, %v2357_v8  ;;  %v2628_v33 = vadd.f32 %v2596_v37, %v2319_v38 }
 0x2e6   : > { %3133 = vmatmul.msk.f32.gmra.mxu0 %vm1414_vm3, %v5755_v56  ;;  %v6127_v56 = vperm.slane %v6119_v40, 1 }
 0x2e7   : > { %v2667_v3 = vmul.f32 %v5990_v9, %v2625_v46  ;;  %v2670_v4 = vmul.f32 %v5964_v35, %v2628_v33 }
 0x2e9   : > { %2699 = vst [vmem:[%s5916_s23 + $0xd0] sm:$0xff] %v2667_v3  ;;  %v3164_v3 = vld [vmem:[%s3862_s9 + $0x1a8] sm:$0xff] }
 0x2ea   : > { %2702 = vst [vmem:[%s5916_s23 + $0xe8] sm:$0xff] %v2670_v4  ;;  %v2359_v42 = vpop.f32.mrf.mxu0  ;;  %v2461_v14 = vpop.f32.mrf.mxu3 }
 0x2eb   : > { %v2360_v58 = vadd.f32 %v2359_v42, %v6068_v47  ;;  %v2462_v54 = vadd.f32 %v2461_v14, %v5901_v44  ;;  %v3159_v42 = vld [vmem:[%s3862_s9 + $0x180] sm:$0xff] }
 0x2ed   : > { %v2629_v23 = vadd.f32 %v2597_v60, %v2360_v58  ;;  %v2738_v35 = vadd.f32 %v3144_v30, %v2462_v54 }
 0x2ef   : > { %v2671_v34 = vmul.f32 %v5990_v9, %v2629_v23  ;;  %v2781_v17 = vmul.f32 %v6127_v56, %v2738_v35 }
 0x2f1   : > { %2703 = vst [vmem:[%s5916_s23 + $0xf0] sm:$0xff] %v2671_v34  ;;  %v3168_v34 = vld [vmem:[%s3862_s9 + $0x1c8] sm:$0xff] }
 0x2f2   : > { %3177 = vst [vmem:[%s5916_s23 + $0x108] sm:$0xff] %v2781_v17  ;;  %v2420_v49 = vpop.f32.mrf.mxu1  ;;  %v2464_v55 = vpop.f32.mrf.mxu3 }
 0x2f3   : > { %v2421_v20 = vadd.f32 %v2420_v49, %v5901_v44  ;;  %v2465_v45 = vadd.f32 %v2464_v55, %v5919_v52  ;;  %v3163_v49 = vld [vmem:[%s3862_s9 + $0x1a0] sm:$0xff] }
 0x2f5   : > { %v2737_v6 = vadd.f32 %v3143_v43, %v2421_v20  ;;  %v2742_v9 = vadd.f32 %v3148_v63, %v2465_v45 }
 0x2f7   : > { %v2780_v48 = vmul.f32 %v6137_v39, %v2737_v6  ;;  %v2785_v12 = vmul.f32 %v6127_v56, %v2742_v9 }
 0x2f9   : > { %3176 = vst [vmem:[%s5916_s23 + $0x100] sm:$0xff] %v2780_v48  ;;  %v3146_v48 = vld [vmem:[%s3862_s9 + $0x118] sm:$0xff] }
 0x2fa   : > { %3181 = vst [vmem:[%s5916_s23 + $0x128] sm:$0xff] %v2785_v12  ;;  %v2423_v26 = vpop.f32.mrf.mxu1  ;;  %v2467_v25 = vpop.f32.mrf.mxu3 }
 0x2fb   : > { %v2424_v53 = vadd.f32 %v2423_v26, %v5919_v52  ;;  %v2468_v5 = vadd.f32 %v2467_v25, %v5942_v27  ;;  %v3172_v26 = vld [vmem:[%s3862_s9 + $0x1e8] sm:$0xff]  ;;  %v6188_v25 = vperm.slane %v6119_v40, 3 }
 0x2fd   : > { %v2741_v18 = vadd.f32 %v3147_v22, %v2424_v53  ;;  %v2746_v59 = vadd.f32 %v3152_v32, %v2468_v5  ;;  %v3167_v5 = vld [vmem:[%s3862_s9 + $0x1c0] sm:$0xff] }
 0x2ff   : > { %v2784_v1 = vmul.f32 %v6137_v39, %v2741_v18  ;;  %v2789_v10 = vmul.f32 %v6127_v56, %v2746_v59 }
 0x301   : > { %3180 = vst [vmem:[%s5916_s23 + $0x120] sm:$0xff] %v2784_v1 }
 0x302   : > { %3185 = vst [vmem:[%s5916_s23 + $0x148] sm:$0xff] %v2789_v10  ;;  %v2426_v24 = vpop.f32.mrf.mxu1  ;;  %v2470_v21 = vpop.f32.mrf.mxu3 }
 0x303   : > { %v2427_v31 = vadd.f32 %v2426_v24, %v5942_v27  ;;  %v2471_v50 = vadd.f32 %v2470_v21, %v5975_v62 }
 0x305   : > { %v2745_v7 = vadd.f32 %v3151_v19, %v2427_v31  ;;  %v2750_v15 = vadd.f32 %v3156_v28, %v2471_v50  ;;  %v3150_v31 = vld [vmem:[%s3862_s9 + $0x138] sm:$0xff] }
 0x307   : > { %v2788_v36 = vmul.f32 %v6137_v39, %v2745_v7  ;;  %v2793_v0 = vmul.f32 %v6127_v56, %v2750_v15  ;;  %v3174_v15 = vld [vmem:[%s3862_s9 + $0x1f8] sm:$0xff] }
 0x309   : > { %3184 = vst [vmem:[%s5916_s23 + $0x140] sm:$0xff] %v2788_v36 }
 0x30a   : > { %3189 = vst [vmem:[%s5916_s23 + $0x168] sm:$0xff] %v2793_v0  ;;  %v2429_v61 = vpop.f32.mrf.mxu1  ;;  %v2473_v2 = vpop.f32.mrf.mxu3  ;;  %v3171_v0 = vld [vmem:[%s3862_s9 + $0x1e0] sm:$0xff] }
 0x30b   : > { %v2430_v57 = vadd.f32 %v2429_v61, %v5975_v62  ;;  %v2474_v16 = vadd.f32 %v2473_v2, %v6000_v13 }
 0x30d   : > { %v2749_v37 = vadd.f32 %v3155_v11, %v2430_v57  ;;  %v2754_v8 = vadd.f32 %v3160_v29, %v2474_v16 }
 0x30f   : > { %v2792_v38 = vmul.f32 %v6137_v39, %v2749_v37  ;;  %v2797_v46 = vmul.f32 %v6127_v56, %v2754_v8 }
 0x311   : > { %3188 = vst [vmem:[%s5916_s23 + $0x160] sm:$0xff] %v2792_v38  ;;  %v3154_v38 = vld [vmem:[%s3862_s9 + $0x158] sm:$0xff] }
 0x312   : > { %3193 = vst [vmem:[%s5916_s23 + $0x188] sm:$0xff] %v2797_v46  ;;  %v2476_v33 = vpop.f32.mrf.mxu3  ;;  %v2432_v4 = vpop.f32.mrf.mxu1 }
 0x313   : > { %v2477_v60 = vadd.f32 %v2476_v33, %v6024_v51  ;;  %v2433_v14 = vadd.f32 %v2432_v4, %v6000_v13 }
 0x315   : > { %v2758_v30 = vadd.f32 %v3164_v3, %v2477_v60  ;;  %v2753_v58 = vadd.f32 %v3159_v42, %v2433_v14  ;;  %v3145_v3 = vld [vmem:[%s3862_s9 + $0x110] sm:$0xff]  ;;  %v6216_v42 = vperm.slane %v6119_v40, 2 }
 0x317   : > { %v2801_v54 = vmul.f32 %v6127_v56, %v2758_v30  ;;  %v2796_v23 = vmul.f32 %v6137_v39, %v2753_v58 }
 0x319   : > { %3197 = vst [vmem:[%s5916_s23 + $0x1a8] sm:$0xff] %v2801_v54 }
 0x31a   : > { %3192 = vst [vmem:[%s5916_s23 + $0x180] sm:$0xff] %v2796_v23  ;;  %v2479_v35 = vpop.f32.mrf.mxu3  ;;  %v2435_v17 = vpop.f32.mrf.mxu1 }
 0x31b   : > { %v2480_v43 = vadd.f32 %v2479_v35, %v6046_v41  ;;  %v2436_v55 = vadd.f32 %v2435_v17, %v6024_v51 }
 0x31d   : > { %v2762_v63 = vadd.f32 %v3168_v34, %v2480_v43  ;;  %v2757_v20 = vadd.f32 %v3163_v49, %v2436_v55  ;;  %v3158_v34 = vld [vmem:[%s3862_s9 + $0x178] sm:$0xff]  ;;  %v3149_v49 = vld [vmem:[%s3862_s9 + $0x130] sm:$0xff] }
 0x31f   : > { %v2805_v45 = vmul.f32 %v6127_v56, %v2762_v63  ;;  %v2800_v6 = vmul.f32 %v6137_v39, %v2757_v20 }
 0x321   : > { %3201 = vst [vmem:[%s5916_s23 + $0x1c8] sm:$0xff] %v2805_v45  ;;  %v2543_v9 = vpop.f32.mrf.mxu2 }
 0x322   : > { %3196 = vst [vmem:[%s5916_s23 + $0x1a0] sm:$0xff] %v2800_v6  ;;  %v2482_v12 = vpop.f32.mrf.mxu3  ;;  %v2544_v22 = vadd.f32 %v2543_v9, %v5901_v44  ;;  %v2438_v53 = vpop.f32.mrf.mxu1  ;;  %v3162_v9 = vld [vmem:[%s3862_s9 + $0x198] sm:$0xff] }
 0x323   : > { %v2483_v32 = vadd.f32 %v2482_v12, %v6068_v47  ;;  %v2439_v18 = vadd.f32 %v2438_v53, %v6046_v41 }
 0x324   : > { %v2740_v59 = vadd.f32 %v3146_v48, %v2544_v22 }
 0x325   : > { %v2766_v1 = vadd.f32 %v3172_v26, %v2483_v32  ;;  %v2761_v10 = vadd.f32 %v3167_v5, %v2439_v18  ;;  %v3153_v26 = vld [vmem:[%s3862_s9 + $0x150] sm:$0xff] }
 0x326   : > { %v2783_v24 = vmul.f32 %v6188_v25, %v2740_v59  ;;  %v3166_v59 = vld [vmem:[%s3862_s9 + $0x1b8] sm:$0xff] }
 0x327   : > { %v2809_v19 = vmul.f32 %v6127_v56, %v2766_v1  ;;  %v2804_v21 = vmul.f32 %v6137_v39, %v2761_v10 }
 0x328   : > { %3179 = vst [vmem:[%s5916_s23 + $0x118] sm:$0xff] %v2783_v24  ;;  %v3157_v24 = vld [vmem:[%s3862_s9 + $0x170] sm:$0xff] }
 0x329   : > { %3205 = vst [vmem:[%s5916_s23 + $0x1e8] sm:$0xff] %v2809_v19  ;;  %v2546_v28 = vpop.f32.mrf.mxu2 }
 0x32a   : > { %3200 = vst [vmem:[%s5916_s23 + $0x1c0] sm:$0xff] %v2804_v21  ;;  %v2547_v50 = vadd.f32 %v2546_v28, %v5919_v52  ;;  %v2441_v36 = vpop.f32.mrf.mxu1 }
 0x32b   : > { %v2564_v7 = vpop.f32.mrf.mxu3  ;;  %v2442_v61 = vadd.f32 %v2441_v36, %v6068_v47 }
 0x32c   : > { %v2565_v56 = vadd.f32 %v2564_v7, %v6068_v47  ;;  %v2744_v11 = vadd.f32 %v3150_v31, %v2547_v50  ;;  %v3170_v7 = vld [vmem:[%s3862_s9 + $0x1d8] sm:$0xff] }
 0x32d   : > { %v2765_v29 = vadd.f32 %v3171_v0, %v2442_v61  ;;  %v3161_v0 = vld [vmem:[%s3862_s9 + $0x190] sm:$0xff] }
 0x32e   : > { %v2768_v2 = vadd.f32 %v3174_v15, %v2565_v56  ;;  %v2787_v57 = vmul.f32 %v6188_v25, %v2744_v11 }
 0x32f   : > { %v2808_v37 = vmul.f32 %v6137_v39, %v2765_v29  ;;  %v3173_v39 = vld [vmem:[%s3862_s9 + $0x1f0] sm:$0xff] }
 0x330   : > { %v2811_v16 = vmul.f32 %v6188_v25, %v2768_v2  ;;  %3183 = vst [vmem:[%s5916_s23 + $0x138] sm:$0xff] %v2787_v57  ;;  %v3165_v57 = vld [vmem:[%s3862_s9 + $0x1b0] sm:$0xff] }
 0x331   : > { %v2549_v8 = vpop.f32.mrf.mxu2  ;;  %3204 = vst [vmem:[%s5916_s23 + $0x1e0] sm:$0xff] %v2808_v37 }
 0x332   : > { %3207 = vst [vmem:[%s5916_s23 + $0x1f8] sm:$0xff] %v2811_v16  ;;  %v2550_v46 = vadd.f32 %v2549_v8, %v5942_v27  ;;  %v3169_v8 = vld [vmem:[%s3862_s9 + $0x1d0] sm:$0xff] }
 0x333   : > { %v2502_v33 = vpop.f32.mrf.mxu0 }
 0x334   : > { %v2503_v4 = vadd.f32 %v2502_v33, %v5901_v44  ;;  %v2523_v60 = vpop.f32.mrf.mxu1  ;;  %v2748_v14 = vadd.f32 %v3154_v38, %v2550_v46 }
 0x335   : > { %v2524_v30 = vadd.f32 %v2523_v60, %v6068_v47 }
 0x336   : > { %v2739_v58 = vadd.f32 %v3145_v3, %v2503_v4  ;;  %v2791_v54 = vmul.f32 %v6188_v25, %v2748_v14 }
 0x337   : > { %v2767_v23 = vadd.f32 %v3173_v39, %v2524_v30 }
 0x338   : > { %v2782_v35 = vmul.f32 %v6216_v42, %v2739_v58  ;;  %3187 = vst [vmem:[%s5916_s23 + $0x158] sm:$0xff] %v2791_v54 }
 0x339   : > { %v2810_v44 = vmul.f32 %v6216_v42, %v2767_v23 }
 0x33a   : > { %3178 = vst [vmem:[%s5916_s23 + $0x110] sm:$0xff] %v2782_v35  ;;  %v2552_v40 = vpop.f32.mrf.mxu2 }
 0x33b   : > { %3206 = vst [vmem:[%s5916_s23 + $0x1f0] sm:$0xff] %v2810_v44  ;;  %v2553_v17 = vadd.f32 %v2552_v40, %v5975_v62  ;;  %v2505_v47 = vpop.f32.mrf.mxu0 }
 0x33c   : > { %v2506_v43 = vadd.f32 %v2505_v47, %v5919_v52 }
 0x33d   : > { %v2752_v55 = vadd.f32 %v3158_v34, %v2553_v17 }
 0x33e   : > { %v2743_v63 = vadd.f32 %v3149_v49, %v2506_v43 }
 0x33f   : > { %v2795_v20 = vmul.f32 %v6188_v25, %v2752_v55 }
 0x340   : > { %v2786_v45 = vmul.f32 %v6216_v42, %v2743_v63 }
 0x341   : > { %3191 = vst [vmem:[%s5916_s23 + $0x178] sm:$0xff] %v2795_v20 }
 0x342   : > { %3182 = vst [vmem:[%s5916_s23 + $0x130] sm:$0xff] %v2786_v45  ;;  %v2555_v6 = vpop.f32.mrf.mxu2 }
 0x343   : > { %v2556_v48 = vadd.f32 %v2555_v6, %v6000_v13  ;;  %v2508_v12 = vpop.f32.mrf.mxu0 }
 0x344   : > { %v2509_v52 = vadd.f32 %v2508_v12, %v5942_v27 }
 0x345   : > { %v2756_v22 = vadd.f32 %v3162_v9, %v2556_v48 }
 0x346   : > { %v2747_v32 = vadd.f32 %v3153_v26, %v2509_v52 }
 0x347   : > { %v2799_v53 = vmul.f32 %v6188_v25, %v2756_v22 }
 0x348   : > { %v2790_v5 = vmul.f32 %v6216_v42, %v2747_v32 }
 0x349   : > { %3195 = vst [vmem:[%s5916_s23 + $0x198] sm:$0xff] %v2799_v53 }
 0x34a   : > { %3186 = vst [vmem:[%s5916_s23 + $0x150] sm:$0xff] %v2790_v5  ;;  %v2558_v18 = vpop.f32.mrf.mxu2 }
 0x34b   : > { %v2559_v1 = vadd.f32 %v2558_v18, %v6024_v51  ;;  %v2511_v10 = vpop.f32.mrf.mxu0 }
 0x34c   : > { %v2512_v27 = vadd.f32 %v2511_v10, %v5975_v62 }
 0x34d   : > { %v2760_v19 = vadd.f32 %v3166_v59, %v2559_v1 }
 0x34e   : > { %v2751_v21 = vadd.f32 %v3157_v24, %v2512_v27 }
 0x34f   : > { %v2803_v28 = vmul.f32 %v6188_v25, %v2760_v19 }
 0x350   : > { %v2794_v31 = vmul.f32 %v6216_v42, %v2751_v21 }
 0x351   : > { %3199 = vst [vmem:[%s5916_s23 + $0x1b8] sm:$0xff] %v2803_v28 }
 0x352   : > { %3190 = vst [vmem:[%s5916_s23 + $0x170] sm:$0xff] %v2794_v31  ;;  %v2561_v50 = vpop.f32.mrf.mxu2 }
 0x353   : > { %v2562_v15 = vadd.f32 %v2561_v50, %v6046_v41  ;;  %v2514_v36 = vpop.f32.mrf.mxu0 }
 0x354   : > { %v2515_v62 = vadd.f32 %v2514_v36, %v6000_v13 }
 0x355   : > { %v2764_v56 = vadd.f32 %v3170_v7, %v2562_v15 }
 0x356   : > { %v2755_v61 = vadd.f32 %v3161_v0, %v2515_v62 }
 0x357   : > { %v2807_v11 = vmul.f32 %v6188_v25, %v2764_v56 }
 0x358   : > { %v2798_v2 = vmul.f32 %v6216_v42, %v2755_v61 }
 0x359   : > { %3203 = vst [vmem:[%s5916_s23 + $0x1d8] sm:$0xff] %v2807_v11 }
 0x35a   : > { %3194 = vst [vmem:[%s5916_s23 + $0x190] sm:$0xff] %v2798_v2 }
 0x35b   : > { %v2517_v29 = vpop.f32.mrf.mxu0 }
 0x35c   : > { %v2518_v16 = vadd.f32 %v2517_v29, %v6024_v51 }
 0x35e   : > { %v2759_v37 = vadd.f32 %v3165_v57, %v2518_v16 }
 0x360   : > { %v2802_v13 = vmul.f32 %v6216_v42, %v2759_v37 }
 0x362   : > { %3198 = vst [vmem:[%s5916_s23 + $0x1b0] sm:$0xff] %v2802_v13 }
 0x363   : > { %v2520_v25 = vpop.f32.mrf.mxu0 }
 0x364   : > { %v2521_v38 = vadd.f32 %v2520_v25, %v6046_v41 }
 0x366   : > { %v2763_v46 = vadd.f32 %v3169_v8, %v2521_v38 }
 0x368   : > { %v2806_v51 = vmul.f32 %v6216_v42, %v2763_v46 }
 0x36a   : > { %3202 = vst [vmem:[%s5916_s23 + $0x1d0] sm:$0xff] %v2806_v51 }
 0x36b   : > { %3641 = shalt.err (!%p3638_p9)
}
 0x36c   : > { %s3700_s13 = smov 512   ;;  %s3701_s30 = smov 32  }
 0x36d   : > { %3275 = dma.vmem_to_hbm [thread:$0]  (%p3804_p7), %s2860_s8, 8192, %s2862_s27, %s2846_s25, %s3700_s13, %s3700_s13, %s3701_s30  }
 0x36e PF: > { %s2876_s18 = sand.u32 1, %s3676_s21   ;;  %p6473_p12 = scmp.ge.s32.totalorder %s3688_s24, 2 }
 0x36f   : > { %s2877_s7 = scalar_lea.sflag [#allocation5], %s2876_s18 }
 0x370   : > { %p3289_p13 = pnand %p6473_p12, %p3772_p6 }
 0x372   : > { %p3290_p0 = pneg %p3289_p13 }
 0x374   : > { %3671 = dma.done.wait (%p3290_p0), %s2877_s7, 8192  }
 0x375   : > { %3673 = vsyncadd (%p3290_p0), %s2877_s7, 4294959104  ;;  %s6474_s24 = sld [smem:[#allocation16_spill]]  ;;  %s6477_s21 = smov %s3680_s22 }
 0x376   : > { %s6475_s10 = sld [smem:[#allocation14_spill]] }
 0x377   : > { %s6476_s23 = sld [smem:[#allocation17_spill]] }
 0x37b   : > { %p22_p3 = scmp.ge.s32.totalorder %s6474_s24, 4  }
 0x37c   : > { %s6478_s22 = smov %s6475_s10 }
 0x37d   :  { %24 = sbr.rel (!%p22_p3) target bundleno = 10 (0xa), region = 109 }
 0x382   :  { %2883 = vsyncpa [#allocation4], 1 }
 0x383   :  { %2885 = vsyncpa [#allocation4 + $0x1], 1 }
 0x384   :  { %2886 = vsyncpa [#allocation7], 1 }
 0x385   :  { %2888 = vsyncpa [#allocation7 + $0x1], 1 }
 0x386   :  { %2889 = vsyncpa [#allocation5], 1 }
 0x387   :  { %2891 = vsyncpa [#allocation5 + $0x1], 1 }

</bundles_post_ra>
